<compile_context>
chip_gen: v7x
topology: tpu7x:2x2x1
jax: 0.10.0
libtpu: 0.0.40
codegen_flags: <defaults>
</compile_context>

<pallas_src>
import functools

import numpy as np

import jax
import jax.numpy as jnp
from jax import lax
from jax.experimental import pallas as pl
from jax.experimental.pallas import tpu as pltpu

_EPS = 1e-5
_SLOPE = 0.2

_VMEM_LIMIT_CACHE = None


def _round_up(x, m):
    return ((x + m - 1) // m) * m


def _cdiv(a, b):
    return -(-a // b)


def _vmem_limit_bytes():
    """Generation-dependent scoped-VMEM limit (bigger on v5e/v6e, ~51MiB v7x)."""
    global _VMEM_LIMIT_CACHE
    if _VMEM_LIMIT_CACHE is None:
        try:
            cap = int(pltpu.get_tpu_info().vmem_capacity_bytes)
            limit = min(int(cap * 0.8), 110 * 1024 * 1024)
        except Exception:  # pragma: no cover - conservative fallback
            limit = 48 * 1024 * 1024
        _VMEM_LIMIT_CACHE = limit
    return _VMEM_LIMIT_CACHE


# ----------------------------------------------------------------------------
# Kernel: fused 4x4 conv (K-folded taps, group-shifted-window matmuls) + bias
#         (+ LeakyReLU when no InstanceNorm follows)
#         (+ masked per-channel sum / sum-of-squares partials when IN follows)
# ----------------------------------------------------------------------------
def _conv_kernel(x_ref, w_ref, b_ref, y_ref, *maybe_st_ref, nqi, nqj, th,
                 ow_pad, oh, ow, apply_lrelu, need_stats, slope=_SLOPE):
    # x_ref : (1, 1, th+qi_max, C, Kpk)  packed-phase row tile (bf16)
    # w_ref : (nqi*nqj, Kpk, OCp)        per-offset-group weight matrices (bf16)
    # b_ref : (1, OCp)                   bias (f32)
    # y_ref : (1, th, ow_pad, OCp)       conv output tile
    # st_ref: (1, 1, 2, OCp)             per-tile [sum, sum_sq] partials (f32)
    kpk = w_ref.shape[1]
    ocp = w_ref.shape[2]

    acc = jnp.zeros((th * ow_pad, ocp), jnp.float32)
    # Static unroll (<= 16 iterations; 4 for the stride-2 layers).  For very
    # large cp (>=256) a lax.fori_loop would bound window live ranges; not
    # needed at these channel counts.
    for qi in range(nqi):
        for qj in range(nqj):
            xs = x_ref[0, 0, pl.ds(qi, th), pl.ds(qj, ow_pad), :]
            xs = xs.reshape(th * ow_pad, kpk)        # ow_pad % 8 == 0 -> cheap
            acc = acc + jnp.dot(xs, w_ref[qi * nqj + qj],
                                preferred_element_type=jnp.float32)

    y2 = acc + b_ref[...]                            # (th*ow_pad, OCp) f32
    if apply_lrelu:
        y2 = jnp.where(y2 > 0, y2, slope * y2)
    y3 = y2.reshape(th, ow_pad, ocp)
    y_ref[0] = y3.astype(y_ref.dtype)

    if need_stats:
        st_ref = maybe_st_ref[0]
        row0 = pl.program_id(1) * th
        ridx = lax.broadcasted_iota(jnp.int32, (th, ow_pad, 1), 0)
        cidx = lax.broadcasted_iota(jnp.int32, (th, ow_pad, 1), 1)
        valid = ((row0 + ridx) < oh) & (cidx < ow)   # mask padded rows/cols
        yv = jnp.where(valid, y3, 0.0).reshape(th * ow_pad, ocp)
        st_ref[0, 0, pl.ds(0, 1), :] = jnp.sum(yv, axis=0, keepdims=True)
        st_ref[0, 0, pl.ds(1, 1), :] = jnp.sum(yv * yv, axis=0, keepdims=True)


def _conv_pallas(xt, wt, bb, *, th, ow_pad, oh, ow, nqi, nqj, apply_lrelu,
                 need_stats, out_dtype):
    N, n_ht, thh, C, kpk = xt.shape
    ng, _, ocp = wt.shape
    kernel = functools.partial(
        _conv_kernel, nqi=nqi, nqj=nqj, th=th, ow_pad=ow_pad, oh=oh, ow=ow,
        apply_lrelu=apply_lrelu, need_stats=need_stats)

    in_specs = [
        # One halo'd row tile per grid step (properly double-buffered).
        pl.BlockSpec((1, 1, thh, C, kpk), lambda n, t: (n, t, 0, 0, 0)),
        # Grid-constant weights / bias.
        # NOTE(perf, v7x): pipeline_mode=pl.Buffered(1) would single-buffer
        # these constant blocks; omitted for portability.
        pl.BlockSpec((ng, kpk, ocp), lambda n, t: (0, 0, 0)),
        pl.BlockSpec((1, ocp), lambda n, t: (0, 0)),
    ]
    out_shape = [jax.ShapeDtypeStruct((N, n_ht * th, ow_pad, ocp), out_dtype)]
    out_specs = [pl.BlockSpec((1, th, ow_pad, ocp), lambda n, t: (n, t, 0, 0))]
    if need_stats:
        out_shape.append(jax.ShapeDtypeStruct((N, n_ht, 2, ocp), jnp.float32))
        out_specs.append(
            pl.BlockSpec((1, 1, 2, ocp), lambda n, t: (n, t, 0, 0)))

    res = pl.pallas_call(
        kernel,
        out_shape=tuple(out_shape),
        grid_spec=pltpu.PrefetchScalarGridSpec(
            num_scalar_prefetch=0,
            grid=(N, n_ht),
            in_specs=in_specs,
            out_specs=tuple(out_specs)),
        compiler_params=pltpu.CompilerParams(
            dimension_semantics=("parallel", "parallel"),
            vmem_limit_bytes=_vmem_limit_bytes()),
    )(xt, wt, bb)
    if need_stats:
        return res[0], res[1]
    return res[0], None


# ----------------------------------------------------------------------------
# JAX glue for one conv layer: pad, packed-phase repack, halo row tiles,
# weight repack (taps folded into K), optional InstanceNorm apply (fused jnp).
# ----------------------------------------------------------------------------
def _conv_layer(x_nhwc, w_oihw, bias, stride, use_in, use_lrelu, *, tile_rows,
                final):
    N, H, W, cin = x_nhwc.shape
    oc, ic, kh, kw = w_oihw.shape
    assert ic == cin, (ic, cin)
    s, pad = stride, 1
    assert kh % s == 0 and kw % s == 0
    oh = (H + 2 * pad - kh) // s + 1
    ow = (W + 2 * pad - kw) // s + 1
    nqi, nqj = kh // s, kw // s
    qi_max, qj_max = nqi - 1, nqj - 1

    # Row tiling: >= 2 tiles per sample when possible (both v7x TCs get work).
    n_target = min(oh, max(2, _cdiv(oh, tile_rows)))
    th = _cdiv(oh, n_target)
    n_ht = _cdiv(oh, th)
    oh_pad = n_ht * th
    ow_pad = _round_up(ow, 8)            # sublane-aligned output columns

    # Minimal channel pad so the packed contraction dim (s*s*cp) is a multiple
    # of 8 -- no 16x lane inflation for the small-channel first layer.
    cp = _round_up(cin, 8) if s == 1 else _round_up(cin, max(1, 8 // (s * s)))
    kpk = s * s * cp
    R, C = oh_pad + qi_max, ow_pad + qj_max
    Hp, Wp = s * R, s * C

    xb = jnp.pad(x_nhwc.astype(jnp.bfloat16),
                 ((0, 0), (pad, Hp - H - pad), (pad, Wp - W - pad),
                  (0, cp - cin)))
    # Packed-phase ("pixel-unshuffle") view: the s*s phases' channels sit side
    # by side in the last dim, so each (qi,qj) offset group is a single matmul
    # with K = s*s*cp (taps folded into the contraction dim).
    xph = xb.reshape(N, R, s, C, s, cp).transpose(0, 1, 3, 2, 4, 5)
    xph = xph.reshape(N, R, C, kpk)
    # Row tiles with a qi_max-row halo (tiny HBM duplication) so the Pallas
    # input block is one small tile instead of the whole resident sample.
    rows = np.arange(n_ht)[:, None] * th + np.arange(th + qi_max)[None, :]
    xt = xph[:, rows]                    # (N, n_ht, th+qi_max, C, Kpk)

    # Weights: (OC, IC, KH, KW) -> (n_groups, s*s*cp, OCp), taps folded into K.
    ocp = _round_up(oc, 128)
    wt = jnp.transpose(w_oihw, (2, 3, 1, 0))              # (kh, kw, ic, oc)
    wt = jnp.pad(wt, ((0, 0), (0, 0), (0, cp - ic), (0, ocp - oc)))
    wt = wt.reshape(nqi, s, nqj, s, cp, ocp).transpose(0, 2, 1, 3, 4, 5)
    wt = wt.reshape(nqi * nqj, kpk, ocp).astype(jnp.bfloat16)
    bb = jnp.pad(bias.astype(jnp.float32), (0, ocp - oc)).reshape(1, ocp)

    out_dtype = jnp.float32 if final else jnp.bfloat16
    y, stats = _conv_pallas(
        xt, wt, bb, th=th, ow_pad=ow_pad, oh=oh, ow=ow, nqi=nqi, nqj=nqj,
        apply_lrelu=(use_lrelu and not use_in), need_stats=use_in,
        out_dtype=out_dtype)

    # Drop padded rows / cols / channels (fused into the next layer's repack).
    y = y[:, :oh, :ow, :oc]

    if use_in:
        # Tiny cross-tile reduction of the in-kernel partial sums, then the
        # normalize + LeakyReLU is plain jnp (XLA fuses it with the repack;
        # no standalone mem-bound Pallas pass).
        sums = jnp.sum(stats, axis=1)                     # (N, 2, OCp)
        cnt = float(oh * ow)
        mean = sums[:, 0, :oc] / cnt                      # (N, OC)
        var = jnp.maximum(sums[:, 1, :oc] / cnt - mean * mean, 0.0)
        rstd = lax.rsqrt(var + _EPS)
        yf = (y.astype(jnp.float32) - mean[:, None, None, :]) \
            * rstd[:, None, None, :]
        if use_lrelu:
            yf = jnp.where(yf > 0, yf, _SLOPE * yf)
        y = yf.astype(out_dtype)
    return y


# ----------------------------------------------------------------------------
# Discriminator: parameter construction + forward
# ----------------------------------------------------------------------------
def init_discriminator_params(key, input_nc, ndf, n_layers):
    """Deterministic synthetic weights; shapes follow the PyTorch __init__.

    Returns (params, configs): params is an arrays-only pytree (jit-friendly);
    configs is a static tuple of (stride, use_in, use_lrelu) per layer.
    """
    layer_defs = [(input_nc, ndf, 2, False, True)]
    mult = ndf
    for i in range(1, n_layers):
        mult_prev = mult
        mult = min(2 ** i, 8) * ndf
        layer_defs.append((mult_prev, mult, 2, True, True))
    mult_prev = mult
    mult = min(2 ** n_layers, 8)          # reproduces the original (no * ndf)
    layer_defs.append((mult_prev, mult, 1, True, True))
    layer_defs.append((mult, 1, 1, False, False))

    params, configs = [], []
    for (in_c, out_c, stride, use_in, use_lrelu) in layer_defs:
        key, kw_key, kb_key = jax.random.split(key, 3)
        w = jax.random.normal(kw_key, (out_c, in_c, 4, 4), jnp.float32) * 0.05
        b = jax.random.normal(kb_key, (out_c,), jnp.float32) * 0.05
        params.append(dict(w=w, b=b))
        configs.append((stride, use_in, use_lrelu))
    return params, tuple(configs)


def discriminator_forward(params, x_nchw, *, configs, tile_rows=None):
    if tile_rows is None:
        # Bigger row tiles when the chip has a big VMEM (v5e/v6e).
        tile_rows = 128 if _vmem_limit_bytes() >= 96 * 1024 * 1024 else 64
    # NCHW (PyTorch) -> NHWC, bf16 activations between layers.
    x = jnp.transpose(x_nchw, (0, 2, 3, 1)).astype(jnp.bfloat16)
    n_total = len(params)
    for li, (p, cfg) in enumerate(zip(params, configs)):
        stride, use_in, use_lrelu = cfg
        x = _conv_layer(x, p["w"], p["b"], stride, use_in, use_lrelu,
                        tile_rows=tile_rows, final=(li == n_total - 1))
    return jnp.transpose(x.astype(jnp.float32), (0, 3, 1, 2))


# ----------------------------------------------------------------------------
# Pure-JAX f32 reference (for validation only)
# ----------------------------------------------------------------------------
def _reference_forward(params, configs, x_nchw):
    x = x_nchw.astype(jnp.float32)
    for p, (stride, use_in, use_lrelu) in zip(params, configs):
        x = lax.conv_general_dilated(
            x, p["w"], window_strides=(stride, stride),
            padding=[(1, 1), (1, 1)],
            dimension_numbers=("NCHW", "OIHW", "NCHW"))
        x = x + p["b"].reshape(1, -1, 1, 1)
        if use_in:
            mean = jnp.mean(x, axis=(2, 3), keepdims=True)
            var = jnp.mean((x - mean) ** 2, axis=(2, 3), keepdims=True)
            x = (x - mean) * lax.rsqrt(var + _EPS)
        if use_lrelu:
            x = jnp.where(x > 0, x, _SLOPE * x)
    return x


if __name__ == "__main__":
    # Small configuration: input_nc=4, ndf=8, n_layers=2, spatial 16x16, batch 2.
    input_nc, ndf, n_layers = 4, 8, 2
    key = jax.random.PRNGKey(0)
    key, pkey, xkey = jax.random.split(key, 3)

    params, configs = init_discriminator_params(pkey, input_nc, ndf, n_layers)
    x = jax.random.normal(xkey, (2, input_nc, 16, 16), jnp.float32)   # NCHW

    # tile_rows=3 deliberately exercises the multi-tile / ragged-tile path
    # (masked InstanceNorm statistics) at these toy shapes.
    fwd = jax.jit(functools.partial(discriminator_forward,
                                    configs=configs, tile_rows=3))
    out = jax.block_until_ready(fwd(params, x))

    ref = jax.block_until_ready(_reference_forward(params, configs, x))
    assert out.shape == ref.shape, (out.shape, ref.shape)
    max_err = float(jnp.max(jnp.abs(out - ref)))
    # bf16 MXU operands / bf16 intermediate activations vs a pure-f32 reference.
    assert bool(jnp.allclose(out, ref, atol=5e-2, rtol=5e-2)), max_err

    print("KERNEL_OK")
</pallas_src>

<mosaic_0001>
module attributes {stable_mosaic.version = 11 : i64} {
  func.func @_conv_kernel(%arg0: i32, %arg1: i32, %arg2: memref<1x1x4x9x16xbf16, #tpu.memory_space<vmem>>, %arg3: memref<4x16x128xbf16, #tpu.memory_space<vmem>>, %arg4: memref<1x128xf32, #tpu.memory_space<vmem>>, %arg5: memref<1x3x8x128xbf16, #tpu.memory_space<vmem>>) attributes {dimension_semantics = [#tpu.dimension_semantics<parallel>, #tpu.dimension_semantics<parallel>], iteration_bounds = array<i64: 2, 3>, scalar_prefetch = 0 : i64, scratch_operands = 0 : i64, tpu.core_type = #tpu.core_type<tc>, window_params = [{transform_indices = @transform_0, window_bounds = array<i64: 1, 1, 4, 9, 16>}, {pipeline_mode = #tpu.pipeline_mode<synchronous>, transform_indices = @transform_1, window_bounds = array<i64: 4, 16, 128>}, {pipeline_mode = #tpu.pipeline_mode<synchronous>, transform_indices = @transform_2, window_bounds = array<i64: 1, 128>}, {transform_indices = @transform_3, window_bounds = array<i64: 1, 3, 8, 128>}]} {
    %cst = arith.constant 0.000000e+00 : f32
    %0 = vector.broadcast %cst : f32 to vector<24x128xf32>
    %c0 = arith.constant 0 : index
    %c0_0 = arith.constant 0 : index
    %c0_1 = arith.constant 0 : index
    %c0_2 = arith.constant 0 : index
    %c0_3 = arith.constant 0 : index
    %1 = vector.load %arg2[%c0, %c0_0, %c0_1, %c0_2, %c0_3] : memref<1x1x4x9x16xbf16, #tpu.memory_space<vmem>>, vector<1x1x3x8x16xbf16>
    %2 = vector.shape_cast %1 : vector<1x1x3x8x16xbf16> to vector<3x8x16xbf16>
    %3 = vector.shape_cast %2 : vector<3x8x16xbf16> to vector<24x16xbf16>
    %c0_4 = arith.constant 0 : index
    %c0_5 = arith.constant 0 : index
    %c0_6 = arith.constant 0 : index
    %4 = vector.load %arg3[%c0_4, %c0_5, %c0_6] : memref<4x16x128xbf16, #tpu.memory_space<vmem>>, vector<1x16x128xbf16>
    %5 = vector.shape_cast %4 : vector<1x16x128xbf16> to vector<16x128xbf16>
    %cst_7 = arith.constant dense<0.000000e+00> : vector<24x128xf32>
    %6 = tpu.matmul %3, %5, %cst_7 {dimension_numbers = #tpu.dot_dimension_numbers<[1], [0], [0], [1], [0, 0, 1, 1], [], []>} : vector<24x16xbf16>, vector<16x128xbf16>, vector<24x128xf32> -> vector<24x128xf32>
    %7 = arith.addf %0, %6 : vector<24x128xf32>
    %c0_8 = arith.constant 0 : index
    %c0_9 = arith.constant 0 : index
    %c0_10 = arith.constant 0 : index
    %c1 = arith.constant 1 : index
    %c0_11 = arith.constant 0 : index
    %8 = vector.load %arg2[%c0_8, %c0_9, %c0_10, %c1, %c0_11] : memref<1x1x4x9x16xbf16, #tpu.memory_space<vmem>>, vector<1x1x3x8x16xbf16>
    %9 = vector.shape_cast %8 : vector<1x1x3x8x16xbf16> to vector<3x8x16xbf16>
    %10 = vector.shape_cast %9 : vector<3x8x16xbf16> to vector<24x16xbf16>
    %c1_12 = arith.constant 1 : index
    %c0_13 = arith.constant 0 : index
    %c0_14 = arith.constant 0 : index
    %11 = vector.load %arg3[%c1_12, %c0_13, %c0_14] : memref<4x16x128xbf16, #tpu.memory_space<vmem>>, vector<1x16x128xbf16>
    %12 = vector.shape_cast %11 : vector<1x16x128xbf16> to vector<16x128xbf16>
    %cst_15 = arith.constant dense<0.000000e+00> : vector<24x128xf32>
    %13 = tpu.matmul %10, %12, %cst_15 {dimension_numbers = #tpu.dot_dimension_numbers<[1], [0], [0], [1], [0, 0, 1, 1], [], []>} : vector<24x16xbf16>, vector<16x128xbf16>, vector<24x128xf32> -> vector<24x128xf32>
    %14 = arith.addf %7, %13 : vector<24x128xf32>
    %c0_16 = arith.constant 0 : index
    %c0_17 = arith.constant 0 : index
    %c1_18 = arith.constant 1 : index
    %c0_19 = arith.constant 0 : index
    %c0_20 = arith.constant 0 : index
    %15 = vector.load %arg2[%c0_16, %c0_17, %c1_18, %c0_19, %c0_20] : memref<1x1x4x9x16xbf16, #tpu.memory_space<vmem>>, vector<1x1x3x8x16xbf16>
    %16 = vector.shape_cast %15 : vector<1x1x3x8x16xbf16> to vector<3x8x16xbf16>
    %17 = vector.shape_cast %16 : vector<3x8x16xbf16> to vector<24x16xbf16>
    %c2 = arith.constant 2 : index
    %c0_21 = arith.constant 0 : index
    %c0_22 = arith.constant 0 : index
    %18 = vector.load %arg3[%c2, %c0_21, %c0_22] : memref<4x16x128xbf16, #tpu.memory_space<vmem>>, vector<1x16x128xbf16>
    %19 = vector.shape_cast %18 : vector<1x16x128xbf16> to vector<16x128xbf16>
    %cst_23 = arith.constant dense<0.000000e+00> : vector<24x128xf32>
    %20 = tpu.matmul %17, %19, %cst_23 {dimension_numbers = #tpu.dot_dimension_numbers<[1], [0], [0], [1], [0, 0, 1, 1], [], []>} : vector<24x16xbf16>, vector<16x128xbf16>, vector<24x128xf32> -> vector<24x128xf32>
    %21 = arith.addf %14, %20 : vector<24x128xf32>
    %c0_24 = arith.constant 0 : index
    %c0_25 = arith.constant 0 : index
    %c1_26 = arith.constant 1 : index
    %c1_27 = arith.constant 1 : index
    %c0_28 = arith.constant 0 : index
    %22 = vector.load %arg2[%c0_24, %c0_25, %c1_26, %c1_27, %c0_28] : memref<1x1x4x9x16xbf16, #tpu.memory_space<vmem>>, vector<1x1x3x8x16xbf16>
    %23 = vector.shape_cast %22 : vector<1x1x3x8x16xbf16> to vector<3x8x16xbf16>
    %24 = vector.shape_cast %23 : vector<3x8x16xbf16> to vector<24x16xbf16>
    %c3 = arith.constant 3 : index
    %c0_29 = arith.constant 0 : index
    %c0_30 = arith.constant 0 : index
    %25 = vector.load %arg3[%c3, %c0_29, %c0_30] : memref<4x16x128xbf16, #tpu.memory_space<vmem>>, vector<1x16x128xbf16>
    %26 = vector.shape_cast %25 : vector<1x16x128xbf16> to vector<16x128xbf16>
    %cst_31 = arith.constant dense<0.000000e+00> : vector<24x128xf32>
    %27 = tpu.matmul %24, %26, %cst_31 {dimension_numbers = #tpu.dot_dimension_numbers<[1], [0], [0], [1], [0, 0, 1, 1], [], []>} : vector<24x16xbf16>, vector<16x128xbf16>, vector<24x128xf32> -> vector<24x128xf32>
    %28 = arith.addf %21, %27 : vector<24x128xf32>
    %c0_32 = arith.constant 0 : index
    %c0_33 = arith.constant 0 : index
    %29 = vector.load %arg4[%c0_32, %c0_33] : memref<1x128xf32, #tpu.memory_space<vmem>>, vector<1x128xf32>
    %30 = vector.broadcast %29 : vector<1x128xf32> to vector<24x128xf32>
    %31 = arith.addf %28, %30 : vector<24x128xf32>
    %cst_34 = arith.constant 0.000000e+00 : f32
    %32 = vector.broadcast %cst_34 : f32 to vector<24x128xf32>
    %33 = arith.cmpf ogt, %31, %32 : vector<24x128xf32>
    %cst_35 = arith.constant 2.000000e-01 : f32
    %34 = vector.broadcast %cst_35 : f32 to vector<24x128xf32>
    %35 = arith.mulf %34, %31 : vector<24x128xf32>
    %36 = arith.select %33, %31, %35 : vector<24x128xi1>, vector<24x128xf32>
    %37 = vector.shape_cast %36 : vector<24x128xf32> to vector<3x8x128xf32>
    %38 = arith.truncf %37 : vector<3x8x128xf32> to vector<3x8x128xbf16>
    %c0_36 = arith.constant 0 : index
    %c0_37 = arith.constant 0 : index
    %c0_38 = arith.constant 0 : index
    %c0_39 = arith.constant 0 : index
    %39 = vector.load %arg5[%c0_36, %c0_37, %c0_38, %c0_39] : memref<1x3x8x128xbf16, #tpu.memory_space<vmem>>, vector<1x3x8x128xbf16>
    %40 = vector.shape_cast %39 : vector<1x3x8x128xbf16> to vector<3x8x128xbf16>
    %41 = vector.shape_cast %38 : vector<3x8x128xbf16> to vector<1x3x8x128xbf16>
    tpu.vector_store %arg5[%c0_36, %c0_37, %c0_38, %c0_39], %41 {strides = array<i32>} : memref<1x3x8x128xbf16, #tpu.memory_space<vmem>>, vector<1x3x8x128xbf16>,
    return
  }
  func.func @transform_0(%arg0: i32, %arg1: i32) -> (i32, i32, i32, i32, i32) {
    %c0_i32 = arith.constant 0 : i32
    %c0_i32_0 = arith.constant 0 : i32
    %c0_i32_1 = arith.constant 0 : i32
    %c0_i32_2 = arith.constant 0 : i32
    return %arg0, %arg1, %c0_i32, %c0_i32_0, %c0_i32_1 : i32, i32, i32, i32, i32
  }
  func.func @transform_1(%arg0: i32, %arg1: i32) -> (i32, i32, i32) {
    %c0_i32 = arith.constant 0 : i32
    %c0_i32_0 = arith.constant 0 : i32
    %c0_i32_1 = arith.constant 0 : i32
    %c0_i32_2 = arith.constant 0 : i32
    return %c0_i32, %c0_i32_0, %c0_i32_1 : i32, i32, i32
  }
  func.func @transform_2(%arg0: i32, %arg1: i32) -> (i32, i32) {
    %c0_i32 = arith.constant 0 : i32
    %c0_i32_0 = arith.constant 0 : i32
    %c0_i32_1 = arith.constant 0 : i32
    return %c0_i32, %c0_i32_0 : i32, i32
  }
  func.func @transform_3(%arg0: i32, %arg1: i32) -> (i32, i32, i32, i32) {
    %c0_i32 = arith.constant 0 : i32
    %c0_i32_0 = arith.constant 0 : i32
    %c0_i32_1 = arith.constant 0 : i32
    return %arg0, %arg1, %c0_i32, %c0_i32_0 : i32, i32, i32, i32
  }
}

module attributes {stable_mosaic.version = 11 : i64} {
  func.func @_conv_kernel(%arg0: i32, %arg1: i32, %arg2: memref<1x1x3x9x32xbf16, #tpu.memory_space<vmem>>, %arg3: memref<4x32x128xbf16, #tpu.memory_space<vmem>>, %arg4: memref<1x128xf32, #tpu.memory_space<vmem>>, %arg5: memref<1x2x8x128xbf16, #tpu.memory_space<vmem>>, %arg6: memref<1x1x2x128xf32, #tpu.memory_space<vmem>>) attributes {dimension_semantics = [#tpu.dimension_semantics<parallel>, #tpu.dimension_semantics<parallel>], iteration_bounds = array<i64: 2, 2>, scalar_prefetch = 0 : i64, scratch_operands = 0 : i64, tpu.core_type = #tpu.core_type<tc>, window_params = [{transform_indices = @transform_0, window_bounds = array<i64: 1, 1, 3, 9, 32>}, {pipeline_mode = #tpu.pipeline_mode<synchronous>, transform_indices = @transform_1, window_bounds = array<i64: 4, 32, 128>}, {pipeline_mode = #tpu.pipeline_mode<synchronous>, transform_indices = @transform_2, window_bounds = array<i64: 1, 128>}, {transform_indices = @transform_3, window_bounds = array<i64: 1, 2, 8, 128>}, {transform_indices = @transform_4, window_bounds = array<i64: 1, 1, 2, 128>}]} {
    %cst = arith.constant 0.000000e+00 : f32
    %0 = vector.broadcast %cst : f32 to vector<16x128xf32>
    %c0 = arith.constant 0 : index
    %c0_0 = arith.constant 0 : index
    %c0_1 = arith.constant 0 : index
    %c0_2 = arith.constant 0 : index
    %c0_3 = arith.constant 0 : index
    %1 = vector.load %arg2[%c0, %c0_0, %c0_1, %c0_2, %c0_3] : memref<1x1x3x9x32xbf16, #tpu.memory_space<vmem>>, vector<1x1x2x8x32xbf16>
    %2 = vector.shape_cast %1 : vector<1x1x2x8x32xbf16> to vector<2x8x32xbf16>
    %3 = vector.shape_cast %2 : vector<2x8x32xbf16> to vector<16x32xbf16>
    %c0_4 = arith.constant 0 : index
    %c0_5 = arith.constant 0 : index
    %c0_6 = arith.constant 0 : index
    %4 = vector.load %arg3[%c0_4, %c0_5, %c0_6] : memref<4x32x128xbf16, #tpu.memory_space<vmem>>, vector<1x32x128xbf16>
    %5 = vector.shape_cast %4 : vector<1x32x128xbf16> to vector<32x128xbf16>
    %cst_7 = arith.constant dense<0.000000e+00> : vector<16x128xf32>
    %6 = tpu.matmul %3, %5, %cst_7 {dimension_numbers = #tpu.dot_dimension_numbers<[1], [0], [0], [1], [0, 0, 1, 1], [], []>} : vector<16x32xbf16>, vector<32x128xbf16>, vector<16x128xf32> -> vector<16x128xf32>
    %7 = arith.addf %0, %6 : vector<16x128xf32>
    %c0_8 = arith.constant 0 : index
    %c0_9 = arith.constant 0 : index
    %c0_10 = arith.constant 0 : index
    %c1 = arith.constant 1 : index
    %c0_11 = arith.constant 0 : index
    %8 = vector.load %arg2[%c0_8, %c0_9, %c0_10, %c1, %c0_11] : memref<1x1x3x9x32xbf16, #tpu.memory_space<vmem>>, vector<1x1x2x8x32xbf16>
    %9 = vector.shape_cast %8 : vector<1x1x2x8x32xbf16> to vector<2x8x32xbf16>
    %10 = vector.shape_cast %9 : vector<2x8x32xbf16> to vector<16x32xbf16>
    %c1_12 = arith.constant 1 : index
    %c0_13 = arith.constant 0 : index
    %c0_14 = arith.constant 0 : index
    %11 = vector.load %arg3[%c1_12, %c0_13, %c0_14] : memref<4x32x128xbf16, #tpu.memory_space<vmem>>, vector<1x32x128xbf16>
    %12 = vector.shape_cast %11 : vector<1x32x128xbf16> to vector<32x128xbf16>
    %cst_15 = arith.constant dense<0.000000e+00> : vector<16x128xf32>
    %13 = tpu.matmul %10, %12, %cst_15 {dimension_numbers = #tpu.dot_dimension_numbers<[1], [0], [0], [1], [0, 0, 1, 1], [], []>} : vector<16x32xbf16>, vector<32x128xbf16>, vector<16x128xf32> -> vector<16x128xf32>
    %14 = arith.addf %7, %13 : vector<16x128xf32>
    %c0_16 = arith.constant 0 : index
    %c0_17 = arith.constant 0 : index
    %c1_18 = arith.constant 1 : index
    %c0_19 = arith.constant 0 : index
    %c0_20 = arith.constant 0 : index
    %15 = vector.load %arg2[%c0_16, %c0_17, %c1_18, %c0_19, %c0_20] : memref<1x1x3x9x32xbf16, #tpu.memory_space<vmem>>, vector<1x1x2x8x32xbf16>
    %16 = vector.shape_cast %15 : vector<1x1x2x8x32xbf16> to vector<2x8x32xbf16>
    %17 = vector.shape_cast %16 : vector<2x8x32xbf16> to vector<16x32xbf16>
    %c2 = arith.constant 2 : index
    %c0_21 = arith.constant 0 : index
    %c0_22 = arith.constant 0 : index
    %18 = vector.load %arg3[%c2, %c0_21, %c0_22] : memref<4x32x128xbf16, #tpu.memory_space<vmem>>, vector<1x32x128xbf16>
    %19 = vector.shape_cast %18 : vector<1x32x128xbf16> to vector<32x128xbf16>
    %cst_23 = arith.constant dense<0.000000e+00> : vector<16x128xf32>
    %20 = tpu.matmul %17, %19, %cst_23 {dimension_numbers = #tpu.dot_dimension_numbers<[1], [0], [0], [1], [0, 0, 1, 1], [], []>} : vector<16x32xbf16>, vector<32x128xbf16>, vector<16x128xf32> -> vector<16x128xf32>
    %21 = arith.addf %14, %20 : vector<16x128xf32>
    %c0_24 = arith.constant 0 : index
    %c0_25 = arith.constant 0 : index
    %c1_26 = arith.constant 1 : index
    %c1_27 = arith.constant 1 : index
    %c0_28 = arith.constant 0 : index
    %22 = vector.load %arg2[%c0_24, %c0_25, %c1_26, %c1_27, %c0_28] : memref<1x1x3x9x32xbf16, #tpu.memory_space<vmem>>, vector<1x1x2x8x32xbf16>
    %23 = vector.shape_cast %22 : vector<1x1x2x8x32xbf16> to vector<2x8x32xbf16>
    %24 = vector.shape_cast %23 : vector<2x8x32xbf16> to vector<16x32xbf16>
    %c3 = arith.constant 3 : index
    %c0_29 = arith.constant 0 : index
    %c0_30 = arith.constant 0 : index
    %25 = vector.load %arg3[%c3, %c0_29, %c0_30] : memref<4x32x128xbf16, #tpu.memory_space<vmem>>, vector<1x32x128xbf16>
    %26 = vector.shape_cast %25 : vector<1x32x128xbf16> to vector<32x128xbf16>
    %cst_31 = arith.constant dense<0.000000e+00> : vector<16x128xf32>
    %27 = tpu.matmul %24, %26, %cst_31 {dimension_numbers = #tpu.dot_dimension_numbers<[1], [0], [0], [1], [0, 0, 1, 1], [], []>} : vector<16x32xbf16>, vector<32x128xbf16>, vector<16x128xf32> -> vector<16x128xf32>
    %28 = arith.addf %21, %27 : vector<16x128xf32>
    %c0_32 = arith.constant 0 : index
    %c0_33 = arith.constant 0 : index
    %29 = vector.load %arg4[%c0_32, %c0_33] : memref<1x128xf32, #tpu.memory_space<vmem>>, vector<1x128xf32>
    %30 = vector.broadcast %29 : vector<1x128xf32> to vector<16x128xf32>
    %31 = arith.addf %28, %30 : vector<16x128xf32>
    %32 = vector.shape_cast %31 : vector<16x128xf32> to vector<2x8x128xf32>
    %33 = arith.truncf %32 : vector<2x8x128xf32> to vector<2x8x128xbf16>
    %c0_34 = arith.constant 0 : index
    %c0_35 = arith.constant 0 : index
    %c0_36 = arith.constant 0 : index
    %c0_37 = arith.constant 0 : index
    %34 = vector.load %arg5[%c0_34, %c0_35, %c0_36, %c0_37] : memref<1x2x8x128xbf16, #tpu.memory_space<vmem>>, vector<1x2x8x128xbf16>
    %35 = vector.shape_cast %34 : vector<1x2x8x128xbf16> to vector<2x8x128xbf16>
    %36 = vector.shape_cast %33 : vector<2x8x128xbf16> to vector<1x2x8x128xbf16>
    tpu.vector_store %arg5[%c0_34, %c0_35, %c0_36, %c0_37], %36 {strides = array<i32>} : memref<1x2x8x128xbf16, #tpu.memory_space<vmem>>, vector<1x2x8x128xbf16>,
    %c2_i32 = arith.constant 2 : i32
    %37 = arith.muli %arg1, %c2_i32 : i32
    %38 = tpu.iota {dimensions = array<i32: 0>} : vector<2x8x1xi32>
    %39 = tpu.iota {dimensions = array<i32: 1>} : vector<2x8x1xi32>
    %40 = vector.broadcast %37 : i32 to vector<2x8x1xi32>
    %41 = arith.addi %40, %38 : vector<2x8x1xi32>
    %c4_i32 = arith.constant 4 : i32
    %42 = vector.broadcast %c4_i32 : i32 to vector<2x8x1xi32>
    %43 = arith.cmpi slt, %41, %42 : vector<2x8x1xi32>
    %c4_i32_38 = arith.constant 4 : i32
    %44 = vector.broadcast %c4_i32_38 : i32 to vector<2x8x1xi32>
    %45 = arith.cmpi slt, %39, %44 : vector<2x8x1xi32>
    %46 = arith.andi %43, %45 : vector<2x8x1xi1>
    %cst_39 = arith.constant 0.000000e+00 : f32
    %47 = vector.shape_cast %46 : vector<2x8x1xi1> to vector<2x8x1xi1>
    %48 = vector.broadcast %47 : vector<2x8x1xi1> to vector<2x8x128xi1>
    %49 = vector.broadcast %cst_39 : f32 to vector<2x8x128xf32>
    %50 = arith.select %48, %32, %49 : vector<2x8x128xi1>, vector<2x8x128xf32>
    %51 = vector.shape_cast %50 : vector<2x8x128xf32> to vector<16x128xf32>
    %cst_40 = arith.constant dense<0.000000e+00> : vector<128xf32>
    %52 = vector.multi_reduction <add>, %51, %cst_40 [0] : vector<16x128xf32> to vector<128xf32>
    %53 = vector.shape_cast %52 : vector<128xf32> to vector<1x128xf32>
    %c0_41 = arith.constant 0 : index
    %c0_42 = arith.constant 0 : index
    %c0_43 = arith.constant 0 : index
    %c0_44 = arith.constant 0 : index
    %54 = vector.load %arg6[%c0_41, %c0_42, %c0_43, %c0_44] : memref<1x1x2x128xf32, #tpu.memory_space<vmem>>, vector<1x1x1x128xf32>
    %55 = vector.shape_cast %54 : vector<1x1x1x128xf32> to vector<1x128xf32>
    %56 = vector.shape_cast %53 : vector<1x128xf32> to vector<1x1x1x128xf32>
    tpu.vector_store %arg6[%c0_41, %c0_42, %c0_43, %c0_44], %56 {strides = array<i32>} : memref<1x1x2x128xf32, #tpu.memory_space<vmem>>, vector<1x1x1x128xf32>,
    %57 = arith.mulf %51, %51 : vector<16x128xf32>
    %cst_45 = arith.constant dense<0.000000e+00> : vector<128xf32>
    %58 = vector.multi_reduction <add>, %57, %cst_45 [0] : vector<16x128xf32> to vector<128xf32>
    %59 = vector.shape_cast %58 : vector<128xf32> to vector<1x128xf32>
    %c0_46 = arith.constant 0 : index
    %c0_47 = arith.constant 0 : index
    %c1_48 = arith.constant 1 : index
    %c0_49 = arith.constant 0 : index
    %60 = vector.load %arg6[%c0_46, %c0_47, %c1_48, %c0_49] : memref<1x1x2x128xf32, #tpu.memory_space<vmem>>, vector<1x1x1x128xf32>
    %61 = vector.shape_cast %60 : vector<1x1x1x128xf32> to vector<1x128xf32>
    %62 = vector.shape_cast %59 : vector<1x128xf32> to vector<1x1x1x128xf32>
    tpu.vector_store %arg6[%c0_46, %c0_47, %c1_48, %c0_49], %62 {strides = array<i32>} : memref<1x1x2x128xf32, #tpu.memory_space<vmem>>, vector<1x1x1x128xf32>,
    return
  }
  func.func @transform_0(%arg0: i32, %arg1: i32) -> (i32, i32, i32, i32, i32) {
    %c0_i32 = arith.constant 0 : i32
    %c0_i32_0 = arith.constant 0 : i32
    %c0_i32_1 = arith.constant 0 : i32
    %c0_i32_2 = arith.constant 0 : i32
    return %arg0, %arg1, %c0_i32, %c0_i32_0, %c0_i32_1 : i32, i32, i32, i32, i32
  }
  func.func @transform_1(%arg0: i32, %arg1: i32) -> (i32, i32, i32) {
    %c0_i32 = arith.constant 0 : i32
    %c0_i32_0 = arith.constant 0 : i32
    %c0_i32_1 = arith.constant 0 : i32
    %c0_i32_2 = arith.constant 0 : i32
    return %c0_i32, %c0_i32_0, %c0_i32_1 : i32, i32, i32
  }
  func.func @transform_2(%arg0: i32, %arg1: i32) -> (i32, i32) {
    %c0_i32 = arith.constant 0 : i32
    %c0_i32_0 = arith.constant 0 : i32
    %c0_i32_1 = arith.constant 0 : i32
    return %c0_i32, %c0_i32_0 : i32, i32
  }
  func.func @transform_3(%arg0: i32, %arg1: i32) -> (i32, i32, i32, i32) {
    %c0_i32 = arith.constant 0 : i32
    %c0_i32_0 = arith.constant 0 : i32
    %c0_i32_1 = arith.constant 0 : i32
    return %arg0, %arg1, %c0_i32, %c0_i32_0 : i32, i32, i32, i32
  }
  func.func @transform_4(%arg0: i32, %arg1: i32) -> (i32, i32, i32, i32) {
    %c0_i32 = arith.constant 0 : i32
    %c0_i32_0 = arith.constant 0 : i32
    %c0_i32_1 = arith.constant 0 : i32
    return %arg0, %arg1, %c0_i32, %c0_i32_0 : i32, i32, i32, i32
  }
}

module attributes {stable_mosaic.version = 11 : i64} {
  func.func @_conv_kernel(%arg0: i32, %arg1: i32, %arg2: memref<1x1x5x11x16xbf16, #tpu.memory_space<vmem>>, %arg3: memref<16x16x128xbf16, #tpu.memory_space<vmem>>, %arg4: memref<1x128xf32, #tpu.memory_space<vmem>>, %arg5: memref<1x2x8x128xbf16, #tpu.memory_space<vmem>>, %arg6: memref<1x1x2x128xf32, #tpu.memory_space<vmem>>) attributes {dimension_semantics = [#tpu.dimension_semantics<parallel>, #tpu.dimension_semantics<parallel>], iteration_bounds = array<i64: 2, 2>, scalar_prefetch = 0 : i64, scratch_operands = 0 : i64, tpu.core_type = #tpu.core_type<tc>, window_params = [{transform_indices = @transform_0, window_bounds = array<i64: 1, 1, 5, 11, 16>}, {pipeline_mode = #tpu.pipeline_mode<synchronous>, transform_indices = @transform_1, window_bounds = array<i64: 16, 16, 128>}, {pipeline_mode = #tpu.pipeline_mode<synchronous>, transform_indices = @transform_2, window_bounds = array<i64: 1, 128>}, {transform_indices = @transform_3, window_bounds = array<i64: 1, 2, 8, 128>}, {transform_indices = @transform_4, window_bounds = array<i64: 1, 1, 2, 128>}]} {
    %cst = arith.constant 0.000000e+00 : f32
    %0 = vector.broadcast %cst : f32 to vector<16x128xf32>
    %c0 = arith.constant 0 : index
    %c0_0 = arith.constant 0 : index
    %c0_1 = arith.constant 0 : index
    %c0_2 = arith.constant 0 : index
    %c0_3 = arith.constant 0 : index
    %1 = vector.load %arg2[%c0, %c0_0, %c0_1, %c0_2, %c0_3] : memref<1x1x5x11x16xbf16, #tpu.memory_space<vmem>>, vector<1x1x2x8x16xbf16>
    %2 = vector.shape_cast %1 : vector<1x1x2x8x16xbf16> to vector<2x8x16xbf16>
    %3 = vector.shape_cast %2 : vector<2x8x16xbf16> to vector<16x16xbf16>
    %c0_4 = arith.constant 0 : index
    %c0_5 = arith.constant 0 : index
    %c0_6 = arith.constant 0 : index
    %4 = vector.load %arg3[%c0_4, %c0_5, %c0_6] : memref<16x16x128xbf16, #tpu.memory_space<vmem>>, vector<1x16x128xbf16>
    %5 = vector.shape_cast %4 : vector<1x16x128xbf16> to vector<16x128xbf16>
    %cst_7 = arith.constant dense<0.000000e+00> : vector<16x128xf32>
    %6 = tpu.matmul %3, %5, %cst_7 {dimension_numbers = #tpu.dot_dimension_numbers<[1], [0], [0], [1], [0, 0, 1, 1], [], []>} : vector<16x16xbf16>, vector<16x128xbf16>, vector<16x128xf32> -> vector<16x128xf32>
    %7 = arith.addf %0, %6 : vector<16x128xf32>
    %c0_8 = arith.constant 0 : index
    %c0_9 = arith.constant 0 : index
    %c0_10 = arith.constant 0 : index
    %c1 = arith.constant 1 : index
    %c0_11 = arith.constant 0 : index
    %8 = vector.load %arg2[%c0_8, %c0_9, %c0_10, %c1, %c0_11] : memref<1x1x5x11x16xbf16, #tpu.memory_space<vmem>>, vector<1x1x2x8x16xbf16>
    %9 = vector.shape_cast %8 : vector<1x1x2x8x16xbf16> to vector<2x8x16xbf16>
    %10 = vector.shape_cast %9 : vector<2x8x16xbf16> to vector<16x16xbf16>
    %c1_12 = arith.constant 1 : index
    %c0_13 = arith.constant 0 : index
    %c0_14 = arith.constant 0 : index
    %11 = vector.load %arg3[%c1_12, %c0_13, %c0_14] : memref<16x16x128xbf16, #tpu.memory_space<vmem>>, vector<1x16x128xbf16>
    %12 = vector.shape_cast %11 : vector<1x16x128xbf16> to vector<16x128xbf16>
    %cst_15 = arith.constant dense<0.000000e+00> : vector<16x128xf32>
    %13 = tpu.matmul %10, %12, %cst_15 {dimension_numbers = #tpu.dot_dimension_numbers<[1], [0], [0], [1], [0, 0, 1, 1], [], []>} : vector<16x16xbf16>, vector<16x128xbf16>, vector<16x128xf32> -> vector<16x128xf32>
    %14 = arith.addf %7, %13 : vector<16x128xf32>
    %c0_16 = arith.constant 0 : index
    %c0_17 = arith.constant 0 : index
    %c0_18 = arith.constant 0 : index
    %c2 = arith.constant 2 : index
    %c0_19 = arith.constant 0 : index
    %15 = vector.load %arg2[%c0_16, %c0_17, %c0_18, %c2, %c0_19] : memref<1x1x5x11x16xbf16, #tpu.memory_space<vmem>>, vector<1x1x2x8x16xbf16>
    %16 = vector.shape_cast %15 : vector<1x1x2x8x16xbf16> to vector<2x8x16xbf16>
    %17 = vector.shape_cast %16 : vector<2x8x16xbf16> to vector<16x16xbf16>
    %c2_20 = arith.constant 2 : index
    %c0_21 = arith.constant 0 : index
    %c0_22 = arith.constant 0 : index
    %18 = vector.load %arg3[%c2_20, %c0_21, %c0_22] : memref<16x16x128xbf16, #tpu.memory_space<vmem>>, vector<1x16x128xbf16>
    %19 = vector.shape_cast %18 : vector<1x16x128xbf16> to vector<16x128xbf16>
    %cst_23 = arith.constant dense<0.000000e+00> : vector<16x128xf32>
    %20 = tpu.matmul %17, %19, %cst_23 {dimension_numbers = #tpu.dot_dimension_numbers<[1], [0], [0], [1], [0, 0, 1, 1], [], []>} : vector<16x16xbf16>, vector<16x128xbf16>, vector<16x128xf32> -> vector<16x128xf32>
    %21 = arith.addf %14, %20 : vector<16x128xf32>
    %c0_24 = arith.constant 0 : index
    %c0_25 = arith.constant 0 : index
    %c0_26 = arith.constant 0 : index
    %c3 = arith.constant 3 : index
    %c0_27 = arith.constant 0 : index
    %22 = vector.load %arg2[%c0_24, %c0_25, %c0_26, %c3, %c0_27] : memref<1x1x5x11x16xbf16, #tpu.memory_space<vmem>>, vector<1x1x2x8x16xbf16>
    %23 = vector.shape_cast %22 : vector<1x1x2x8x16xbf16> to vector<2x8x16xbf16>
    %24 = vector.shape_cast %23 : vector<2x8x16xbf16> to vector<16x16xbf16>
    %c3_28 = arith.constant 3 : index
    %c0_29 = arith.constant 0 : index
    %c0_30 = arith.constant 0 : index
    %25 = vector.load %arg3[%c3_28, %c0_29, %c0_30] : memref<16x16x128xbf16, #tpu.memory_space<vmem>>, vector<1x16x128xbf16>
    %26 = vector.shape_cast %25 : vector<1x16x128xbf16> to vector<16x128xbf16>
    %cst_31 = arith.constant dense<0.000000e+00> : vector<16x128xf32>
    %27 = tpu.matmul %24, %26, %cst_31 {dimension_numbers = #tpu.dot_dimension_numbers<[1], [0], [0], [1], [0, 0, 1, 1], [], []>} : vector<16x16xbf16>, vector<16x128xbf16>, vector<16x128xf32> -> vector<16x128xf32>
    %28 = arith.addf %21, %27 : vector<16x128xf32>
    %c0_32 = arith.constant 0 : index
    %c0_33 = arith.constant 0 : index
    %c1_34 = arith.constant 1 : index
    %c0_35 = arith.constant 0 : index
    %c0_36 = arith.constant 0 : index
    %29 = vector.load %arg2[%c0_32, %c0_33, %c1_34, %c0_35, %c0_36] : memref<1x1x5x11x16xbf16, #tpu.memory_space<vmem>>, vector<1x1x2x8x16xbf16>
    %30 = vector.shape_cast %29 : vector<1x1x2x8x16xbf16> to vector<2x8x16xbf16>
    %31 = vector.shape_cast %30 : vector<2x8x16xbf16> to vector<16x16xbf16>
    %c4 = arith.constant 4 : index
    %c0_37 = arith.constant 0 : index
    %c0_38 = arith.constant 0 : index
    %32 = vector.load %arg3[%c4, %c0_37, %c0_38] : memref<16x16x128xbf16, #tpu.memory_space<vmem>>, vector<1x16x128xbf16>
    %33 = vector.shape_cast %32 : vector<1x16x128xbf16> to vector<16x128xbf16>
    %cst_39 = arith.constant dense<0.000000e+00> : vector<16x128xf32>
    %34 = tpu.matmul %31, %33, %cst_39 {dimension_numbers = #tpu.dot_dimension_numbers<[1], [0], [0], [1], [0, 0, 1, 1], [], []>} : vector<16x16xbf16>, vector<16x128xbf16>, vector<16x128xf32> -> vector<16x128xf32>
    %35 = arith.addf %28, %34 : vector<16x128xf32>
    %c0_40 = arith.constant 0 : index
    %c0_41 = arith.constant 0 : index
    %c1_42 = arith.constant 1 : index
    %c1_43 = arith.constant 1 : index
    %c0_44 = arith.constant 0 : index
    %36 = vector.load %arg2[%c0_40, %c0_41, %c1_42, %c1_43, %c0_44] : memref<1x1x5x11x16xbf16, #tpu.memory_space<vmem>>, vector<1x1x2x8x16xbf16>
    %37 = vector.shape_cast %36 : vector<1x1x2x8x16xbf16> to vector<2x8x16xbf16>
    %38 = vector.shape_cast %37 : vector<2x8x16xbf16> to vector<16x16xbf16>
    %c5 = arith.constant 5 : index
    %c0_45 = arith.constant 0 : index
    %c0_46 = arith.constant 0 : index
    %39 = vector.load %arg3[%c5, %c0_45, %c0_46] : memref<16x16x128xbf16, #tpu.memory_space<vmem>>, vector<1x16x128xbf16>
    %40 = vector.shape_cast %39 : vector<1x16x128xbf16> to vector<16x128xbf16>
    %cst_47 = arith.constant dense<0.000000e+00> : vector<16x128xf32>
    %41 = tpu.matmul %38, %40, %cst_47 {dimension_numbers = #tpu.dot_dimension_numbers<[1], [0], [0], [1], [0, 0, 1, 1], [], []>} : vector<16x16xbf16>, vector<16x128xbf16>, vector<16x128xf32> -> vector<16x128xf32>
    %42 = arith.addf %35, %41 : vector<16x128xf32>
    %c0_48 = arith.constant 0 : index
    %c0_49 = arith.constant 0 : index
    %c1_50 = arith.constant 1 : index
    %c2_51 = arith.constant 2 : index
    %c0_52 = arith.constant 0 : index
    %43 = vector.load %arg2[%c0_48, %c0_49, %c1_50, %c2_51, %c0_52] : memref<1x1x5x11x16xbf16, #tpu.memory_space<vmem>>, vector<1x1x2x8x16xbf16>
    %44 = vector.shape_cast %43 : vector<1x1x2x8x16xbf16> to vector<2x8x16xbf16>
    %45 = vector.shape_cast %44 : vector<2x8x16xbf16> to vector<16x16xbf16>
    %c6 = arith.constant 6 : index
    %c0_53 = arith.constant 0 : index
    %c0_54 = arith.constant 0 : index
    %46 = vector.load %arg3[%c6, %c0_53, %c0_54] : memref<16x16x128xbf16, #tpu.memory_space<vmem>>, vector<1x16x128xbf16>
    %47 = vector.shape_cast %46 : vector<1x16x128xbf16> to vector<16x128xbf16>
    %cst_55 = arith.constant dense<0.000000e+00> : vector<16x128xf32>
    %48 = tpu.matmul %45, %47, %cst_55 {dimension_numbers = #tpu.dot_dimension_numbers<[1], [0], [0], [1], [0, 0, 1, 1], [], []>} : vector<16x16xbf16>, vector<16x128xbf16>, vector<16x128xf32> -> vector<16x128xf32>
    %49 = arith.addf %42, %48 : vector<16x128xf32>
    %c0_56 = arith.constant 0 : index
    %c0_57 = arith.constant 0 : index
    %c1_58 = arith.constant 1 : index
    %c3_59 = arith.constant 3 : index
    %c0_60 = arith.constant 0 : index
    %50 = vector.load %arg2[%c0_56, %c0_57, %c1_58, %c3_59, %c0_60] : memref<1x1x5x11x16xbf16, #tpu.memory_space<vmem>>, vector<1x1x2x8x16xbf16>
    %51 = vector.shape_cast %50 : vector<1x1x2x8x16xbf16> to vector<2x8x16xbf16>
    %52 = vector.shape_cast %51 : vector<2x8x16xbf16> to vector<16x16xbf16>
    %c7 = arith.constant 7 : index
    %c0_61 = arith.constant 0 : index
    %c0_62 = arith.constant 0 : index
    %53 = vector.load %arg3[%c7, %c0_61, %c0_62] : memref<16x16x128xbf16, #tpu.memory_space<vmem>>, vector<1x16x128xbf16>
    %54 = vector.shape_cast %53 : vector<1x16x128xbf16> to vector<16x128xbf16>
    %cst_63 = arith.constant dense<0.000000e+00> : vector<16x128xf32>
    %55 = tpu.matmul %52, %54, %cst_63 {dimension_numbers = #tpu.dot_dimension_numbers<[1], [0], [0], [1], [0, 0, 1, 1], [], []>} : vector<16x16xbf16>, vector<16x128xbf16>, vector<16x128xf32> -> vector<16x128xf32>
    %56 = arith.addf %49, %55 : vector<16x128xf32>
    %c0_64 = arith.constant 0 : index
    %c0_65 = arith.constant 0 : index
    %c2_66 = arith.constant 2 : index
    %c0_67 = arith.constant 0 : index
    %c0_68 = arith.constant 0 : index
    %57 = vector.load %arg2[%c0_64, %c0_65, %c2_66, %c0_67, %c0_68] : memref<1x1x5x11x16xbf16, #tpu.memory_space<vmem>>, vector<1x1x2x8x16xbf16>
    %58 = vector.shape_cast %57 : vector<1x1x2x8x16xbf16> to vector<2x8x16xbf16>
    %59 = vector.shape_cast %58 : vector<2x8x16xbf16> to vector<16x16xbf16>
    %c8 = arith.constant 8 : index
    %c0_69 = arith.constant 0 : index
    %c0_70 = arith.constant 0 : index
    %60 = vector.load %arg3[%c8, %c0_69, %c0_70] : memref<16x16x128xbf16, #tpu.memory_space<vmem>>, vector<1x16x128xbf16>
    %61 = vector.shape_cast %60 : vector<1x16x128xbf16> to vector<16x128xbf16>
    %cst_71 = arith.constant dense<0.000000e+00> : vector<16x128xf32>
    %62 = tpu.matmul %59, %61, %cst_71 {dimension_numbers = #tpu.dot_dimension_numbers<[1], [0], [0], [1], [0, 0, 1, 1], [], []>} : vector<16x16xbf16>, vector<16x128xbf16>, vector<16x128xf32> -> vector<16x128xf32>
    %63 = arith.addf %56, %62 : vector<16x128xf32>
    %c0_72 = arith.constant 0 : index
    %c0_73 = arith.constant 0 : index
    %c2_74 = arith.constant 2 : index
    %c1_75 = arith.constant 1 : index
    %c0_76 = arith.constant 0 : index
    %64 = vector.load %arg2[%c0_72, %c0_73, %c2_74, %c1_75, %c0_76] : memref<1x1x5x11x16xbf16, #tpu.memory_space<vmem>>, vector<1x1x2x8x16xbf16>
    %65 = vector.shape_cast %64 : vector<1x1x2x8x16xbf16> to vector<2x8x16xbf16>
    %66 = vector.shape_cast %65 : vector<2x8x16xbf16> to vector<16x16xbf16>
    %c9 = arith.constant 9 : index
    %c0_77 = arith.constant 0 : index
    %c0_78 = arith.constant 0 : index
    %67 = vector.load %arg3[%c9, %c0_77, %c0_78] : memref<16x16x128xbf16, #tpu.memory_space<vmem>>, vector<1x16x128xbf16>
    %68 = vector.shape_cast %67 : vector<1x16x128xbf16> to vector<16x128xbf16>
    %cst_79 = arith.constant dense<0.000000e+00> : vector<16x128xf32>
    %69 = tpu.matmul %66, %68, %cst_79 {dimension_numbers = #tpu.dot_dimension_numbers<[1], [0], [0], [1], [0, 0, 1, 1], [], []>} : vector<16x16xbf16>, vector<16x128xbf16>, vector<16x128xf32> -> vector<16x128xf32>
    %70 = arith.addf %63, %69 : vector<16x128xf32>
    %c0_80 = arith.constant 0 : index
    %c0_81 = arith.constant 0 : index
    %c2_82 = arith.constant 2 : index
    %c2_83 = arith.constant 2 : index
    %c0_84 = arith.constant 0 : index
    %71 = vector.load %arg2[%c0_80, %c0_81, %c2_82, %c2_83, %c0_84] : memref<1x1x5x11x16xbf16, #tpu.memory_space<vmem>>, vector<1x1x2x8x16xbf16>
    %72 = vector.shape_cast %71 : vector<1x1x2x8x16xbf16> to vector<2x8x16xbf16>
    %73 = vector.shape_cast %72 : vector<2x8x16xbf16> to vector<16x16xbf16>
    %c10 = arith.constant 10 : index
    %c0_85 = arith.constant 0 : index
    %c0_86 = arith.constant 0 : index
    %74 = vector.load %arg3[%c10, %c0_85, %c0_86] : memref<16x16x128xbf16, #tpu.memory_space<vmem>>, vector<1x16x128xbf16>
    %75 = vector.shape_cast %74 : vector<1x16x128xbf16> to vector<16x128xbf16>
    %cst_87 = arith.constant dense<0.000000e+00> : vector<16x128xf32>
    %76 = tpu.matmul %73, %75, %cst_87 {dimension_numbers = #tpu.dot_dimension_numbers<[1], [0], [0], [1], [0, 0, 1, 1], [], []>} : vector<16x16xbf16>, vector<16x128xbf16>, vector<16x128xf32> -> vector<16x128xf32>
    %77 = arith.addf %70, %76 : vector<16x128xf32>
    %c0_88 = arith.constant 0 : index
    %c0_89 = arith.constant 0 : index
    %c2_90 = arith.constant 2 : index
    %c3_91 = arith.constant 3 : index
    %c0_92 = arith.constant 0 : index
    %78 = vector.load %arg2[%c0_88, %c0_89, %c2_90, %c3_91, %c0_92] : memref<1x1x5x11x16xbf16, #tpu.memory_space<vmem>>, vector<1x1x2x8x16xbf16>
    %79 = vector.shape_cast %78 : vector<1x1x2x8x16xbf16> to vector<2x8x16xbf16>
    %80 = vector.shape_cast %79 : vector<2x8x16xbf16> to vector<16x16xbf16>
    %c11 = arith.constant 11 : index
    %c0_93 = arith.constant 0 : index
    %c0_94 = arith.constant 0 : index
    %81 = vector.load %arg3[%c11, %c0_93, %c0_94] : memref<16x16x128xbf16, #tpu.memory_space<vmem>>, vector<1x16x128xbf16>
    %82 = vector.shape_cast %81 : vector<1x16x128xbf16> to vector<16x128xbf16>
    %cst_95 = arith.constant dense<0.000000e+00> : vector<16x128xf32>
    %83 = tpu.matmul %80, %82, %cst_95 {dimension_numbers = #tpu.dot_dimension_numbers<[1], [0], [0], [1], [0, 0, 1, 1], [], []>} : vector<16x16xbf16>, vector<16x128xbf16>, vector<16x128xf32> -> vector<16x128xf32>
    %84 = arith.addf %77, %83 : vector<16x128xf32>
    %c0_96 = arith.constant 0 : index
    %c0_97 = arith.constant 0 : index
    %c3_98 = arith.constant 3 : index
    %c0_99 = arith.constant 0 : index
    %c0_100 = arith.constant 0 : index
    %85 = vector.load %arg2[%c0_96, %c0_97, %c3_98, %c0_99, %c0_100] : memref<1x1x5x11x16xbf16, #tpu.memory_space<vmem>>, vector<1x1x2x8x16xbf16>
    %86 = vector.shape_cast %85 : vector<1x1x2x8x16xbf16> to vector<2x8x16xbf16>
    %87 = vector.shape_cast %86 : vector<2x8x16xbf16> to vector<16x16xbf16>
    %c12 = arith.constant 12 : index
    %c0_101 = arith.constant 0 : index
    %c0_102 = arith.constant 0 : index
    %88 = vector.load %arg3[%c12, %c0_101, %c0_102] : memref<16x16x128xbf16, #tpu.memory_space<vmem>>, vector<1x16x128xbf16>
    %89 = vector.shape_cast %88 : vector<1x16x128xbf16> to vector<16x128xbf16>
    %cst_103 = arith.constant dense<0.000000e+00> : vector<16x128xf32>
    %90 = tpu.matmul %87, %89, %cst_103 {dimension_numbers = #tpu.dot_dimension_numbers<[1], [0], [0], [1], [0, 0, 1, 1], [], []>} : vector<16x16xbf16>, vector<16x128xbf16>, vector<16x128xf32> -> vector<16x128xf32>
    %91 = arith.addf %84, %90 : vector<16x128xf32>
    %c0_104 = arith.constant 0 : index
    %c0_105 = arith.constant 0 : index
    %c3_106 = arith.constant 3 : index
    %c1_107 = arith.constant 1 : index
    %c0_108 = arith.constant 0 : index
    %92 = vector.load %arg2[%c0_104, %c0_105, %c3_106, %c1_107, %c0_108] : memref<1x1x5x11x16xbf16, #tpu.memory_space<vmem>>, vector<1x1x2x8x16xbf16>
    %93 = vector.shape_cast %92 : vector<1x1x2x8x16xbf16> to vector<2x8x16xbf16>
    %94 = vector.shape_cast %93 : vector<2x8x16xbf16> to vector<16x16xbf16>
    %c13 = arith.constant 13 : index
    %c0_109 = arith.constant 0 : index
    %c0_110 = arith.constant 0 : index
    %95 = vector.load %arg3[%c13, %c0_109, %c0_110] : memref<16x16x128xbf16, #tpu.memory_space<vmem>>, vector<1x16x128xbf16>
    %96 = vector.shape_cast %95 : vector<1x16x128xbf16> to vector<16x128xbf16>
    %cst_111 = arith.constant dense<0.000000e+00> : vector<16x128xf32>
    %97 = tpu.matmul %94, %96, %cst_111 {dimension_numbers = #tpu.dot_dimension_numbers<[1], [0], [0], [1], [0, 0, 1, 1], [], []>} : vector<16x16xbf16>, vector<16x128xbf16>, vector<16x128xf32> -> vector<16x128xf32>
    %98 = arith.addf %91, %97 : vector<16x128xf32>
    %c0_112 = arith.constant 0 : index
    %c0_113 = arith.constant 0 : index
    %c3_114 = arith.constant 3 : index
    %c2_115 = arith.constant 2 : index
    %c0_116 = arith.constant 0 : index
    %99 = vector.load %arg2[%c0_112, %c0_113, %c3_114, %c2_115, %c0_116] : memref<1x1x5x11x16xbf16, #tpu.memory_space<vmem>>, vector<1x1x2x8x16xbf16>
    %100 = vector.shape_cast %99 : vector<1x1x2x8x16xbf16> to vector<2x8x16xbf16>
    %101 = vector.shape_cast %100 : vector<2x8x16xbf16> to vector<16x16xbf16>
    %c14 = arith.constant 14 : index
    %c0_117 = arith.constant 0 : index
    %c0_118 = arith.constant 0 : index
    %102 = vector.load %arg3[%c14, %c0_117, %c0_118] : memref<16x16x128xbf16, #tpu.memory_space<vmem>>, vector<1x16x128xbf16>
    %103 = vector.shape_cast %102 : vector<1x16x128xbf16> to vector<16x128xbf16>
    %cst_119 = arith.constant dense<0.000000e+00> : vector<16x128xf32>
    %104 = tpu.matmul %101, %103, %cst_119 {dimension_numbers = #tpu.dot_dimension_numbers<[1], [0], [0], [1], [0, 0, 1, 1], [], []>} : vector<16x16xbf16>, vector<16x128xbf16>, vector<16x128xf32> -> vector<16x128xf32>
    %105 = arith.addf %98, %104 : vector<16x128xf32>
    %c0_120 = arith.constant 0 : index
    %c0_121 = arith.constant 0 : index
    %c3_122 = arith.constant 3 : index
    %c3_123 = arith.constant 3 : index
    %c0_124 = arith.constant 0 : index
    %106 = vector.load %arg2[%c0_120, %c0_121, %c3_122, %c3_123, %c0_124] : memref<1x1x5x11x16xbf16, #tpu.memory_space<vmem>>, vector<1x1x2x8x16xbf16>
    %107 = vector.shape_cast %106 : vector<1x1x2x8x16xbf16> to vector<2x8x16xbf16>
    %108 = vector.shape_cast %107 : vector<2x8x16xbf16> to vector<16x16xbf16>
    %c15 = arith.constant 15 : index
    %c0_125 = arith.constant 0 : index
    %c0_126 = arith.constant 0 : index
    %109 = vector.load %arg3[%c15, %c0_125, %c0_126] : memref<16x16x128xbf16, #tpu.memory_space<vmem>>, vector<1x16x128xbf16>
    %110 = vector.shape_cast %109 : vector<1x16x128xbf16> to vector<16x128xbf16>
    %cst_127 = arith.constant dense<0.000000e+00> : vector<16x128xf32>
    %111 = tpu.matmul %108, %110, %cst_127 {dimension_numbers = #tpu.dot_dimension_numbers<[1], [0], [0], [1], [0, 0, 1, 1], [], []>} : vector<16x16xbf16>, vector<16x128xbf16>, vector<16x128xf32> -> vector<16x128xf32>
    %112 = arith.addf %105, %111 : vector<16x128xf32>
    %c0_128 = arith.constant 0 : index
    %c0_129 = arith.constant 0 : index
    %113 = vector.load %arg4[%c0_128, %c0_129] : memref<1x128xf32, #tpu.memory_space<vmem>>, vector<1x128xf32>
    %114 = vector.broadcast %113 : vector<1x128xf32> to vector<16x128xf32>
    %115 = arith.addf %112, %114 : vector<16x128xf32>
    %116 = vector.shape_cast %115 : vector<16x128xf32> to vector<2x8x128xf32>
    %117 = arith.truncf %116 : vector<2x8x128xf32> to vector<2x8x128xbf16>
    %c0_130 = arith.constant 0 : index
    %c0_131 = arith.constant 0 : index
    %c0_132 = arith.constant 0 : index
    %c0_133 = arith.constant 0 : index
    %118 = vector.load %arg5[%c0_130, %c0_131, %c0_132, %c0_133] : memref<1x2x8x128xbf16, #tpu.memory_space<vmem>>, vector<1x2x8x128xbf16>
    %119 = vector.shape_cast %118 : vector<1x2x8x128xbf16> to vector<2x8x128xbf16>
    %120 = vector.shape_cast %117 : vector<2x8x128xbf16> to vector<1x2x8x128xbf16>
    tpu.vector_store %arg5[%c0_130, %c0_131, %c0_132, %c0_133], %120 {strides = array<i32>} : memref<1x2x8x128xbf16, #tpu.memory_space<vmem>>, vector<1x2x8x128xbf16>,
    %c2_i32 = arith.constant 2 : i32
    %121 = arith.muli %arg1, %c2_i32 : i32
    %122 = tpu.iota {dimensions = array<i32: 0>} : vector<2x8x1xi32>
    %123 = tpu.iota {dimensions = array<i32: 1>} : vector<2x8x1xi32>
    %124 = vector.broadcast %121 : i32 to vector<2x8x1xi32>
    %125 = arith.addi %124, %122 : vector<2x8x1xi32>
    %c3_i32 = arith.constant 3 : i32
    %126 = vector.broadcast %c3_i32 : i32 to vector<2x8x1xi32>
    %127 = arith.cmpi slt, %125, %126 : vector<2x8x1xi32>
    %c3_i32_134 = arith.constant 3 : i32
    %128 = vector.broadcast %c3_i32_134 : i32 to vector<2x8x1xi32>
    %129 = arith.cmpi slt, %123, %128 : vector<2x8x1xi32>
    %130 = arith.andi %127, %129 : vector<2x8x1xi1>
    %cst_135 = arith.constant 0.000000e+00 : f32
    %131 = vector.shape_cast %130 : vector<2x8x1xi1> to vector<2x8x1xi1>
    %132 = vector.broadcast %131 : vector<2x8x1xi1> to vector<2x8x128xi1>
    %133 = vector.broadcast %cst_135 : f32 to vector<2x8x128xf32>
    %134 = arith.select %132, %116, %133 : vector<2x8x128xi1>, vector<2x8x128xf32>
    %135 = vector.shape_cast %134 : vector<2x8x128xf32> to vector<16x128xf32>
    %cst_136 = arith.constant dense<0.000000e+00> : vector<128xf32>
    %136 = vector.multi_reduction <add>, %135, %cst_136 [0] : vector<16x128xf32> to vector<128xf32>
    %137 = vector.shape_cast %136 : vector<128xf32> to vector<1x128xf32>
    %c0_137 = arith.constant 0 : index
    %c0_138 = arith.constant 0 : index
    %c0_139 = arith.constant 0 : index
    %c0_140 = arith.constant 0 : index
    %138 = vector.load %arg6[%c0_137, %c0_138, %c0_139, %c0_140] : memref<1x1x2x128xf32, #tpu.memory_space<vmem>>, vector<1x1x1x128xf32>
    %139 = vector.shape_cast %138 : vector<1x1x1x128xf32> to vector<1x128xf32>
    %140 = vector.shape_cast %137 : vector<1x128xf32> to vector<1x1x1x128xf32>
    tpu.vector_store %arg6[%c0_137, %c0_138, %c0_139, %c0_140], %140 {strides = array<i32>} : memref<1x1x2x128xf32, #tpu.memory_space<vmem>>, vector<1x1x1x128xf32>,
    %141 = arith.mulf %135, %135 : vector<16x128xf32>
    %cst_141 = arith.constant dense<0.000000e+00> : vector<128xf32>
    %142 = vector.multi_reduction <add>, %141, %cst_141 [0] : vector<16x128xf32> to vector<128xf32>
    %143 = vector.shape_cast %142 : vector<128xf32> to vector<1x128xf32>
    %c0_142 = arith.constant 0 : index
    %c0_143 = arith.constant 0 : index
    %c1_144 = arith.constant 1 : index
    %c0_145 = arith.constant 0 : index
    %144 = vector.load %arg6[%c0_142, %c0_143, %c1_144, %c0_145] : memref<1x1x2x128xf32, #tpu.memory_space<vmem>>, vector<1x1x1x128xf32>
    %145 = vector.shape_cast %144 : vector<1x1x1x128xf32> to vector<1x128xf32>
    %146 = vector.shape_cast %143 : vector<1x128xf32> to vector<1x1x1x128xf32>
    tpu.vector_store %arg6[%c0_142, %c0_143, %c1_144, %c0_145], %146 {strides = array<i32>} : memref<1x1x2x128xf32, #tpu.memory_space<vmem>>, vector<1x1x1x128xf32>,
    return
  }
  func.func @transform_0(%arg0: i32, %arg1: i32) -> (i32, i32, i32, i32, i32) {
    %c0_i32 = arith.constant 0 : i32
    %c0_i32_0 = arith.constant 0 : i32
    %c0_i32_1 = arith.constant 0 : i32
    %c0_i32_2 = arith.constant 0 : i32
    return %arg0, %arg1, %c0_i32, %c0_i32_0, %c0_i32_1 : i32, i32, i32, i32, i32
  }
  func.func @transform_1(%arg0: i32, %arg1: i32) -> (i32, i32, i32) {
    %c0_i32 = arith.constant 0 : i32
    %c0_i32_0 = arith.constant 0 : i32
    %c0_i32_1 = arith.constant 0 : i32
    %c0_i32_2 = arith.constant 0 : i32
    return %c0_i32, %c0_i32_0, %c0_i32_1 : i32, i32, i32
  }
  func.func @transform_2(%arg0: i32, %arg1: i32) -> (i32, i32) {
    %c0_i32 = arith.constant 0 : i32
    %c0_i32_0 = arith.constant 0 : i32
    %c0_i32_1 = arith.constant 0 : i32
    return %c0_i32, %c0_i32_0 : i32, i32
  }
  func.func @transform_3(%arg0: i32, %arg1: i32) -> (i32, i32, i32, i32) {
    %c0_i32 = arith.constant 0 : i32
    %c0_i32_0 = arith.constant 0 : i32
    %c0_i32_1 = arith.constant 0 : i32
    return %arg0, %arg1, %c0_i32, %c0_i32_0 : i32, i32, i32, i32
  }
  func.func @transform_4(%arg0: i32, %arg1: i32) -> (i32, i32, i32, i32) {
    %c0_i32 = arith.constant 0 : i32
    %c0_i32_0 = arith.constant 0 : i32
    %c0_i32_1 = arith.constant 0 : i32
    return %arg0, %arg1, %c0_i32, %c0_i32_0 : i32, i32, i32, i32
  }
}

module attributes {stable_mosaic.version = 11 : i64} {
  func.func @_conv_kernel(%arg0: i32, %arg1: i32, %arg2: memref<1x1x4x11x8xbf16, #tpu.memory_space<vmem>>, %arg3: memref<16x8x128xbf16, #tpu.memory_space<vmem>>, %arg4: memref<1x128xf32, #tpu.memory_space<vmem>>, %arg5: memref<1x1x8x128xf32, #tpu.memory_space<vmem>>) attributes {dimension_semantics = [#tpu.dimension_semantics<parallel>, #tpu.dimension_semantics<parallel>], iteration_bounds = array<i64: 2, 2>, scalar_prefetch = 0 : i64, scratch_operands = 0 : i64, tpu.core_type = #tpu.core_type<tc>, window_params = [{transform_indices = @transform_0, window_bounds = array<i64: 1, 1, 4, 11, 8>}, {pipeline_mode = #tpu.pipeline_mode<synchronous>, transform_indices = @transform_1, window_bounds = array<i64: 16, 8, 128>}, {pipeline_mode = #tpu.pipeline_mode<synchronous>, transform_indices = @transform_2, window_bounds = array<i64: 1, 128>}, {transform_indices = @transform_3, window_bounds = array<i64: 1, 1, 8, 128>}]} {
    %cst = arith.constant 0.000000e+00 : f32
    %0 = vector.broadcast %cst : f32 to vector<8x128xf32>
    %c0 = arith.constant 0 : index
    %c0_0 = arith.constant 0 : index
    %c0_1 = arith.constant 0 : index
    %c0_2 = arith.constant 0 : index
    %c0_3 = arith.constant 0 : index
    %1 = vector.load %arg2[%c0, %c0_0, %c0_1, %c0_2, %c0_3] : memref<1x1x4x11x8xbf16, #tpu.memory_space<vmem>>, vector<1x1x1x8x8xbf16>
    %2 = vector.shape_cast %1 : vector<1x1x1x8x8xbf16> to vector<1x8x8xbf16>
    %3 = vector.shape_cast %2 : vector<1x8x8xbf16> to vector<8x8xbf16>
    %c0_4 = arith.constant 0 : index
    %c0_5 = arith.constant 0 : index
    %c0_6 = arith.constant 0 : index
    %4 = vector.load %arg3[%c0_4, %c0_5, %c0_6] : memref<16x8x128xbf16, #tpu.memory_space<vmem>>, vector<1x8x128xbf16>
    %5 = vector.shape_cast %4 : vector<1x8x128xbf16> to vector<8x128xbf16>
    %cst_7 = arith.constant dense<0.000000e+00> : vector<8x128xf32>
    %6 = tpu.matmul %3, %5, %cst_7 {dimension_numbers = #tpu.dot_dimension_numbers<[1], [0], [0], [1], [0, 0, 1, 1], [], []>} : vector<8x8xbf16>, vector<8x128xbf16>, vector<8x128xf32> -> vector<8x128xf32>
    %7 = arith.addf %0, %6 : vector<8x128xf32>
    %c0_8 = arith.constant 0 : index
    %c0_9 = arith.constant 0 : index
    %c0_10 = arith.constant 0 : index
    %c1 = arith.constant 1 : index
    %c0_11 = arith.constant 0 : index
    %8 = vector.load %arg2[%c0_8, %c0_9, %c0_10, %c1, %c0_11] : memref<1x1x4x11x8xbf16, #tpu.memory_space<vmem>>, vector<1x1x1x8x8xbf16>
    %9 = vector.shape_cast %8 : vector<1x1x1x8x8xbf16> to vector<1x8x8xbf16>
    %10 = vector.shape_cast %9 : vector<1x8x8xbf16> to vector<8x8xbf16>
    %c1_12 = arith.constant 1 : index
    %c0_13 = arith.constant 0 : index
    %c0_14 = arith.constant 0 : index
    %11 = vector.load %arg3[%c1_12, %c0_13, %c0_14] : memref<16x8x128xbf16, #tpu.memory_space<vmem>>, vector<1x8x128xbf16>
    %12 = vector.shape_cast %11 : vector<1x8x128xbf16> to vector<8x128xbf16>
    %cst_15 = arith.constant dense<0.000000e+00> : vector<8x128xf32>
    %13 = tpu.matmul %10, %12, %cst_15 {dimension_numbers = #tpu.dot_dimension_numbers<[1], [0], [0], [1], [0, 0, 1, 1], [], []>} : vector<8x8xbf16>, vector<8x128xbf16>, vector<8x128xf32> -> vector<8x128xf32>
    %14 = arith.addf %7, %13 : vector<8x128xf32>
    %c0_16 = arith.constant 0 : index
    %c0_17 = arith.constant 0 : index
    %c0_18 = arith.constant 0 : index
    %c2 = arith.constant 2 : index
    %c0_19 = arith.constant 0 : index
    %15 = vector.load %arg2[%c0_16, %c0_17, %c0_18, %c2, %c0_19] : memref<1x1x4x11x8xbf16, #tpu.memory_space<vmem>>, vector<1x1x1x8x8xbf16>
    %16 = vector.shape_cast %15 : vector<1x1x1x8x8xbf16> to vector<1x8x8xbf16>
    %17 = vector.shape_cast %16 : vector<1x8x8xbf16> to vector<8x8xbf16>
    %c2_20 = arith.constant 2 : index
    %c0_21 = arith.constant 0 : index
    %c0_22 = arith.constant 0 : index
    %18 = vector.load %arg3[%c2_20, %c0_21, %c0_22] : memref<16x8x128xbf16, #tpu.memory_space<vmem>>, vector<1x8x128xbf16>
    %19 = vector.shape_cast %18 : vector<1x8x128xbf16> to vector<8x128xbf16>
    %cst_23 = arith.constant dense<0.000000e+00> : vector<8x128xf32>
    %20 = tpu.matmul %17, %19, %cst_23 {dimension_numbers = #tpu.dot_dimension_numbers<[1], [0], [0], [1], [0, 0, 1, 1], [], []>} : vector<8x8xbf16>, vector<8x128xbf16>, vector<8x128xf32> -> vector<8x128xf32>
    %21 = arith.addf %14, %20 : vector<8x128xf32>
    %c0_24 = arith.constant 0 : index
    %c0_25 = arith.constant 0 : index
    %c0_26 = arith.constant 0 : index
    %c3 = arith.constant 3 : index
    %c0_27 = arith.constant 0 : index
    %22 = vector.load %arg2[%c0_24, %c0_25, %c0_26, %c3, %c0_27] : memref<1x1x4x11x8xbf16, #tpu.memory_space<vmem>>, vector<1x1x1x8x8xbf16>
    %23 = vector.shape_cast %22 : vector<1x1x1x8x8xbf16> to vector<1x8x8xbf16>
    %24 = vector.shape_cast %23 : vector<1x8x8xbf16> to vector<8x8xbf16>
    %c3_28 = arith.constant 3 : index
    %c0_29 = arith.constant 0 : index
    %c0_30 = arith.constant 0 : index
    %25 = vector.load %arg3[%c3_28, %c0_29, %c0_30] : memref<16x8x128xbf16, #tpu.memory_space<vmem>>, vector<1x8x128xbf16>
    %26 = vector.shape_cast %25 : vector<1x8x128xbf16> to vector<8x128xbf16>
    %cst_31 = arith.constant dense<0.000000e+00> : vector<8x128xf32>
    %27 = tpu.matmul %24, %26, %cst_31 {dimension_numbers = #tpu.dot_dimension_numbers<[1], [0], [0], [1], [0, 0, 1, 1], [], []>} : vector<8x8xbf16>, vector<8x128xbf16>, vector<8x128xf32> -> vector<8x128xf32>
    %28 = arith.addf %21, %27 : vector<8x128xf32>
    %c0_32 = arith.constant 0 : index
    %c0_33 = arith.constant 0 : index
    %c1_34 = arith.constant 1 : index
    %c0_35 = arith.constant 0 : index
    %c0_36 = arith.constant 0 : index
    %29 = vector.load %arg2[%c0_32, %c0_33, %c1_34, %c0_35, %c0_36] : memref<1x1x4x11x8xbf16, #tpu.memory_space<vmem>>, vector<1x1x1x8x8xbf16>
    %30 = vector.shape_cast %29 : vector<1x1x1x8x8xbf16> to vector<1x8x8xbf16>
    %31 = vector.shape_cast %30 : vector<1x8x8xbf16> to vector<8x8xbf16>
    %c4 = arith.constant 4 : index
    %c0_37 = arith.constant 0 : index
    %c0_38 = arith.constant 0 : index
    %32 = vector.load %arg3[%c4, %c0_37, %c0_38] : memref<16x8x128xbf16, #tpu.memory_space<vmem>>, vector<1x8x128xbf16>
    %33 = vector.shape_cast %32 : vector<1x8x128xbf16> to vector<8x128xbf16>
    %cst_39 = arith.constant dense<0.000000e+00> : vector<8x128xf32>
    %34 = tpu.matmul %31, %33, %cst_39 {dimension_numbers = #tpu.dot_dimension_numbers<[1], [0], [0], [1], [0, 0, 1, 1], [], []>} : vector<8x8xbf16>, vector<8x128xbf16>, vector<8x128xf32> -> vector<8x128xf32>
    %35 = arith.addf %28, %34 : vector<8x128xf32>
    %c0_40 = arith.constant 0 : index
    %c0_41 = arith.constant 0 : index
    %c1_42 = arith.constant 1 : index
    %c1_43 = arith.constant 1 : index
    %c0_44 = arith.constant 0 : index
    %36 = vector.load %arg2[%c0_40, %c0_41, %c1_42, %c1_43, %c0_44] : memref<1x1x4x11x8xbf16, #tpu.memory_space<vmem>>, vector<1x1x1x8x8xbf16>
    %37 = vector.shape_cast %36 : vector<1x1x1x8x8xbf16> to vector<1x8x8xbf16>
    %38 = vector.shape_cast %37 : vector<1x8x8xbf16> to vector<8x8xbf16>
    %c5 = arith.constant 5 : index
    %c0_45 = arith.constant 0 : index
    %c0_46 = arith.constant 0 : index
    %39 = vector.load %arg3[%c5, %c0_45, %c0_46] : memref<16x8x128xbf16, #tpu.memory_space<vmem>>, vector<1x8x128xbf16>
    %40 = vector.shape_cast %39 : vector<1x8x128xbf16> to vector<8x128xbf16>
    %cst_47 = arith.constant dense<0.000000e+00> : vector<8x128xf32>
    %41 = tpu.matmul %38, %40, %cst_47 {dimension_numbers = #tpu.dot_dimension_numbers<[1], [0], [0], [1], [0, 0, 1, 1], [], []>} : vector<8x8xbf16>, vector<8x128xbf16>, vector<8x128xf32> -> vector<8x128xf32>
    %42 = arith.addf %35, %41 : vector<8x128xf32>
    %c0_48 = arith.constant 0 : index
    %c0_49 = arith.constant 0 : index
    %c1_50 = arith.constant 1 : index
    %c2_51 = arith.constant 2 : index
    %c0_52 = arith.constant 0 : index
    %43 = vector.load %arg2[%c0_48, %c0_49, %c1_50, %c2_51, %c0_52] : memref<1x1x4x11x8xbf16, #tpu.memory_space<vmem>>, vector<1x1x1x8x8xbf16>
    %44 = vector.shape_cast %43 : vector<1x1x1x8x8xbf16> to vector<1x8x8xbf16>
    %45 = vector.shape_cast %44 : vector<1x8x8xbf16> to vector<8x8xbf16>
    %c6 = arith.constant 6 : index
    %c0_53 = arith.constant 0 : index
    %c0_54 = arith.constant 0 : index
    %46 = vector.load %arg3[%c6, %c0_53, %c0_54] : memref<16x8x128xbf16, #tpu.memory_space<vmem>>, vector<1x8x128xbf16>
    %47 = vector.shape_cast %46 : vector<1x8x128xbf16> to vector<8x128xbf16>
    %cst_55 = arith.constant dense<0.000000e+00> : vector<8x128xf32>
    %48 = tpu.matmul %45, %47, %cst_55 {dimension_numbers = #tpu.dot_dimension_numbers<[1], [0], [0], [1], [0, 0, 1, 1], [], []>} : vector<8x8xbf16>, vector<8x128xbf16>, vector<8x128xf32> -> vector<8x128xf32>
    %49 = arith.addf %42, %48 : vector<8x128xf32>
    %c0_56 = arith.constant 0 : index
    %c0_57 = arith.constant 0 : index
    %c1_58 = arith.constant 1 : index
    %c3_59 = arith.constant 3 : index
    %c0_60 = arith.constant 0 : index
    %50 = vector.load %arg2[%c0_56, %c0_57, %c1_58, %c3_59, %c0_60] : memref<1x1x4x11x8xbf16, #tpu.memory_space<vmem>>, vector<1x1x1x8x8xbf16>
    %51 = vector.shape_cast %50 : vector<1x1x1x8x8xbf16> to vector<1x8x8xbf16>
    %52 = vector.shape_cast %51 : vector<1x8x8xbf16> to vector<8x8xbf16>
    %c7 = arith.constant 7 : index
    %c0_61 = arith.constant 0 : index
    %c0_62 = arith.constant 0 : index
    %53 = vector.load %arg3[%c7, %c0_61, %c0_62] : memref<16x8x128xbf16, #tpu.memory_space<vmem>>, vector<1x8x128xbf16>
    %54 = vector.shape_cast %53 : vector<1x8x128xbf16> to vector<8x128xbf16>
    %cst_63 = arith.constant dense<0.000000e+00> : vector<8x128xf32>
    %55 = tpu.matmul %52, %54, %cst_63 {dimension_numbers = #tpu.dot_dimension_numbers<[1], [0], [0], [1], [0, 0, 1, 1], [], []>} : vector<8x8xbf16>, vector<8x128xbf16>, vector<8x128xf32> -> vector<8x128xf32>
    %56 = arith.addf %49, %55 : vector<8x128xf32>
    %c0_64 = arith.constant 0 : index
    %c0_65 = arith.constant 0 : index
    %c2_66 = arith.constant 2 : index
    %c0_67 = arith.constant 0 : index
    %c0_68 = arith.constant 0 : index
    %57 = vector.load %arg2[%c0_64, %c0_65, %c2_66, %c0_67, %c0_68] : memref<1x1x4x11x8xbf16, #tpu.memory_space<vmem>>, vector<1x1x1x8x8xbf16>
    %58 = vector.shape_cast %57 : vector<1x1x1x8x8xbf16> to vector<1x8x8xbf16>
    %59 = vector.shape_cast %58 : vector<1x8x8xbf16> to vector<8x8xbf16>
    %c8 = arith.constant 8 : index
    %c0_69 = arith.constant 0 : index
    %c0_70 = arith.constant 0 : index
    %60 = vector.load %arg3[%c8, %c0_69, %c0_70] : memref<16x8x128xbf16, #tpu.memory_space<vmem>>, vector<1x8x128xbf16>
    %61 = vector.shape_cast %60 : vector<1x8x128xbf16> to vector<8x128xbf16>
    %cst_71 = arith.constant dense<0.000000e+00> : vector<8x128xf32>
    %62 = tpu.matmul %59, %61, %cst_71 {dimension_numbers = #tpu.dot_dimension_numbers<[1], [0], [0], [1], [0, 0, 1, 1], [], []>} : vector<8x8xbf16>, vector<8x128xbf16>, vector<8x128xf32> -> vector<8x128xf32>
    %63 = arith.addf %56, %62 : vector<8x128xf32>
    %c0_72 = arith.constant 0 : index
    %c0_73 = arith.constant 0 : index
    %c2_74 = arith.constant 2 : index
    %c1_75 = arith.constant 1 : index
    %c0_76 = arith.constant 0 : index
    %64 = vector.load %arg2[%c0_72, %c0_73, %c2_74, %c1_75, %c0_76] : memref<1x1x4x11x8xbf16, #tpu.memory_space<vmem>>, vector<1x1x1x8x8xbf16>
    %65 = vector.shape_cast %64 : vector<1x1x1x8x8xbf16> to vector<1x8x8xbf16>
    %66 = vector.shape_cast %65 : vector<1x8x8xbf16> to vector<8x8xbf16>
    %c9 = arith.constant 9 : index
    %c0_77 = arith.constant 0 : index
    %c0_78 = arith.constant 0 : index
    %67 = vector.load %arg3[%c9, %c0_77, %c0_78] : memref<16x8x128xbf16, #tpu.memory_space<vmem>>, vector<1x8x128xbf16>
    %68 = vector.shape_cast %67 : vector<1x8x128xbf16> to vector<8x128xbf16>
    %cst_79 = arith.constant dense<0.000000e+00> : vector<8x128xf32>
    %69 = tpu.matmul %66, %68, %cst_79 {dimension_numbers = #tpu.dot_dimension_numbers<[1], [0], [0], [1], [0, 0, 1, 1], [], []>} : vector<8x8xbf16>, vector<8x128xbf16>, vector<8x128xf32> -> vector<8x128xf32>
    %70 = arith.addf %63, %69 : vector<8x128xf32>
    %c0_80 = arith.constant 0 : index
    %c0_81 = arith.constant 0 : index
    %c2_82 = arith.constant 2 : index
    %c2_83 = arith.constant 2 : index
    %c0_84 = arith.constant 0 : index
    %71 = vector.load %arg2[%c0_80, %c0_81, %c2_82, %c2_83, %c0_84] : memref<1x1x4x11x8xbf16, #tpu.memory_space<vmem>>, vector<1x1x1x8x8xbf16>
    %72 = vector.shape_cast %71 : vector<1x1x1x8x8xbf16> to vector<1x8x8xbf16>
    %73 = vector.shape_cast %72 : vector<1x8x8xbf16> to vector<8x8xbf16>
    %c10 = arith.constant 10 : index
    %c0_85 = arith.constant 0 : index
    %c0_86 = arith.constant 0 : index
    %74 = vector.load %arg3[%c10, %c0_85, %c0_86] : memref<16x8x128xbf16, #tpu.memory_space<vmem>>, vector<1x8x128xbf16>
    %75 = vector.shape_cast %74 : vector<1x8x128xbf16> to vector<8x128xbf16>
    %cst_87 = arith.constant dense<0.000000e+00> : vector<8x128xf32>
    %76 = tpu.matmul %73, %75, %cst_87 {dimension_numbers = #tpu.dot_dimension_numbers<[1], [0], [0], [1], [0, 0, 1, 1], [], []>} : vector<8x8xbf16>, vector<8x128xbf16>, vector<8x128xf32> -> vector<8x128xf32>
    %77 = arith.addf %70, %76 : vector<8x128xf32>
    %c0_88 = arith.constant 0 : index
    %c0_89 = arith.constant 0 : index
    %c2_90 = arith.constant 2 : index
    %c3_91 = arith.constant 3 : index
    %c0_92 = arith.constant 0 : index
    %78 = vector.load %arg2[%c0_88, %c0_89, %c2_90, %c3_91, %c0_92] : memref<1x1x4x11x8xbf16, #tpu.memory_space<vmem>>, vector<1x1x1x8x8xbf16>
    %79 = vector.shape_cast %78 : vector<1x1x1x8x8xbf16> to vector<1x8x8xbf16>
    %80 = vector.shape_cast %79 : vector<1x8x8xbf16> to vector<8x8xbf16>
    %c11 = arith.constant 11 : index
    %c0_93 = arith.constant 0 : index
    %c0_94 = arith.constant 0 : index
    %81 = vector.load %arg3[%c11, %c0_93, %c0_94] : memref<16x8x128xbf16, #tpu.memory_space<vmem>>, vector<1x8x128xbf16>
    %82 = vector.shape_cast %81 : vector<1x8x128xbf16> to vector<8x128xbf16>
    %cst_95 = arith.constant dense<0.000000e+00> : vector<8x128xf32>
    %83 = tpu.matmul %80, %82, %cst_95 {dimension_numbers = #tpu.dot_dimension_numbers<[1], [0], [0], [1], [0, 0, 1, 1], [], []>} : vector<8x8xbf16>, vector<8x128xbf16>, vector<8x128xf32> -> vector<8x128xf32>
    %84 = arith.addf %77, %83 : vector<8x128xf32>
    %c0_96 = arith.constant 0 : index
    %c0_97 = arith.constant 0 : index
    %c3_98 = arith.constant 3 : index
    %c0_99 = arith.constant 0 : index
    %c0_100 = arith.constant 0 : index
    %85 = vector.load %arg2[%c0_96, %c0_97, %c3_98, %c0_99, %c0_100] : memref<1x1x4x11x8xbf16, #tpu.memory_space<vmem>>, vector<1x1x1x8x8xbf16>
    %86 = vector.shape_cast %85 : vector<1x1x1x8x8xbf16> to vector<1x8x8xbf16>
    %87 = vector.shape_cast %86 : vector<1x8x8xbf16> to vector<8x8xbf16>
    %c12 = arith.constant 12 : index
    %c0_101 = arith.constant 0 : index
    %c0_102 = arith.constant 0 : index
    %88 = vector.load %arg3[%c12, %c0_101, %c0_102] : memref<16x8x128xbf16, #tpu.memory_space<vmem>>, vector<1x8x128xbf16>
    %89 = vector.shape_cast %88 : vector<1x8x128xbf16> to vector<8x128xbf16>
    %cst_103 = arith.constant dense<0.000000e+00> : vector<8x128xf32>
    %90 = tpu.matmul %87, %89, %cst_103 {dimension_numbers = #tpu.dot_dimension_numbers<[1], [0], [0], [1], [0, 0, 1, 1], [], []>} : vector<8x8xbf16>, vector<8x128xbf16>, vector<8x128xf32> -> vector<8x128xf32>
    %91 = arith.addf %84, %90 : vector<8x128xf32>
    %c0_104 = arith.constant 0 : index
    %c0_105 = arith.constant 0 : index
    %c3_106 = arith.constant 3 : index
    %c1_107 = arith.constant 1 : index
    %c0_108 = arith.constant 0 : index
    %92 = vector.load %arg2[%c0_104, %c0_105, %c3_106, %c1_107, %c0_108] : memref<1x1x4x11x8xbf16, #tpu.memory_space<vmem>>, vector<1x1x1x8x8xbf16>
    %93 = vector.shape_cast %92 : vector<1x1x1x8x8xbf16> to vector<1x8x8xbf16>
    %94 = vector.shape_cast %93 : vector<1x8x8xbf16> to vector<8x8xbf16>
    %c13 = arith.constant 13 : index
    %c0_109 = arith.constant 0 : index
    %c0_110 = arith.constant 0 : index
    %95 = vector.load %arg3[%c13, %c0_109, %c0_110] : memref<16x8x128xbf16, #tpu.memory_space<vmem>>, vector<1x8x128xbf16>
    %96 = vector.shape_cast %95 : vector<1x8x128xbf16> to vector<8x128xbf16>
    %cst_111 = arith.constant dense<0.000000e+00> : vector<8x128xf32>
    %97 = tpu.matmul %94, %96, %cst_111 {dimension_numbers = #tpu.dot_dimension_numbers<[1], [0], [0], [1], [0, 0, 1, 1], [], []>} : vector<8x8xbf16>, vector<8x128xbf16>, vector<8x128xf32> -> vector<8x128xf32>
    %98 = arith.addf %91, %97 : vector<8x128xf32>
    %c0_112 = arith.constant 0 : index
    %c0_113 = arith.constant 0 : index
    %c3_114 = arith.constant 3 : index
    %c2_115 = arith.constant 2 : index
    %c0_116 = arith.constant 0 : index
    %99 = vector.load %arg2[%c0_112, %c0_113, %c3_114, %c2_115, %c0_116] : memref<1x1x4x11x8xbf16, #tpu.memory_space<vmem>>, vector<1x1x1x8x8xbf16>
    %100 = vector.shape_cast %99 : vector<1x1x1x8x8xbf16> to vector<1x8x8xbf16>
    %101 = vector.shape_cast %100 : vector<1x8x8xbf16> to vector<8x8xbf16>
    %c14 = arith.constant 14 : index
    %c0_117 = arith.constant 0 : index
    %c0_118 = arith.constant 0 : index
    %102 = vector.load %arg3[%c14, %c0_117, %c0_118] : memref<16x8x128xbf16, #tpu.memory_space<vmem>>, vector<1x8x128xbf16>
    %103 = vector.shape_cast %102 : vector<1x8x128xbf16> to vector<8x128xbf16>
    %cst_119 = arith.constant dense<0.000000e+00> : vector<8x128xf32>
    %104 = tpu.matmul %101, %103, %cst_119 {dimension_numbers = #tpu.dot_dimension_numbers<[1], [0], [0], [1], [0, 0, 1, 1], [], []>} : vector<8x8xbf16>, vector<8x128xbf16>, vector<8x128xf32> -> vector<8x128xf32>
    %105 = arith.addf %98, %104 : vector<8x128xf32>
    %c0_120 = arith.constant 0 : index
    %c0_121 = arith.constant 0 : index
    %c3_122 = arith.constant 3 : index
    %c3_123 = arith.constant 3 : index
    %c0_124 = arith.constant 0 : index
    %106 = vector.load %arg2[%c0_120, %c0_121, %c3_122, %c3_123, %c0_124] : memref<1x1x4x11x8xbf16, #tpu.memory_space<vmem>>, vector<1x1x1x8x8xbf16>
    %107 = vector.shape_cast %106 : vector<1x1x1x8x8xbf16> to vector<1x8x8xbf16>
    %108 = vector.shape_cast %107 : vector<1x8x8xbf16> to vector<8x8xbf16>
    %c15 = arith.constant 15 : index
    %c0_125 = arith.constant 0 : index
    %c0_126 = arith.constant 0 : index
    %109 = vector.load %arg3[%c15, %c0_125, %c0_126] : memref<16x8x128xbf16, #tpu.memory_space<vmem>>, vector<1x8x128xbf16>
    %110 = vector.shape_cast %109 : vector<1x8x128xbf16> to vector<8x128xbf16>
    %cst_127 = arith.constant dense<0.000000e+00> : vector<8x128xf32>
    %111 = tpu.matmul %108, %110, %cst_127 {dimension_numbers = #tpu.dot_dimension_numbers<[1], [0], [0], [1], [0, 0, 1, 1], [], []>} : vector<8x8xbf16>, vector<8x128xbf16>, vector<8x128xf32> -> vector<8x128xf32>
    %112 = arith.addf %105, %111 : vector<8x128xf32>
    %c0_128 = arith.constant 0 : index
    %c0_129 = arith.constant 0 : index
    %113 = vector.load %arg4[%c0_128, %c0_129] : memref<1x128xf32, #tpu.memory_space<vmem>>, vector<1x128xf32>
    %114 = vector.broadcast %113 : vector<1x128xf32> to vector<8x128xf32>
    %115 = arith.addf %112, %114 : vector<8x128xf32>
    %116 = vector.shape_cast %115 : vector<8x128xf32> to vector<1x8x128xf32>
    %c0_130 = arith.constant 0 : index
    %c0_131 = arith.constant 0 : index
    %c0_132 = arith.constant 0 : index
    %c0_133 = arith.constant 0 : index
    %117 = vector.load %arg5[%c0_130, %c0_131, %c0_132, %c0_133] : memref<1x1x8x128xf32, #tpu.memory_space<vmem>>, vector<1x1x8x128xf32>
    %118 = vector.shape_cast %117 : vector<1x1x8x128xf32> to vector<1x8x128xf32>
    %119 = vector.shape_cast %116 : vector<1x8x128xf32> to vector<1x1x8x128xf32>
    tpu.vector_store %arg5[%c0_130, %c0_131, %c0_132, %c0_133], %119 {strides = array<i32>} : memref<1x1x8x128xf32, #tpu.memory_space<vmem>>, vector<1x1x8x128xf32>,
    return
  }
  func.func @transform_0(%arg0: i32, %arg1: i32) -> (i32, i32, i32, i32, i32) {
    %c0_i32 = arith.constant 0 : i32
    %c0_i32_0 = arith.constant 0 : i32
    %c0_i32_1 = arith.constant 0 : i32
    %c0_i32_2 = arith.constant 0 : i32
    return %arg0, %arg1, %c0_i32, %c0_i32_0, %c0_i32_1 : i32, i32, i32, i32, i32
  }
  func.func @transform_1(%arg0: i32, %arg1: i32) -> (i32, i32, i32) {
    %c0_i32 = arith.constant 0 : i32
    %c0_i32_0 = arith.constant 0 : i32
    %c0_i32_1 = arith.constant 0 : i32
    %c0_i32_2 = arith.constant 0 : i32
    return %c0_i32, %c0_i32_0, %c0_i32_1 : i32, i32, i32
  }
  func.func @transform_2(%arg0: i32, %arg1: i32) -> (i32, i32) {
    %c0_i32 = arith.constant 0 : i32
    %c0_i32_0 = arith.constant 0 : i32
    %c0_i32_1 = arith.constant 0 : i32
    return %c0_i32, %c0_i32_0 : i32, i32
  }
  func.func @transform_3(%arg0: i32, %arg1: i32) -> (i32, i32, i32, i32) {
    %c0_i32 = arith.constant 0 : i32
    %c0_i32_0 = arith.constant 0 : i32
    %c0_i32_1 = arith.constant 0 : i32
    return %arg0, %arg1, %c0_i32, %c0_i32_0 : i32, i32, i32, i32
  }
}

</mosaic_0001>

<bundles_post_ra>
// kernel: discriminator_forward.4
= control target key start
LH: loop header
LB: loop body
LE: loop exit
PB: predicated region body
PF: predicated region fallthrough
CT: control target
= control target key end

     0   :  { %s911_s12 = smov 0   ;;  %s913_s13 = smov 0   ;;  %s1032_s0 = inlined_call_operand.vmem [shape: bf16[2,3,4,9,16], index: 0, kind: input, shape index: {}]   ;;  %s1033_s1 = inlined_call_operand.vmem [shape: bf16[4,16,128], index: 1, kind: input, shape index: {}]   ;;  %s1034_s2 = inlined_call_operand.vmem [shape: f32[1,128], index: 2, kind: input, shape index: {}]   ;;  %s1035_s3 = inlined_call_operand.vmem [shape: bf16[2,9,8,128], index: 3, kind: output, shape index: {}]  }
   0x1   :  { %s915_s14 = smov 0   ;;  %s917_s15 = smov 0  }
   0x2   :  { %s919_s16 = smov 0  }
   0x3 LB: > { %s22_s17 = sadd.s32 1, %s881_s14  ;;  %s25_s18 = sadd.s32 1, %s885_s15  ;;  %s889_s16 = sphi %s919_s16, %s13_s16   ;;  %s885_s15 = sphi %s917_s15, %s1041_s15   ;;  %s881_s14 = sphi %s915_s14, %s1040_s14   ;;  %s877_s13 = sphi %s913_s13, %s1039_s13   ;;  %s873_s12 = sphi %s911_s12, %s1038_s12  }
   0x4   : > { %p23_p0 = scmp.ge.s32.totalorder %s22_s17, 3  ;;  %p718_p1 = scmp.ge.s32.totalorder %s889_s16, 1 }
   0x5   : > { %p157_p2 = scmp.lt.s32.totalorder %s889_s16, 7 }
   0x6   : > { %s1043_s17 = smov (%p23_p0, %s22_s17), 0  ;;  %s1045_s18 = smov (!%p23_p0, %s25_s18), %s885_s15 }
   0x7   : > { %p158_p3 = pnand %p718_p1, %p157_p2  ;;  %p27_p4 = scmp.ge.s32.totalorder %s1045_s18, 2 }
   0x8   : > { %v843_v0 = vld [vmem:[%s1033_s1 + $0x8] sm:$0xff] (!%p158_p3)   ;;  %p189_p5 = scmp.lt.s32.totalorder (!%p158_p3), %s877_s13, 1  ;;  %v844_v1 = vld [vmem:[%s1033_s1] sm:$0xff] (!%p158_p3)   ;;  %p191_p6 = scmp.lt.s32.totalorder (!%p158_p3), %s873_s12, 2  ;;  %v957_v2 = vld [vmem:[%s1033_s1 + $0x10] sm:$0xff] (!%p158_p3)   ;;  %vm276_vm0 = vcmask (!%p158_p3), 130048  }
   0x9   : > { %s1047_s18 = smov (%p27_p4, %s1045_s18), 0  ;;  %161 = sbr.rel (%p158_p3) target bundleno = 273 (0x111), region = 32 }
   0xa   : > { %777 = vmatprep.subr.bf16.mxu0 (!%p158_p3), %v843_v0  ;;  %783 = vmatprep.subr.bf16.mxu1 (!%p158_p3), %v844_v1  ;;  %v848_v3 = vld [vmem:[%s1033_s1 + $0x18] sm:$0xff] (!%p158_p3)   ;;  %vm217_vm1 = vsmask.f32 (!%p158_p3), 3328  ;;  %vm218_vm2 = vsmask.f32 (!%p158_p3), 7440  ;;  %s198_s8 = smul.u32 (!%p158_p3), 3, %s873_s12 }
   0xb   : > { %778 = vmatpush3.bf16.msra.mxu0 (!%p158_p3), %v843_v0  ;;  %784 = vmatpush3.bf16.msra.mxu1 (!%p158_p3), %v844_v1  ;;  %vm980_vm3 = vmor (!%p158_p3), %vm217_vm1, %vm218_vm2 }
   0xc   : > { %789 = vmatprep.subr.bf16.mxu0 (!%p158_p3), %v957_v2  ;;  %795 = vmatprep.subr.bf16.mxu1 (!%p158_p3), %v848_v3  ;;  %p201_p7 = scmp.lt.s32.totalorder (!%p158_p3), %s198_s8, 8 }
  0x10   : > { %s1049_s13 = smov (!%p189_p5, %s877_s13), 1  ;;  %s1051_s8 = smov (!%p201_p7, %s198_s8), 8 }
  0x11   : > { %s192_s23 = scalar_select %p191_p6, %s873_s12, 2 }
  0x12   : > { %s801_s24 = smul.u32 24, %s1049_s13 }
  0x13   : > { %s719_s27 = sshll.u32 %s192_s23, 3  ;;  %s802_s9 = smul.u32 9, %s1049_s13 }
  0x14   : > { %s195_s30 = sadd.s32 %s801_s24, %s719_s27 }
  0x15   : > { %s720_s4 = sshll.u32 %s195_s30, 2  ;;  %s204_s12 = sadd.s32 %s802_s9, %s1051_s8 }
  0x16   : > { %s966_s7 = scalar_lea.vmem %s1032_s0, %s720_s4  ;;  %s721_s13 = sshll.u32 %s204_s12, 2 }
  0x17   : > { %v209_v4 = vld [vmem:[%s966_s7] sm:$0xf]  ;;  %v210_v5 = vld [vmem:[%s966_s7 + $0x8] sm:$0xf]  ;;  %v214_v6 = vld [vmem:[%s966_s7 + $0x4] sm:$0x1]  ;;  %s206_s21 = scalar_lea.vmem %s1035_s3, %s721_s13 }
  0x18   : > { %v221_v7 = vshrl.u32 %v209_v4, 16  ;;  %v224_v8 = vshll.u32 %v209_v4, 16  ;;  %v235_v9 = vshrl.u32 %v210_v5, 16  ;;  %v238_v10 = vshll.u32 %v210_v5, 16  ;;  %v215_v11 = vld [vmem:[%s966_s7 + $0xc] sm:$0x1] }
  0x19   : > { %v729_v12 = vcombine.low %v209_v4, %v210_v5  ;;  %v230_v13 = vshll.u32 %v214_v6, 16  ;;  %v244_v14 = vshll.u32 %v215_v11, 16  ;;  %v211_v15 = vld [vmem:[%s966_s7 + $0x10] sm:$0xf]  ;;  %v216_v16 = vld [vmem:[%s966_s7 + $0x14] sm:$0x1] }
  0x1a   : > { %v223_v17 = vrot.slane %v221_v7, 4  ;;  %v226_v18 = vrot.slane %v224_v8, 5  ;;  %v237_v19 = vrot.slane %v235_v9, 4  ;;  %v240_v20 = vrot.slane %v238_v10, 5  ;;  %v744_v21 = vld [vmem:[%s966_s7 + $0x8] sm:$0xf] }
  0x1b   : > { %785 = vmatprep.mubr.msk.bf16.mxu1 %vm276_vm0, %v729_v12  ;;  %v232_v22 = vrot.slane %v230_v13, 5  ;;  %v246_v23 = vrot.slane %v244_v14, 5  ;;  %v249_v24 = vshrl.u32 %v211_v15, 16  ;;  %v252_v25 = vshll.u32 %v211_v15, 16  ;;  %v745_v26 = vld [vmem:[%s966_s7 + $0xc] sm:$0x1] }
  0x1c   : > { %v227_v27 = vor.u32 %v226_v18, %v223_v17  ;;  %v241_v28 = vor.u32 %v240_v20, %v237_v19  ;;  %v730_v29 = vcombine.low %v211_v15, %v211_v15  ;;  %v258_v30 = vshll.u32 %v216_v16, 16  ;;  %v746_v31 = vld [vmem:[%s966_s7 + $0x10] sm:$0xf]  ;;  %v747_v42 = vld [vmem:[%s966_s7 + $0x14] sm:$0x1] }
  0x1d   : > { %v251_v33 = vrot.slane %v249_v24, 4  ;;  %v254_v34 = vrot.slane %v252_v25, 5  ;;  %v484_v35 = vshrl.u32 %v744_v21, 16  ;;  %v487_v36 = vshll.u32 %v744_v21, 16  ;;  %v748_v50 = vld [vmem:[%s966_s7 + $0x18] sm:$0xf] }
  0x1e   : > { %v228_v37 = vrot.slane %v227_v27, 4  ;;  %v242_v38 = vrot.slane %v241_v28, 4  ;;  %786 = vmatmul.mubr.msk.bf16.vlgmr.msra.gmra.mrb[0].mxu1 %vm276_vm0, %v730_v29  ;;  %v260_v39 = vrot.slane %v258_v30, 5  ;;  %v493_v40 = vshll.u32 %v745_v26, 16  ;;  %v749_v51 = vld [vmem:[%s966_s7 + $0x1c] sm:$0x1] }
  0x1f   : > { %v255_v41 = vor.u32 %v254_v34, %v251_v33  ;;  %796 = vmatpush3.bf16.msra.mxu1 %v848_v3  ;;  %v486_v43 = vrot.slane %v484_v35, 4  ;;  %v489_v44 = vrot.slane %v487_v36, 5  ;;  %v498_v45 = vshrl.u32 %v746_v31, 16  ;;  %v849_v62 = vld [vmem:[%s966_s7 + $0x8] ss:$8 sps:$4 sm:$0xff]  }
  0x20   : > { %v233_v46 = vsel %vm980_vm3, %v228_v37, %v232_v22  ;;  %v247_v47 = vsel %vm980_vm3, %v242_v38, %v246_v23  ;;  %v495_v48 = vrot.slane %v493_v40, 5  ;;  %v501_v49 = vshll.u32 %v746_v31, 16  ;;  %v850_v13 = vld [vmem:[%s966_s7 + $0x18] ss:$0 sps:$4 sm:$0xff]   ;;  %v757_v31 = vld [vmem:[%s1034_s2] ss:$0 sm:$0xff] }
  0x21   : > { %v724_v52 = vcombine.low %v233_v46, %v247_v47  ;;  %v256_v53 = vrot.slane %v255_v41, 4  ;;  %v490_v54 = vor.u32 %v489_v44, %v486_v43  ;;  %v500_v55 = vrot.slane %v498_v45, 4 }
  0x22   : > { %v503_v56 = vrot.slane %v501_v49, 5  ;;  %v507_v57 = vshll.u32 %v747_v42, 16  ;;  %v512_v58 = vshrl.u32 %v748_v50, 16  ;;  %v515_v59 = vshll.u32 %v748_v50, 16 }
  0x23   : > { %779 = vmatprep.mubr.msk.bf16.mxu0 %vm276_vm0, %v724_v52  ;;  %v261_v60 = vsel %vm980_vm3, %v256_v53, %v260_v39  ;;  %v491_v61 = vrot.slane %v490_v54, 4  ;;  %v521_v63 = vshll.u32 %v749_v51, 16 }
  0x24   : > { %v725_v0 = vcombine.low %v261_v60, %v261_v60  ;;  %v504_v1 = vor.u32 %v503_v56, %v500_v55  ;;  %v509_v3 = vrot.slane %v507_v57, 5  ;;  %v514_v4 = vrot.slane %v512_v58, 4 }
  0x25   : > { %v517_v5 = vrot.slane %v515_v59, 5  ;;  %v496_v6 = vsel %vm980_vm3, %v491_v61, %v495_v48  ;;  %v523_v9 = vrot.slane %v521_v63, 5 }
  0x26   : > { %780 = vmatmul.mubr.msk.bf16.vlgmr.msra.gmra.mrb[0].mxu0 %vm276_vm0, %v725_v0  ;;  %v505_v7 = vrot.slane %v504_v1, 4 }
  0x27   : > { %790 = vmatpush3.bf16.msra.mxu0 %v957_v2  ;;  %791 = vmatprep.mubr.msk.bf16.mxu0 %vm276_vm0, %v849_v62  ;;  %v518_v8 = vor.u32 %v517_v5, %v514_v4 }
  0x28   : > { %v510_v10 = vsel %vm980_vm3, %v505_v7, %v509_v3 }
  0x29   : > { %v752_v11 = vcombine.low %v496_v6, %v510_v10  ;;  %v519_v12 = vrot.slane %v518_v8, 4 }
  0x2b   : > { %797 = vmatprep.mubr.msk.bf16.mxu1 %vm276_vm0, %v752_v11  ;;  %v524_v14 = vsel %vm980_vm3, %v519_v12, %v523_v9 }
  0x2c   : > { %v753_v15 = vcombine.low %v524_v14, %v524_v14 }
  0x2e   : > { %798 = vmatmul.mubr.msk.bf16.vlgmr.msra.gmra.mrb[4].mxu1 %vm276_vm0, %v753_v15  ;;  %792 = vmatmul.mubr.msk.bf16.vlgmr.msra.gmra.mrb[4].mxu0 %vm276_vm0, %v850_v13 }
  0xf1   : > { %v787_v2 = vpop.f32.mrb[0].mxu1 }
  0xf2   : > { %v385_v16 = vpop.f32.mrb[1].mxu1 }
  0xf3   : > { %v788_v17 = vpop.f32.mrb[2].mxu1 }
  0xf4   : > { %v388_v18 = vpop.f32.mrb[3].mxu1 }
  0xf9   : > { %v781_v19 = vpop.f32.mrb[0].mxu0 }
  0xfa   : > { %v394_v20 = vadd.f32 %v787_v2, %v781_v19  ;;  %v317_v21 = vpop.f32.mrb[1].mxu0 }
  0xfb   : > { %v386_v22 = vadd.f32 %v385_v16, %v317_v21  ;;  %v782_v23 = vpop.f32.mrb[2].mxu0 }
  0xfc   : > { %v320_v24 = vpop.f32.mrb[3].mxu0 }
  0xfd   : > { %v389_v25 = vadd.f32 %v388_v18, %v320_v24 }
 0x101   : > { %v799_v26 = vpop.f32.mrb[4].mxu1  ;;  %v793_v27 = vpop.f32.mrb[4].mxu0 }
 0x102   : > { %v476_v28 = vadd.f32 %v793_v27, %v394_v20  ;;  %v579_v29 = vpop.f32.mrb[5].mxu1  ;;  %v460_v30 = vpop.f32.mrb[5].mxu0 }
 0x103   : > { %v474_v32 = vadd.f32 %v460_v30, %v386_v22  ;;  %v800_v33 = vpop.f32.mrb[6].mxu1  ;;  %v794_v34 = vpop.f32.mrb[6].mxu0 }
 0x104   : > { %v595_v35 = vadd.f32 %v799_v26, %v476_v28  ;;  %v582_v36 = vpop.f32.mrb[7].mxu1  ;;  %v463_v37 = vpop.f32.mrb[7].mxu0 }
 0x105   : > { %v593_v38 = vadd.f32 %v579_v29, %v474_v32  ;;  %v475_v39 = vadd.f32 %v463_v37, %v389_v25 }
 0x106   : > { %v605_v40 = vadd.f32 %v757_v31, %v595_v35 }
 0x107   : > { %v603_v41 = vadd.f32 %v757_v31, %v593_v38  ;;  %v594_v42 = vadd.f32 %v582_v36, %v475_v39 }
 0x108   : > { %vm608_vm4 = vcmp.gt.f32.partialorder %v605_v40, 0.0  ;;  %v611_v43 = vmul.f32 0.2, %v605_v40 }
 0x109   : > { %v609_v44 = vmul.f32 0.2, %v603_v41  ;;  %v604_v45 = vadd.f32 %v757_v31, %v594_v42  ;;  %vm606_vm5 = vcmp.gt.f32.partialorder %v603_v41, 0.0 }
 0x10a   : > { %v614_v46 = vsel %vm608_vm4, %v605_v40, %v611_v43 }
 0x10b   : > { %v617_v47 = vpack.c.bf16 %v614_v46, %v614_v46  ;;  %vm607_vm6 = vcmp.gt.f32.partialorder %v604_v45, 0.0  ;;  %v610_v48 = vmul.f32 0.2, %v604_v45  ;;  %v612_v49 = vsel %vm606_vm5, %v603_v41, %v609_v44 }
 0x10d   : > { %620 = vst [vmem:[%s206_s21 + $0x8] sm:$0xf] %v617_v47  ;;  %v613_v50 = vsel %vm607_vm6, %v604_v45, %v610_v48 }
 0x10e   : > { %v763_v51 = vpack.c.bf16 %v613_v50, %v612_v49 }
 0x110   : > { %764 = vst [vmem:[%s206_s21] sm:$0xff] %v763_v51  }
 0x111 PF: > { %s13_s16 = sadd.s32 1, %s889_s16   ;;  %s1038_s12 = smov %s881_s14 }
 0x112   : > { %p10_p8 = scmp.ge.s32.totalorder %s13_s16, 8   ;;  %s1039_s13 = smov %s885_s15 }
 0x113   : > { %s1040_s14 = smov %s1043_s17  ;;  %s1041_s15 = smov %s1047_s18 }
 0x114   :  { %12 = sbr.rel (!%p10_p8) target bundleno = 3 (0x3), region = 66 }

// kernel: discriminator_forward.5
= control target key start
LH: loop header
LB: loop body
LE: loop exit
PB: predicated region body
PF: predicated region fallthrough
CT: control target
= control target key end

     0   :  { %s997_s15 = smov 0   ;;  %s999_s16 = smov 0   ;;  %s1141_s0 = inlined_call_operand.vmem [shape: bf16[2,2,3,9,32], index: 0, kind: input, shape index: {}]   ;;  %s1142_s1 = inlined_call_operand.vmem [shape: bf16[4,32,128], index: 1, kind: input, shape index: {}]   ;;  %s1143_s2 = inlined_call_operand.vmem [shape: f32[1,128], index: 2, kind: input, shape index: {}]   ;;  %s1144_s3 = inlined_call_operand.vmem [shape: bf16[2,4,8,128], index: 3, kind: output, shape index: {0}]   ;;  %s1145_s4 = inlined_call_operand.vmem [shape: f32[2,2,2,128], index: 4, kind: output, shape index: {1}]  }
   0x1   :  { %s1001_s17 = smov 0   ;;  %s1003_s18 = smov 0  }
   0x2   :  { %s1005_s19 = smov 0  }
   0x3 LB: > { %s24_s20 = sadd.s32 1, %s960_s17  ;;  %s27_s21 = sadd.s32 1, %s964_s18  ;;  %s968_s19 = sphi %s1005_s19, %s15_s19   ;;  %s964_s18 = sphi %s1003_s18, %s1151_s18   ;;  %s960_s17 = sphi %s1001_s17, %s1150_s17   ;;  %s956_s16 = sphi %s999_s16, %s1149_s16   ;;  %s952_s15 = sphi %s997_s15, %s1148_s15  }
   0x4   : > { %p25_p0 = scmp.ge.s32.totalorder %s24_s20, 2  ;;  %p782_p1 = scmp.ge.s32.totalorder %s968_s19, 1 }
   0x5   : > { %p187_p2 = scmp.lt.s32.totalorder %s968_s19, 5 }
   0x6   : > { %s1153_s20 = smov (%p25_p0, %s24_s20), 0  ;;  %s1155_s21 = smov (!%p25_p0, %s27_s21), %s964_s18 }
   0x7   : > { %p188_p3 = pnand %p782_p1, %p187_p2  ;;  %p29_p4 = scmp.ge.s32.totalorder %s1155_s21, 2 }
   0x8   : > { %v920_v0 = vld [vmem:[%s1142_s1 + $0x10] sm:$0xff] (!%p188_p3)   ;;  %v970_v1 = vmov (!%p188_p3), 0.0   ;;  %v921_v2 = vld [vmem:[%s1142_s1] sm:$0xff] (!%p188_p3)   ;;  %v922_v3 = vld [vmem:[%s1142_s1 + $0x18] sm:$0xff] (!%p188_p3)   ;;  %vm971_vm0 = vmmov (!%p188_p3), 0   ;;  %p229_p5 = scmp.lt.s32.totalorder (!%p188_p3), %s956_s16, 1 }
   0x9   : > { %s1157_s21 = smov (%p29_p4, %s1155_s21), 0  ;;  %191 = sbr.rel (%p188_p3) target bundleno = 282 (0x11a), region = 32 }
   0xa   : > { %844 = vmatprep.subr.bf16.mxu0 (!%p188_p3), %v970_v1  ;;  %852 = vmatprep.subr.bf16.mxu1 (!%p188_p3), %v970_v1  ;;  %v923_v4 = vld [vmem:[%s1142_s1 + $0x8] sm:$0xff] (!%p188_p3)   ;;  %p231_p6 = scmp.lt.s32.totalorder (!%p188_p3), %s952_s15, 1  ;;  %vm316_vm1 = vcmask (!%p188_p3), 261120   ;;  %vm265_vm2 = vsmask.f32 (!%p188_p3), 3328  ;;  %v926_v5 = vld [vmem:[%s1142_s1 + $0x30] sm:$0xff] (!%p188_p3)  }
   0xb   : > { %845 = vmatpush3.bf16.msra.mxu0 (!%p188_p3), %v920_v0  ;;  %856 = vmatprep.mubr.msk.bf16.mxu1 (!%p188_p3), %vm971_vm0, %v970_v1  ;;  %vm266_vm3 = vsmask.f32 (!%p188_p3), 7440  ;;  %v928_v23 = vld [vmem:[%s1142_s1 + $0x38] sm:$0xff] (!%p188_p3)   ;;  %v925_v47 = vld [vmem:[%s1142_s1 + $0x20] sm:$0xff] (!%p188_p3)   ;;  %v927_v54 = vld [vmem:[%s1142_s1 + $0x28] sm:$0xff] (!%p188_p3)   ;;  %s784_s27 = sshll.u32 (!%p188_p3), %s952_s15, 1 }
   0xc   : > { %853 = vmatpush3.bf16.msra.mxu1 (!%p188_p3), %v921_v2  ;;  %846 = vmatprep.subr.bf16.mxu0 (!%p188_p3), %v970_v1  ;;  %vm1087_vm4 = vmor (!%p188_p3), %vm265_vm2, %vm266_vm3  ;;  %p241_p7 = scmp.lt.s32.totalorder (!%p188_p3), %s784_s27, 3 }
   0xd   : > { %854 = vmatprep.subr.bf16.mxu1 (!%p188_p3), %v970_v1  ;;  %848 = vmatprep.mubr.msk.bf16.mxu0 (!%p188_p3), %vm971_vm0, %v970_v1 }
   0xf   : > { %847 = vmatpush3.bf16.msra.mxu0 (!%p188_p3), %v922_v3 }
  0x10   : > { %s1159_s16 = smov (!%p229_p5, %s956_s16), 1  ;;  %855 = vmatpush3.bf16.msra.mxu1 %v923_v4  ;;  %860 = vmatprep.subr.bf16.mxu0 %v970_v1 }
  0x11   : > { %s1057_s30 = scalar_select %p231_p6, %s952_s15, 1  ;;  %868 = vmatprep.subr.bf16.mxu1 %v970_v1 }
  0x12   : > { %s877_s5 = smul.u32 12, %s1159_s16  ;;  %s785_s28 = sshll.u32 %s1159_s16, 2 }
  0x13   : > { %s876_s6 = smul.u32 6, %s1057_s30  ;;  %s787_s10 = sshll.u32 %s1159_s16, 1 }
  0x15   : > { %s235_s7 = sadd.s32 %s877_s5, %s876_s6 }
  0x16   : > { %s783_s8 = sshll.u32 %s235_s7, 2 }
  0x17   : > { %s1066_s11 = scalar_lea.vmem %s1141_s0, %s783_s8 }
  0x18   : > { %v257_v6 = vld [vmem:[%s1066_s11] sm:$0xf]  ;;  %v258_v7 = vld [vmem:[%s1066_s11 + $0x8] sm:$0xf]  ;;  %v263_v8 = vld [vmem:[%s1066_s11 + $0x4] sm:$0x1] }
  0x19   : > { %v269_v9 = vshrl.u32 %v257_v6, 16  ;;  %v272_v10 = vshll.u32 %v257_v6, 16  ;;  %v283_v11 = vshrl.u32 %v258_v7, 16  ;;  %v286_v12 = vshll.u32 %v258_v7, 16  ;;  %v264_v13 = vld [vmem:[%s1066_s11 + $0xc] sm:$0x1] }
  0x1a   : > { %v797_v14 = vcombine.low %v257_v6, %v258_v7  ;;  %v278_v15 = vshll.u32 %v263_v8, 16  ;;  %v292_v16 = vshll.u32 %v264_v13, 16  ;;  %v811_v17 = vld [vmem:[%s1066_s11 + $0x8] sm:$0xf]  ;;  %v812_v18 = vld [vmem:[%s1066_s11 + $0xc] sm:$0x1] }
  0x1b   : > { %v271_v19 = vrot.slane %v269_v9, 4  ;;  %v274_v20 = vrot.slane %v272_v10, 5  ;;  %v285_v21 = vrot.slane %v283_v11, 4  ;;  %v288_v22 = vrot.slane %v286_v12, 5  ;;  %v813_v24 = vld [vmem:[%s1066_s11 + $0x10] sm:$0xf] }
  0x1c   : > { %857 = vmatmul.mubr.msk.bf16.vlgmr.msra.gmra.mrb[0].mxu1 %vm316_vm1, %v797_v14  ;;  %v280_v25 = vrot.slane %v278_v15, 5  ;;  %v294_v26 = vrot.slane %v292_v16, 5  ;;  %v814_v27 = vld [vmem:[%s1066_s11 + $0x14] sm:$0x1]  ;;  %v498_v28 = vshrl.u32 %v811_v17, 16  ;;  %v501_v29 = vshll.u32 %v811_v17, 16 }
  0x1d   : > { %v275_v30 = vor.u32 %v274_v20, %v271_v19  ;;  %v289_v31 = vor.u32 %v288_v22, %v285_v21  ;;  %869 = vmatpush3.bf16.msra.mxu1 %v926_v5  ;;  %872 = vmatprep.mubr.msk.bf16.mxu1 %vm971_vm0, %v970_v1  ;;  %v507_v32 = vshll.u32 %v812_v18, 16  ;;  %v512_v33 = vshrl.u32 %v813_v24, 16  ;;  %v929_v57 = vld [vmem:[%s1066_s11 + $0x8] ss:$8 sps:$4 sm:$0xff]   ;;  %v823_v15 = vld [vmem:[%s1143_s2] ss:$0 sm:$0xff]  ;;  %s253_s11 = sadd.s32 %s787_s10, %s1057_s30 }
  0x1e   : > { %870 = vmatprep.subr.bf16.mxu1 %v970_v1  ;;  %v500_v35 = vrot.slane %v498_v28, 4  ;;  %v503_v36 = vrot.slane %v501_v29, 5  ;;  %v515_v37 = vshll.u32 %v813_v24, 16  ;;  %v521_v38 = vshll.u32 %v814_v27, 16  ;;  %s788_s12 = sshll.u32 %s253_s11, 1 }
  0x1f   : > { %v276_v39 = vrot.slane %v275_v30, 4  ;;  %v290_v40 = vrot.slane %v289_v31, 4  ;;  %v514_v41 = vrot.slane %v512_v33, 4  ;;  %v509_v43 = vrot.slane %v507_v32, 5  ;;  %s255_s22 = scalar_lea.vmem %s1145_s4, %s788_s12 }
  0x20   : > { %v504_v42 = vor.u32 %v503_v36, %v500_v35  ;;  %v517_v44 = vrot.slane %v515_v37, 5  ;;  %v523_v51 = vrot.slane %v521_v38, 5  ;;  %v607_v5 = vstv %s784_s27  ;;  %s1161_s27 = smov (!%p241_p7, %s784_s27), 3 }
  0x21   : > { %v281_v45 = vsel %vm1087_vm4, %v276_v39, %v280_v25  ;;  %v295_v46 = vsel %vm1087_vm4, %v290_v40, %v294_v26  ;;  %871 = vmatpush3.bf16.msra.mxu1 %v928_v23  ;;  %v608_v10 = vadd.s32 1, %v607_v5  ;;  %vm609_vm5 = vcmp.lt.s32.totalorder %v607_v5, 4  ;;  %s244_s5 = sadd.s32 %s785_s28, %s1161_s27 }
  0x22   : > { %v793_v48 = vcombine.low %v281_v45, %v295_v46  ;;  %v505_v49 = vrot.slane %v504_v42, 4  ;;  %v518_v50 = vor.u32 %v517_v44, %v514_v41  ;;  %s786_s6 = sshll.u32 %s244_s5, 2 }
  0x23   : > { %vm610_vm7 = vcmp.lt.s32.totalorder %v608_v10, 4  ;;  %s246_s9 = scalar_lea.vmem %s1144_s3, %s786_s6 }
  0x24   : > { %849 = vmatmul.mubr.msk.bf16.vlgmr.msra.gmra.mrb[0].mxu0 %vm316_vm1, %v793_v48  ;;  %v510_v52 = vsel %vm1087_vm4, %v505_v49, %v509_v43  ;;  %v519_v53 = vrot.slane %v518_v50, 4 }
  0x25   : > { %861 = vmatpush3.bf16.msra.mxu0 %v925_v47  ;;  %864 = vmatprep.mubr.msk.bf16.mxu0 %vm971_vm0, %v970_v1 }
  0x26   : > { %862 = vmatprep.subr.bf16.mxu0 %v970_v1  ;;  %v524_v55 = vsel %vm1087_vm4, %v519_v53, %v523_v51  ;;  %v605_v1 = vlaneseq }
  0x27   : > { %v819_v56 = vcombine.low %v510_v52, %v524_v55 }
  0x28   : > { %v606_v7 = vshrl.u32 %v605_v1, 7 }
  0x29   : > { %863 = vmatpush3.bf16.msra.mxu0 %v927_v54  ;;  %873 = vmatmul.mubr.msk.bf16.vlgmr.msra.gmra.mrb[4].mxu1 %vm316_vm1, %v819_v56 }
  0x2a   : > { %vm611_vm6 = vcmp.lt.s32.totalorder %v606_v7, 4 }
  0x2b   : > { %vm612_vm8 = vmand %vm609_vm5, %vm611_vm6 }
  0x2c   : > { %865 = vmatmul.mubr.msk.bf16.vlgmr.msra.gmra.mrb[4].mxu0 %vm316_vm1, %v929_v57  ;;  %vm613_vm9 = vmand %vm610_vm7, %vm611_vm6 }
  0xef   : > { %v415_v58 = vpop.f32.mrb[0].mxu1 }
  0xf0   : > { %v858_v59 = vpop.f32.mrb[1].mxu1 }
  0xf1   : > { %v418_v60 = vpop.f32.mrb[2].mxu1 }
  0xf2   : > { %v859_v61 = vpop.f32.mrb[3].mxu1 }
  0xf7   : > { %v354_v62 = vpop.f32.mrb[0].mxu0 }
  0xf8   : > { %v416_v63 = vadd.f32 %v415_v58, %v354_v62  ;;  %v850_v0 = vpop.f32.mrb[1].mxu0 }
  0xf9   : > { %v357_v2 = vpop.f32.mrb[2].mxu0 }
  0xfa   : > { %v419_v3 = vadd.f32 %v418_v60, %v357_v2  ;;  %v851_v4 = vpop.f32.mrb[3].mxu0 }
  0xfc   : > { %v582_v6 = vpop.f32.mrb[4].mxu1 }
  0xfd   : > { %v874_v8 = vpop.f32.mrb[5].mxu1 }
  0xfe   : > { %v585_v9 = vpop.f32.mrb[6].mxu1 }
  0xff   : > { %v484_v11 = vpop.f32.mrb[4].mxu0  ;;  %v875_v12 = vpop.f32.mrb[7].mxu1 }
 0x100   : > { %v491_v13 = vadd.f32 %v484_v11, %v416_v63  ;;  %v866_v14 = vpop.f32.mrb[5].mxu0 }
 0x101   : > { %v487_v16 = vpop.f32.mrb[6].mxu0 }
 0x102   : > { %v589_v17 = vadd.f32 %v582_v6, %v491_v13  ;;  %v492_v18 = vadd.f32 %v487_v16, %v419_v3  ;;  %v867_v19 = vpop.f32.mrb[7].mxu0 }
 0x104   : > { %v598_v20 = vadd.f32 %v823_v15, %v589_v17  ;;  %v590_v21 = vadd.f32 %v585_v9, %v492_v18 }
 0x106   : > { %v618_v22 = vsel %vm612_vm8, %v598_v20, 0.0  ;;  %v599_v23 = vadd.f32 %v823_v15, %v590_v21 }
 0x107   : > { %v628_v26 = vmul.f32 %v618_v22, %v618_v22 }
 0x108   : > { %v830_v24 = vpack.c.bf16 %v599_v23, %v598_v20  ;;  %v619_v25 = vsel %vm613_vm9, %v599_v23, 0.0 }
 0x109   : > { %v620_v27 = vadd.f32 %v619_v25, %v618_v22  ;;  %v629_v28 = vmul.f32 %v619_v25, %v619_v25 }
 0x10a   : > { %831 = vst [vmem:[%s246_s9] sm:$0xff] %v830_v24  }
 0x10b   : > { %v621_v29 = vrot.slane %v620_v27, 4  ;;  %v630_v30 = vadd.f32 %v629_v28, %v628_v26 }
 0x10d   : > { %v622_v31 = vadd.f32 %v621_v29, %v620_v27  ;;  %v631_v32 = vrot.slane %v630_v30, 4 }
 0x10f   : > { %v623_v33 = vrot.slane %v622_v31, 2  ;;  %v632_v34 = vadd.f32 %v631_v32, %v630_v30 }
 0x111   : > { %v624_v35 = vadd.f32 %v623_v33, %v622_v31  ;;  %v633_v36 = vrot.slane %v632_v34, 2 }
 0x113   : > { %v625_v37 = vrot.slane %v624_v35, 1  ;;  %v634_v38 = vadd.f32 %v633_v36, %v632_v34 }
 0x115   : > { %v626_v39 = vadd.f32 %v625_v37, %v624_v35  ;;  %v635_v40 = vrot.slane %v634_v38, 1 }
 0x117   : > { %627 = vst [vmem:[%s255_s22] sm:$0x1] %v626_v39  ;;  %v636_v41 = vadd.f32 %v635_v40, %v634_v38 }
 0x119   : > { %637 = vst [vmem:[%s255_s22 + $0x1] sm:$0x1] %v636_v41 }
 0x11a PF: > { %s15_s19 = sadd.s32 1, %s968_s19   ;;  %s1148_s15 = smov %s960_s17 }
 0x11b   : > { %p12_p8 = scmp.ge.s32.totalorder %s15_s19, 6   ;;  %s1149_s16 = smov %s964_s18 }
 0x11c   : > { %s1150_s17 = smov %s1153_s20  ;;  %s1151_s18 = smov %s1157_s21 }
 0x11d   :  { %14 = sbr.rel (!%p12_p8) target bundleno = 3 (0x3), region = 78 }

// kernel: discriminator_forward.6
= control target key start
LH: loop header
LB: loop body
LE: loop exit
PB: predicated region body
PF: predicated region fallthrough
CT: control target
= control target key end

     0   :  { %s2125_s15 = smov 0   ;;  %s2127_s16 = smov 0   ;;  %s2480_s0 = inlined_call_operand.vmem [shape: bf16[2,2,5,11,16], index: 0, kind: input, shape index: {}]   ;;  %s2481_s1 = inlined_call_operand.vmem [shape: bf16[16,16,128], index: 1, kind: input, shape index: {}]   ;;  %s2482_s2 = inlined_call_operand.vmem [shape: f32[1,128], index: 2, kind: input, shape index: {}]   ;;  %s2483_s3 = inlined_call_operand.vmem [shape: bf16[2,4,8,128], index: 3, kind: output, shape index: {0}]   ;;  %s2484_s4 = inlined_call_operand.vmem [shape: f32[2,2,2,128], index: 4, kind: output, shape index: {1}]  }
   0x1   :  { %s2129_s17 = smov 0   ;;  %s2131_s18 = smov 0  }
   0x2   :  { %s2133_s19 = smov 0  }
   0x3 LB: > { %s24_s20 = sadd.s32 1, %s2088_s17  ;;  %s27_s21 = sadd.s32 1, %s2092_s18  ;;  %s2096_s19 = sphi %s2133_s19, %s15_s19   ;;  %s2092_s18 = sphi %s2131_s18, %s2494_s18   ;;  %s2088_s17 = sphi %s2129_s17, %s2493_s17   ;;  %s2084_s16 = sphi %s2127_s16, %s2492_s16   ;;  %s2080_s15 = sphi %s2125_s15, %s2491_s15  }
   0x4   : > { %p25_p0 = scmp.ge.s32.totalorder %s24_s20, 2  ;;  %p1734_p1 = scmp.ge.s32.totalorder %s2096_s19, 1 }
   0x5   : > { %p187_p2 = scmp.lt.s32.totalorder %s2096_s19, 5 }
   0x6   : > { %s2496_s20 = smov (%p25_p0, %s24_s20), 0  ;;  %s2498_s21 = smov (!%p25_p0, %s27_s21), %s2092_s18 }
   0x7   : > { %p188_p3 = pnand %p1734_p1, %p187_p2  ;;  %p29_p4 = scmp.ge.s32.totalorder %s2498_s21, 2 }
   0x8   : > { %v2038_v0 = vld [vmem:[%s2481_s1 + $0x8] sm:$0xff] (!%p188_p3)   ;;  %v2098_v1 = vmov (!%p188_p3), 0.0   ;;  %v2039_v2 = vld [vmem:[%s2481_s1] sm:$0xff] (!%p188_p3)   ;;  %vm2099_vm0 = vmmov (!%p188_p3), 0   ;;  %p229_p5 = scmp.lt.s32.totalorder (!%p188_p3), %s2084_s16, 1  ;;  %p231_p6 = scmp.lt.s32.totalorder (!%p188_p3), %s2080_s15, 1 }
   0x9   : > { %s2500_s21 = smov (%p29_p4, %s2498_s21), 0  ;;  %191 = sbr.rel (%p188_p3) target bundleno = 330 (0x14a), region = 32 }
   0xa   : > { %1898 = vmatprep.subr.bf16.mxu0 (!%p188_p3), %v2098_v1  ;;  %1904 = vmatprep.subr.bf16.mxu1 (!%p188_p3), %v2098_v1  ;;  %vm263_vm1 = vsmask.f32 (!%p188_p3), 3328  ;;  %vm264_vm2 = vsmask.f32 (!%p188_p3), 7440  ;;  %vm306_vm3 = vcmask (!%p188_p3), 130048   ;;  %v2042_v3 = vld [vmem:[%s2481_s1 + $0x18] sm:$0xff] (!%p188_p3)  }
   0xb   : > { %1899 = vmatpush3.bf16.msra.mxu0 (!%p188_p3), %v2038_v0  ;;  %1906 = vmatprep.mubr.msk.bf16.mxu1 (!%p188_p3), %vm2099_vm0, %v2098_v1  ;;  %vm483_vm4 = vsmask.f32 (!%p188_p3), 2304  ;;  %vm484_vm5 = vsmask.f32 (!%p188_p3), 6416  ;;  %vm412_vm6 = vcmask (!%p188_p3), 1042432   ;;  %vm413_vm7 = vcmask (!%p188_p3), 1046532   ;;  %vm2212_vm8 = vmor (!%p188_p3), %vm263_vm1, %vm264_vm2 }
   0xc   : > { %1905 = vmatpush3.bf16.msra.mxu1 (!%p188_p3), %v2039_v2  ;;  %1900 = vmatprep.mubr.msk.bf16.mxu0 (!%p188_p3), %vm2099_vm0, %v2098_v1  ;;  %v2041_v39 = vld [vmem:[%s2481_s1 + $0x10] sm:$0xff] (!%p188_p3)   ;;  %vm2230_vm9 = vmor (!%p188_p3), %vm483_vm4, %vm484_vm5  ;;  %v2057_v32 = vld [vmem:[%s2481_s1 + $0x78] sm:$0xff] (!%p188_p3)  }
   0xd   : > { %1910 = vmatprep.subr.bf16.mxu0 (!%p188_p3), %v2098_v1  ;;  %1916 = vmatprep.subr.bf16.mxu1 (!%p188_p3), %v2098_v1  ;;  %vm2236_vm10 = vmor (!%p188_p3), %vm412_vm6, %vm413_vm7 }
  0x10   : > { %s2502_s16 = smov (!%p229_p5, %s2084_s16), 1 }
  0x11   : > { %s2175_s26 = scalar_select %p231_p6, %s2080_s15, 1 }
  0x12   : > { %s1995_s27 = smul.u32 20, %s2502_s16  ;;  %s1739_s9 = sshll.u32 %s2502_s16, 1 }
  0x13   : > { %s1994_s28 = smul.u32 10, %s2175_s26  ;;  %s253_s10 = sadd.s32 %s1739_s9, %s2175_s26 }
  0x14   : > { %s1740_s11 = sshll.u32 %s253_s10, 1 }
  0x15   : > { %s235_s29 = sadd.s32 %s1995_s27, %s1994_s28  ;;  %s1737_s27 = sshll.u32 %s2502_s16, 2 }
  0x16   : > { %s1735_s30 = sshll.u32 %s235_s29, 2  ;;  %s255_s14 = scalar_lea.vmem %s2484_s4, %s1740_s11 }
  0x17   : > { %s2182_s7 = scalar_lea.vmem %s2480_s0, %s1735_s30 }
  0x18   : > { %v257_v4 = vld [vmem:[%s2182_s7] sm:$0xf]  ;;  %v258_v5 = vld [vmem:[%s2182_s7 + $0x8] sm:$0xf]  ;;  %v2190_v6 = vld [vmem:[%s2182_s7 + $0x4] sm:$0x1] }
  0x19   : > { %v267_v7 = vshrl.u32 %v257_v4, 16  ;;  %v270_v8 = vshll.u32 %v257_v4, 16  ;;  %v281_v9 = vshrl.u32 %v258_v5, 16  ;;  %v284_v10 = vshll.u32 %v258_v5, 16  ;;  %v2193_v11 = vld [vmem:[%s2182_s7 + $0xc] sm:$0x1] }
  0x1a   : > { %v1746_v12 = vcombine.low %v257_v4, %v258_v5  ;;  %v276_v13 = vshll.u32 %v2190_v6, 16  ;;  %v290_v14 = vshll.u32 %v2193_v11, 16  ;;  %v417_v15 = vrot.slane %v2190_v6, 5  ;;  %v2199_v16 = vld [vmem:[%s2182_s7] sm:$0xe] }
  0x1b   : > { %v269_v17 = vrot.slane %v267_v7, 4  ;;  %v272_v18 = vrot.slane %v270_v8, 5  ;;  %v283_v19 = vrot.slane %v281_v9, 4  ;;  %v286_v20 = vrot.slane %v284_v10, 5  ;;  %v407_v21 = vld [vmem:[%s2182_s7 + $0x8] sm:$0xe] }
  0x1c   : > { %1907 = vmatmul.mubr.msk.bf16.vlgmr.msra.gmra.mrb[0].mxu1 %vm306_vm3, %v1746_v12  ;;  %v278_v22 = vrot.slane %v276_v13, 5  ;;  %v292_v23 = vrot.slane %v290_v14, 5  ;;  %v421_v24 = vrot.slane %v2193_v11, 5  ;;  %v481_v25 = vld [vmem:[%s2182_s7 + $0x4] sm:$0x3]  ;;  %v487_v26 = vshrl.u32 %v2199_v16, 16 }
  0x1d   : > { %v273_v27 = vor.u32 %v272_v18, %v269_v17  ;;  %v287_v28 = vor.u32 %v286_v20, %v283_v19  ;;  %1917 = vmatpush3.bf16.msra.mxu1 %v2042_v3  ;;  %1918 = vmatprep.mubr.msk.bf16.mxu1 %vm2099_vm0, %v2098_v1  ;;  %v482_v29 = vld [vmem:[%s2182_s7 + $0xc] sm:$0x3]  ;;  %v490_v30 = vshll.u32 %v2199_v16, 16  ;;  %v496_v31 = vshrl.u32 %v481_v25, 16  ;;  %v1768_v42 = vld [vmem:[%s2182_s7 + $0x8] sm:$0xf] }
  0x1e   : > { %v489_v33 = vrot.slane %v487_v26, 5  ;;  %v499_v34 = vshll.u32 %v481_v25, 16  ;;  %v505_v35 = vshrl.u32 %v407_v21, 16  ;;  %v508_v36 = vshll.u32 %v407_v21, 16  ;;  %1928 = vmatprep.subr.bf16.mxu1 %v2098_v1  ;;  %v2222_v47 = vld [vmem:[%s2182_s7 + $0xc] sm:$0x1] }
  0x1f   : > { %v274_v37 = vrot.slane %v273_v27, 4  ;;  %v288_v38 = vrot.slane %v287_v28, 4  ;;  %v492_v40 = vrot.slane %v490_v30, 6  ;;  %v498_v41 = vrot.slane %v496_v31, 5  ;;  %v1770_v58 = vld [vmem:[%s2182_s7 + $0x10] sm:$0xf] }
  0x20   : > { %v501_v43 = vrot.slane %v499_v34, 6  ;;  %v507_v44 = vrot.slane %v505_v35, 5  ;;  %v510_v45 = vrot.slane %v508_v36, 6  ;;  %v514_v46 = vshrl.u32 %v482_v29, 16  ;;  %v2244_v0 = vld [vmem:[%s2182_s7 + $0x14] sm:$0x1] }
  0x21   : > { %v279_v48 = vsel %vm2212_vm8, %v274_v37, %v278_v22  ;;  %v293_v49 = vsel %vm2212_vm8, %v288_v38, %v292_v23  ;;  %v493_v51 = vor.u32 %v492_v40, %v489_v33  ;;  %v517_v52 = vshll.u32 %v482_v29, 16  ;;  %v2256_v10 = vld [vmem:[%s2182_s7 + $0x8] sm:$0xe]  ;;  %v1787_v25 = vld [vmem:[%s2182_s7 + $0x14] sm:$0x3] }
  0x22   : > { %v1743_v53 = vcombine.low %v279_v48, %v293_v49  ;;  %v502_v54 = vor.u32 %v501_v43, %v498_v41  ;;  %v511_v55 = vor.u32 %v510_v45, %v507_v44  ;;  %v516_v56 = vrot.slane %v514_v46, 5  ;;  %v2044_v18 = vld [vmem:[%s2481_s1 + $0x28] sm:$0xff]   ;;  %v1800_v44 = vld [vmem:[%s2182_s7 + $0x10] sm:$0xf] }
  0x23   : > { %v494_v59 = vrot.slane %v493_v51, 4  ;;  %v519_v60 = vrot.slane %v517_v52, 6  ;;  %v1749_v61 = vrot.slane %v2199_v16, 9  ;;  %v1750_v62 = vrot.slane %v407_v21, 9  ;;  %v1786_v16 = vld [vmem:[%s2182_s7 + $0xc] sm:$0x3] }
  0x24   : > { %1901 = vmatmul.mubr.msk.bf16.vlgmr.msra.gmra.mrb[0].mxu0 %vm306_vm3, %v1743_v53  ;;  %v512_v63 = vrot.slane %v511_v55, 4  ;;  %v648_v2 = vshrl.u32 %v1768_v42, 16  ;;  %v651_v3 = vshll.u32 %v1768_v42, 16  ;;  %v657_v4 = vshll.u32 %v2222_v47, 16  ;;  %v2271_v21 = vld [vmem:[%s2182_s7 + $0x10] sm:$0xe] }
  0x25   : > { %1911 = vmatpush3.bf16.msra.mxu0 %v2041_v39  ;;  %1912 = vmatprep.mubr.msk.bf16.mxu0 %vm2099_vm0, %v2098_v1  ;;  %v503_v5 = vsel %vm2230_vm9, %v494_v59, %v502_v54  ;;  %v520_v7 = vor.u32 %v519_v60, %v516_v56  ;;  %v418_v8 = vsel %vm2236_vm10, %v1749_v61, %v417_v15  ;;  %v662_v9 = vshrl.u32 %v1770_v58, 16  ;;  %v2043_v15 = vld [vmem:[%s2481_s1 + $0x20] sm:$0xff]   ;;  %v2045_v51 = vld [vmem:[%s2182_s7 + $0x8] ss:$8 sps:$4 sm:$0xff]   ;;  %v2294_v56 = vld [vmem:[%s2182_s7 + $0x14] sm:$0x1] }
  0x26   : > { %1922 = vmatprep.subr.bf16.mxu0 %v2098_v1  ;;  %v422_v11 = vsel %vm2236_vm10, %v1750_v62, %v421_v24  ;;  %v650_v12 = vrot.slane %v648_v2, 4  ;;  %v653_v13 = vrot.slane %v651_v3, 5  ;;  %v659_v14 = vrot.slane %v657_v4, 5  ;;  %v2047_v59 = vld [vmem:[%s2481_s1 + $0x38] sm:$0xff]  }
  0x27   : > { %v521_v6 = vsel %vm2230_vm9, %v512_v63, %v520_v7  ;;  %v1753_v17 = vcombine.low %v418_v8, %v422_v11  ;;  %v664_v19 = vrot.slane %v662_v9, 4  ;;  %v665_v20 = vshll.u32 %v1770_v58, 16  ;;  %v1802_v63 = vld [vmem:[%s2182_s7 + $0x18] sm:$0xf]  ;;  %v2311_v7 = vld [vmem:[%s2182_s7 + $0x10] sm:$0xe] }
  0x28   : > { %v1758_v22 = vcombine.low %v503_v5, %v521_v6  ;;  %v654_v23 = vor.u32 %v653_v13, %v650_v12  ;;  %v671_v24 = vshll.u32 %v2244_v0, 16  ;;  %v808_v26 = vshrl.u32 %v2256_v10, 16  ;;  %v2308_v5 = vld [vmem:[%s2182_s7 + $0x1c] sm:$0x1]  ;;  %v1818_v12 = vld [vmem:[%s2182_s7 + $0x14] sm:$0x3] }
  0x29   : > { %v667_v27 = vrot.slane %v665_v20, 5  ;;  %v811_v28 = vshll.u32 %v2256_v10, 16  ;;  %v817_v29 = vshrl.u32 %v1786_v16, 16  ;;  %v820_v30 = vshll.u32 %v1786_v16, 16 }
  0x2a   : > { %1919 = vmatmul.mubr.msk.bf16.vlgmr.msra.gmra.mrb[4].mxu1 %vm306_vm3, %v1758_v22  ;;  %v655_v31 = vrot.slane %v654_v23, 4  ;;  %v673_v33 = vrot.slane %v671_v24, 5  ;;  %v810_v34 = vrot.slane %v808_v26, 5  ;;  %v826_v35 = vshrl.u32 %v2271_v21, 16  ;;  %v2330_v23 = vld [vmem:[%s2182_s7 + $0x18] sm:$0xe] }
  0x2b   : > { %1929 = vmatpush3.bf16.msra.mxu1 %v2044_v18  ;;  %1930 = vmatprep.mubr.msk.bf16.mxu1 %vm2099_vm0, %v2098_v1  ;;  %v668_v36 = vor.u32 %v667_v27, %v664_v19  ;;  %v813_v37 = vrot.slane %v811_v28, 6  ;;  %v819_v38 = vrot.slane %v817_v29, 5  ;;  %v822_v39 = vrot.slane %v820_v30, 6  ;;  %v1819_v29 = vld [vmem:[%s2182_s7 + $0x1c] sm:$0x3] }
  0x2c   : > { %1913 = vmatmul.mubr.msk.bf16.vlgmr.msra.gmra.mrb[4].mxu0 %vm306_vm3, %v1753_v17  ;;  %v660_v40 = vsel %vm2212_vm8, %v655_v31, %v659_v14  ;;  %1940 = vmatprep.subr.bf16.mxu1 %v2098_v1  ;;  %v828_v41 = vrot.slane %v826_v35, 5  ;;  %v829_v42 = vshll.u32 %v2271_v21, 16  ;;  %v835_v43 = vshrl.u32 %v1787_v25, 16 }
  0x2d   : > { %1923 = vmatpush3.bf16.msra.mxu0 %v2043_v15  ;;  %1924 = vmatprep.mubr.msk.bf16.mxu0 %vm2099_vm0, %v2098_v1  ;;  %v669_v45 = vrot.slane %v668_v36, 4  ;;  %v814_v46 = vor.u32 %v813_v37, %v810_v34  ;;  %v823_v48 = vor.u32 %v822_v39, %v819_v38  ;;  %v838_v49 = vshll.u32 %v1787_v25, 16  ;;  %v2049_v34 = vld [vmem:[%s2481_s1 + $0x48] sm:$0xff]  }
  0x2e   : > { %1934 = vmatprep.subr.bf16.mxu0 %v2098_v1  ;;  %v831_v52 = vrot.slane %v829_v42, 6  ;;  %v837_v53 = vrot.slane %v835_v43, 5  ;;  %v1779_v54 = vrot.slane %v2256_v10, 9  ;;  %v741_v55 = vrot.slane %v2222_v47, 5  ;;  %v2046_v47 = vld [vmem:[%s2481_s1 + $0x30] sm:$0xff]  }
  0x2f   : > { %v674_v58 = vsel %vm2212_vm8, %v669_v45, %v673_v33  ;;  %v815_v60 = vrot.slane %v814_v46, 4  ;;  %v840_v61 = vrot.slane %v838_v49, 6  ;;  %v1780_v62 = vrot.slane %v2271_v21, 9  ;;  %v1832_v49 = vld [vmem:[%s2182_s7 + $0x18] sm:$0xf] }
  0x30   : > { %v1774_v2 = vcombine.low %v660_v40, %v674_v58  ;;  %v832_v3 = vor.u32 %v831_v52, %v828_v41  ;;  %v745_v4 = vrot.slane %v2244_v0, 5  ;;  %v742_v9 = vsel %vm2236_vm10, %v1779_v54, %v741_v55  ;;  %v2048_v40 = vld [vmem:[%s2481_s1 + $0x40] sm:$0xff]  }
  0x31   : > { %v841_v8 = vor.u32 %v840_v61, %v837_v53  ;;  %v969_v10 = vshrl.u32 %v1800_v44, 16  ;;  %v972_v11 = vshll.u32 %v1800_v44, 16  ;;  %v824_v13 = vsel %vm2230_vm9, %v815_v60, %v823_v48  ;;  %v1834_v61 = vld [vmem:[%s2182_s7 + $0x20] sm:$0xf] }
  0x32   : > { %1931 = vmatmul.mubr.msk.bf16.vlgmr.msra.gmra.mrb[8].mxu1 %vm306_vm3, %v1774_v2  ;;  %v833_v14 = vrot.slane %v832_v3, 4  ;;  %v978_v0 = vshll.u32 %v2294_v56, 16  ;;  %v983_v16 = vshrl.u32 %v1802_v63, 16  ;;  %v746_v6 = vsel %vm2236_vm10, %v1780_v62, %v745_v4  ;;  %v2052_v62 = vld [vmem:[%s2481_s1 + $0x58] sm:$0xff]  }
  0x33   : > { %1941 = vmatpush3.bf16.msra.mxu1 %v2047_v59  ;;  %1942 = vmatprep.mubr.msk.bf16.mxu1 %vm2099_vm0, %v2098_v1  ;;  %v971_v17 = vrot.slane %v969_v10, 4  ;;  %v974_v15 = vrot.slane %v972_v11, 5  ;;  %v986_v18 = vshll.u32 %v1802_v63, 16  ;;  %v992_v22 = vshll.u32 %v2308_v5, 16  ;;  %v2364_v3 = vld [vmem:[%s2182_s7 + $0x1c] sm:$0x1] }
  0x34   : > { %1925 = vmatmul.mubr.msk.bf16.vlgmr.msra.gmra.mrb[8].mxu0 %vm306_vm3, %v2045_v51  ;;  %v842_v19 = vsel %vm2230_vm9, %v833_v14, %v841_v8  ;;  %1952 = vmatprep.subr.bf16.mxu1 %v2098_v1  ;;  %v980_v20 = vrot.slane %v978_v0, 5  ;;  %v985_v21 = vrot.slane %v983_v16, 4  ;;  %v1129_v27 = vshrl.u32 %v2311_v7, 16 }
  0x35   : > { %1935 = vmatpush3.bf16.msra.mxu0 %v2046_v47  ;;  %1936 = vmatprep.mubr.msk.bf16.mxu0 %vm2099_vm0, %v2098_v1  ;;  %v1790_v24 = vcombine.low %v824_v13, %v842_v19  ;;  %v975_v25 = vor.u32 %v974_v15, %v971_v17  ;;  %v988_v26 = vrot.slane %v986_v18, 5  ;;  %v994_v28 = vrot.slane %v992_v22, 5 }
  0x36   : > { %1946 = vmatprep.subr.bf16.mxu0 %v2098_v1  ;;  %v1132_v30 = vshll.u32 %v2311_v7, 16  ;;  %v1138_v31 = vshrl.u32 %v1818_v12, 16  ;;  %v1141_v33 = vshll.u32 %v1818_v12, 16  ;;  %v1131_v37 = vrot.slane %v1129_v27, 5  ;;  %v2369_v12 = vld [vmem:[%s2182_s7 + $0x24] sm:$0x1] }
  0x37   : > { %v976_v35 = vrot.slane %v975_v25, 4  ;;  %v989_v36 = vor.u32 %v988_v26, %v985_v21  ;;  %v1147_v38 = vshrl.u32 %v2330_v23, 16  ;;  %v1783_v39 = vcombine.low %v742_v9, %v746_v6  ;;  %v2050_v9 = vld [vmem:[%s2182_s7 + $0x10] ss:$8 sps:$4 sm:$0xff]   ;;  %v1850_v26 = vld [vmem:[%s2182_s7 + $0x1c] sm:$0x3] }
  0x38   : > { %v1134_v41 = vrot.slane %v1132_v30, 6  ;;  %v1140_v42 = vrot.slane %v1138_v31, 5  ;;  %v1150_v43 = vshll.u32 %v2330_v23, 16  ;;  %v1143_v45 = vrot.slane %v1141_v33, 6  ;;  %v2374_v6 = vld [vmem:[%s2182_s7 + $0x18] sm:$0xe] }
  0x39   : > { %v990_v44 = vrot.slane %v989_v36, 4  ;;  %v1149_v46 = vrot.slane %v1147_v38, 5  ;;  %v1156_v48 = vshrl.u32 %v1819_v29, 16  ;;  %v1159_v53 = vshll.u32 %v1819_v29, 16  ;;  %v2051_v21 = vld [vmem:[%s2481_s1 + $0x50] sm:$0xff]  }
  0x3a   : > { %1943 = vmatmul.mubr.msk.bf16.vlgmr.msra.gmra.mrb[12].mxu1 %vm306_vm3, %v1790_v24  ;;  %v1135_v51 = vor.u32 %v1134_v41, %v1131_v37  ;;  %v1152_v52 = vrot.slane %v1150_v43, 6  ;;  %v981_v54 = vsel %vm2212_vm8, %v976_v35, %v980_v20  ;;  %v1144_v2 = vor.u32 %v1143_v45, %v1140_v42  ;;  %v2379_v20 = vld [vmem:[%s2182_s7 + $0x20] sm:$0xe]  ;;  %v1851_v36 = vld [vmem:[%s2182_s7 + $0x24] sm:$0x3]  ;;  %v2054_v45 = vld [vmem:[%s2481_s1 + $0x68] sm:$0xff]  }
  0x3b   : > { %1953 = vmatpush3.bf16.msra.mxu1 %v2049_v34  ;;  %1954 = vmatprep.mubr.msk.bf16.mxu1 %vm2099_vm0, %v2098_v1  ;;  %v995_v55 = vsel %vm2212_vm8, %v990_v44, %v994_v28  ;;  %v1158_v58 = vrot.slane %v1156_v48, 5  ;;  %v1161_v60 = vrot.slane %v1159_v53, 6  ;;  %v1811_v47 = vrot.slane %v2311_v7, 9  ;;  %v2053_v53 = vld [vmem:[%s2481_s1 + $0x60] sm:$0xff]  }
  0x3c   : > { %1937 = vmatmul.mubr.msk.bf16.vlgmr.msra.gmra.mrb[12].mxu0 %vm306_vm3, %v1783_v39  ;;  %1964 = vmatprep.subr.bf16.mxu1 %v2098_v1  ;;  %v1153_v59 = vor.u32 %v1152_v52, %v1149_v46  ;;  %v1136_v63 = vrot.slane %v1135_v51, 4  ;;  %v1290_v4 = vshrl.u32 %v1832_v49, 16  ;;  %v1806_v8 = vcombine.low %v981_v54, %v995_v55 }
  0x3d   : > { %1947 = vmatpush3.bf16.msra.mxu0 %v2048_v40  ;;  %1948 = vmatprep.mubr.msk.bf16.mxu0 %vm2099_vm0, %v2098_v1  ;;  %v1162_v11 = vor.u32 %v1161_v60, %v1158_v58  ;;  %v1293_v13 = vshll.u32 %v1832_v49, 16  ;;  %v1062_v14 = vrot.slane %v2294_v56, 5  ;;  %v1812_v0 = vrot.slane %v2330_v23, 9 }
  0x3e   : > { %1958 = vmatprep.subr.bf16.mxu0 %v2098_v1  ;;  %v1154_v10 = vrot.slane %v1153_v59, 4  ;;  %v1292_v16 = vrot.slane %v1290_v4, 4  ;;  %v1304_v7 = vshrl.u32 %v1834_v61, 16  ;;  %v1066_v17 = vrot.slane %v2308_v5, 5 }
  0x3f   : > { %v1295_v15 = vrot.slane %v1293_v13, 5  ;;  %v1299_v18 = vshll.u32 %v2364_v3, 16  ;;  %v1307_v19 = vshll.u32 %v1834_v61, 16  ;;  %v1145_v56 = vsel %vm2230_vm9, %v1136_v63, %v1144_v2 }
  0x40   : > { %v1163_v22 = vsel %vm2230_vm9, %v1154_v10, %v1162_v11  ;;  %v1306_v23 = vrot.slane %v1304_v7, 4  ;;  %v1313_v24 = vshll.u32 %v2369_v12, 16  ;;  %v1450_v27 = vshrl.u32 %v2374_v6, 16  ;;  %v2055_v10 = vld [vmem:[%s2182_s7 + $0x18] ss:$8 sps:$4 sm:$0xff]   ;;  %v2056_v11 = vld [vmem:[%s2481_s1 + $0x70] sm:$0xff]  }
  0x41   : > { %v1296_v5 = vor.u32 %v1295_v15, %v1292_v16  ;;  %v1309_v25 = vrot.slane %v1307_v19, 5  ;;  %v1453_v28 = vshll.u32 %v2374_v6, 16  ;;  %v1063_v29 = vsel %vm2236_vm10, %v1811_v47, %v1062_v14  ;;  %s1736_s7 = sshll.u32 %s2080_s15, 1 }
  0x42   : > { %1955 = vmatmul.mubr.msk.bf16.vlgmr.msra.gmra.mrb[16].mxu1 %vm306_vm3, %v1806_v8  ;;  %v1468_v30 = vshrl.u32 %v2379_v20, 16  ;;  %v1822_v31 = vcombine.low %v1145_v56, %v1163_v22  ;;  %v1067_v33 = vsel %vm2236_vm10, %v1812_v0, %v1066_v17  ;;  %v1301_v34 = vrot.slane %v1299_v18, 5  ;;  %p241_p7 = scmp.lt.s32.totalorder %s1736_s7, 3 }
  0x43   : > { %1965 = vmatpush3.bf16.msra.mxu1 %v2052_v62  ;;  %1966 = vmatprep.mubr.msk.bf16.mxu1 %vm2099_vm0, %v2098_v1  ;;  %v1310_v35 = vor.u32 %v1309_v25, %v1306_v23  ;;  %v1315_v37 = vrot.slane %v1313_v24, 5  ;;  %v1459_v38 = vshrl.u32 %v1850_v26, 16  ;;  %v1462_v39 = vshll.u32 %v1850_v26, 16 }
  0x44   : > { %1949 = vmatmul.mubr.msk.bf16.vlgmr.msra.gmra.mrb[16].mxu0 %vm306_vm3, %v2050_v9  ;;  %1976 = vmatprep.subr.bf16.mxu1 %v2098_v1  ;;  %v1471_v40 = vshll.u32 %v2379_v20, 16  ;;  %v1297_v41 = vrot.slane %v1296_v5, 4  ;;  %v1452_v42 = vrot.slane %v1450_v27, 5  ;;  %v1455_v43 = vrot.slane %v1453_v28, 6 }
  0x45   : > { %1959 = vmatpush3.bf16.msra.mxu0 %v2051_v21  ;;  %1960 = vmatprep.mubr.msk.bf16.mxu0 %vm2099_vm0, %v2098_v1  ;;  %v1470_v44 = vrot.slane %v1468_v30, 5  ;;  %v1311_v46 = vrot.slane %v1310_v35, 4  ;;  %v1477_v49 = vshrl.u32 %v1851_v36, 16  ;;  %v1480_v51 = vshll.u32 %v1851_v36, 16 }
  0x46   : > { %1970 = vmatprep.subr.bf16.mxu0 %v2098_v1  ;;  %v1473_v48 = vrot.slane %v1471_v40, 6  ;;  %v1815_v52 = vcombine.low %v1063_v29, %v1067_v33  ;;  %v1302_v54 = vsel %vm2212_vm8, %v1297_v41, %v1301_v34  ;;  %v1456_v55 = vor.u32 %v1455_v43, %v1452_v42 }
  0x47   : > { %v1461_v58 = vrot.slane %v1459_v38, 5  ;;  %v1464_v59 = vrot.slane %v1462_v39, 6  ;;  %v1316_v60 = vsel %vm2212_vm8, %v1311_v46, %v1315_v37  ;;  %v1479_v62 = vrot.slane %v1477_v49, 5 }
  0x48   : > { %v1474_v61 = vor.u32 %v1473_v48, %v1470_v44  ;;  %v1482_v63 = vrot.slane %v1480_v51, 6  ;;  %v1838_v2 = vcombine.low %v1302_v54, %v1316_v60  ;;  %v1457_v47 = vrot.slane %v1456_v55, 4 }
  0x49   : > { %v1465_v4 = vor.u32 %v1464_v59, %v1461_v58  ;;  %v1843_v13 = vrot.slane %v2374_v6, 9  ;;  %v1383_v14 = vrot.slane %v2364_v3, 5  ;;  %v1844_v0 = vrot.slane %v2379_v20, 9 }
  0x4a   : > { %1967 = vmatmul.mubr.msk.bf16.vlgmr.msra.gmra.mrb[20].mxu1 %vm306_vm3, %v1822_v31  ;;  %v1475_v8 = vrot.slane %v1474_v61, 4  ;;  %v1483_v9 = vor.u32 %v1482_v63, %v1479_v62  ;;  %v1387_v16 = vrot.slane %v2369_v12, 5 }
  0x4b   : > { %1977 = vmatpush3.bf16.msra.mxu1 %v2054_v45  ;;  %1978 = vmatprep.mubr.msk.bf16.mxu1 %vm2099_vm0, %v2098_v1  ;;  %v1466_v7 = vsel %vm2230_vm9, %v1457_v47, %v1465_v4  ;;  %v1384_v3 = vsel %vm2236_vm10, %v1843_v13, %v1383_v14 }
  0x4c   : > { %1961 = vmatmul.mubr.msk.bf16.vlgmr.msra.gmra.mrb[20].mxu0 %vm306_vm3, %v1815_v52  ;;  %1988 = vmatprep.subr.bf16.mxu1 %v2098_v1  ;;  %v1484_v17 = vsel %vm2230_vm9, %v1475_v8, %v1483_v9  ;;  %v1388_v12 = vsel %vm2236_vm10, %v1844_v0, %v1387_v16 }
  0x4d   : > { %1971 = vmatpush3.bf16.msra.mxu0 %v2053_v53  ;;  %1972 = vmatprep.mubr.msk.bf16.mxu0 %vm2099_vm0, %v2098_v1  ;;  %v1854_v6 = vcombine.low %v1466_v7, %v1484_v17  ;;  %v1847_v15 = vcombine.low %v1384_v3, %v1388_v12 }
  0x4e   : > { %1982 = vmatprep.subr.bf16.mxu0 %v2098_v1 }
  0x52   : > { %1979 = vmatmul.mubr.msk.bf16.vlgmr.msra.gmra.mrb[24].mxu1 %vm306_vm3, %v1838_v2 }
  0x53   : > { %1989 = vmatpush3.bf16.msra.mxu1 %v2057_v32  ;;  %1990 = vmatprep.mubr.msk.bf16.mxu1 %vm2099_vm0, %v2098_v1 }
  0x54   : > { %1973 = vmatmul.mubr.msk.bf16.vlgmr.msra.gmra.mrb[24].mxu0 %vm306_vm3, %v2055_v10 }
  0x55   : > { %1983 = vmatpush3.bf16.msra.mxu0 %v2056_v11  ;;  %1984 = vmatprep.mubr.msk.bf16.mxu0 %vm2099_vm0, %v2098_v1 }
  0x5a   : > { %1991 = vmatmul.mubr.msk.bf16.vlgmr.msra.gmra.mrb[28].mxu1 %vm306_vm3, %v1854_v6 }
  0x5c   : > { %1985 = vmatmul.mubr.msk.bf16.vlgmr.msra.gmra.mrb[28].mxu0 %vm306_vm3, %v1847_v15 }
  0xef   : > { %v399_v50 = vpop.f32.mrb[0].mxu1 }
  0xf0   : > { %v1908_v18 = vpop.f32.mrb[1].mxu1 }
  0xf1   : > { %v402_v19 = vpop.f32.mrb[2].mxu1 }
  0xf2   : > { %v1909_v20 = vpop.f32.mrb[3].mxu1 }
  0xf7   : > { %v344_v21 = vpop.f32.mrb[0].mxu0 }
  0xf8   : > { %v400_v56 = vadd.f32 %v399_v50, %v344_v21  ;;  %v1902_v22 = vpop.f32.mrb[1].mxu0 }
  0xf9   : > { %v347_v1 = vpop.f32.mrb[2].mxu0 }
  0xfa   : > { %v403_v23 = vadd.f32 %v402_v19, %v347_v1  ;;  %v1903_v24 = vpop.f32.mrb[3].mxu0 }
  0xfd   : > { %v571_v5 = vpop.f32.mrb[4].mxu1 }
  0xfe   : > { %v1920_v25 = vpop.f32.mrb[5].mxu1 }
  0xff   : > { %v472_v57 = vpop.f32.mrb[4].mxu0  ;;  %v574_v26 = vpop.f32.mrb[6].mxu1 }
 0x100   : > { %v479_v27 = vadd.f32 %v472_v57, %v400_v56  ;;  %v1914_v28 = vpop.f32.mrb[5].mxu0  ;;  %v1921_v29 = vpop.f32.mrb[7].mxu1 }
 0x101   : > { %v475_v30 = vpop.f32.mrb[6].mxu0 }
 0x102   : > { %v480_v31 = vadd.f32 %v475_v30, %v403_v23  ;;  %v1915_v33 = vpop.f32.mrb[7].mxu0  ;;  %v578_v34 = vadd.f32 %v571_v5, %v479_v27 }
 0x104   : > { %v579_v35 = vadd.f32 %v574_v26, %v480_v31  ;;  %v1557_v26 = vlaneseq  ;;  %v1559_v31 = vstv %s1736_s7  ;;  %s2504_s7 = smov (!%p241_p7, %s1736_s7), 3 }
 0x105   : > { %v724_v36 = vpop.f32.mrb[8].mxu1  ;;  %vm1561_vm11 = vcmp.lt.s32.totalorder %v1559_v31, 3  ;;  %s244_s29 = sadd.s32 %s1737_s27, %s2504_s7 }
 0x106   : > { %v1932_v37 = vpop.f32.mrb[9].mxu1  ;;  %v1558_v33 = vshrl.u32 %v1557_v26, 7  ;;  %s1738_s30 = sshll.u32 %s244_s29, 2 }
 0x107   : > { %v634_v38 = vpop.f32.mrb[8].mxu0  ;;  %v727_v39 = vpop.f32.mrb[10].mxu1  ;;  %v1560_v37 = vadd.s32 1, %v1559_v31  ;;  %s246_s8 = scalar_lea.vmem %s2483_s3, %s1738_s30 }
 0x108   : > { %v641_v40 = vadd.f32 %v634_v38, %v578_v34  ;;  %v1926_v41 = vpop.f32.mrb[9].mxu0  ;;  %v1933_v42 = vpop.f32.mrb[11].mxu1  ;;  %vm1563_vm12 = vcmp.lt.s32.totalorder %v1558_v33, 3 }
 0x109   : > { %v637_v43 = vpop.f32.mrb[10].mxu0  ;;  %vm1562_vm13 = vcmp.lt.s32.totalorder %v1560_v37, 3  ;;  %vm1564_vm14 = vmand %vm1561_vm11, %vm1563_vm12 }
 0x10a   : > { %v642_v44 = vadd.f32 %v637_v43, %v579_v35  ;;  %v1927_v45 = vpop.f32.mrb[11].mxu0  ;;  %v731_v46 = vadd.f32 %v724_v36, %v641_v40  ;;  %v1857_v43 = vld [vmem:[%s2482_s2] ss:$0 sm:$0xff]  ;;  %vm1565_vm15 = vmand %vm1562_vm13, %vm1563_vm12 }
 0x10c   : > { %v732_v48 = vadd.f32 %v727_v39, %v642_v44 }
 0x10d   : > { %v892_v49 = vpop.f32.mrb[12].mxu1 }
 0x10e   : > { %v1944_v51 = vpop.f32.mrb[13].mxu1 }
 0x10f   : > { %v796_v52 = vpop.f32.mrb[12].mxu0  ;;  %v895_v53 = vpop.f32.mrb[14].mxu1 }
 0x110   : > { %v803_v54 = vadd.f32 %v796_v52, %v731_v46  ;;  %v1938_v55 = vpop.f32.mrb[13].mxu0  ;;  %v1945_v58 = vpop.f32.mrb[15].mxu1 }
 0x111   : > { %v799_v59 = vpop.f32.mrb[14].mxu0 }
 0x112   : > { %v804_v60 = vadd.f32 %v799_v59, %v732_v48  ;;  %v1939_v61 = vpop.f32.mrb[15].mxu0  ;;  %v899_v62 = vadd.f32 %v892_v49, %v803_v54 }
 0x114   : > { %v900_v63 = vadd.f32 %v895_v53, %v804_v60 }
 0x115   : > { %v1045_v2 = vpop.f32.mrb[16].mxu1 }
 0x116   : > { %v1956_v32 = vpop.f32.mrb[17].mxu1 }
 0x117   : > { %v955_v47 = vpop.f32.mrb[16].mxu0  ;;  %v1048_v4 = vpop.f32.mrb[18].mxu1 }
 0x118   : > { %v962_v8 = vadd.f32 %v955_v47, %v899_v62  ;;  %v1950_v9 = vpop.f32.mrb[17].mxu0  ;;  %v1957_v10 = vpop.f32.mrb[19].mxu1 }
 0x119   : > { %v958_v11 = vpop.f32.mrb[18].mxu0 }
 0x11a   : > { %v963_v13 = vadd.f32 %v958_v11, %v900_v63  ;;  %v1951_v14 = vpop.f32.mrb[19].mxu0  ;;  %v1052_v0 = vadd.f32 %v1045_v2, %v962_v8 }
 0x11c   : > { %v1053_v16 = vadd.f32 %v1048_v4, %v963_v13 }
 0x11d   : > { %v1213_v7 = vpop.f32.mrb[20].mxu1 }
 0x11e   : > { %v1968_v17 = vpop.f32.mrb[21].mxu1 }
 0x11f   : > { %v1117_v3 = vpop.f32.mrb[20].mxu0  ;;  %v1216_v12 = vpop.f32.mrb[22].mxu1 }
 0x120   : > { %v1124_v6 = vadd.f32 %v1117_v3, %v1052_v0  ;;  %v1962_v15 = vpop.f32.mrb[21].mxu0  ;;  %v1969_v50 = vpop.f32.mrb[23].mxu1 }
 0x121   : > { %v1120_v18 = vpop.f32.mrb[22].mxu0 }
 0x122   : > { %v1125_v19 = vadd.f32 %v1120_v18, %v1053_v16  ;;  %v1963_v20 = vpop.f32.mrb[23].mxu0  ;;  %v1220_v21 = vadd.f32 %v1213_v7, %v1124_v6 }
 0x124   : > { %v1221_v56 = vadd.f32 %v1216_v12, %v1125_v19 }
 0x125   : > { %v1366_v22 = vpop.f32.mrb[24].mxu1 }
 0x126   : > { %v1980_v1 = vpop.f32.mrb[25].mxu1 }
 0x127   : > { %v1276_v23 = vpop.f32.mrb[24].mxu0  ;;  %v1369_v24 = vpop.f32.mrb[26].mxu1 }
 0x128   : > { %v1283_v5 = vadd.f32 %v1276_v23, %v1220_v21  ;;  %v1974_v25 = vpop.f32.mrb[25].mxu0  ;;  %v1981_v57 = vpop.f32.mrb[27].mxu1 }
 0x129   : > { %v1279_v27 = vpop.f32.mrb[26].mxu0 }
 0x12a   : > { %v1284_v28 = vadd.f32 %v1279_v27, %v1221_v56  ;;  %v1975_v29 = vpop.f32.mrb[27].mxu0  ;;  %v1373_v30 = vadd.f32 %v1366_v22, %v1283_v5 }
 0x12c   : > { %v1374_v34 = vadd.f32 %v1369_v24, %v1284_v28 }
 0x12d   : > { %v1534_v35 = vpop.f32.mrb[28].mxu1 }
 0x12e   : > { %v1992_v36 = vpop.f32.mrb[29].mxu1 }
 0x12f   : > { %v1438_v38 = vpop.f32.mrb[28].mxu0  ;;  %v1537_v39 = vpop.f32.mrb[30].mxu1 }
 0x130   : > { %v1445_v40 = vadd.f32 %v1438_v38, %v1373_v30  ;;  %v1986_v41 = vpop.f32.mrb[29].mxu0  ;;  %v1993_v42 = vpop.f32.mrb[31].mxu1 }
 0x131   : > { %v1441_v44 = vpop.f32.mrb[30].mxu0 }
 0x132   : > { %v1541_v45 = vadd.f32 %v1534_v35, %v1445_v40  ;;  %v1446_v46 = vadd.f32 %v1441_v44, %v1374_v34  ;;  %v1987_v48 = vpop.f32.mrb[31].mxu0 }
 0x134   : > { %v1550_v49 = vadd.f32 %v1857_v43, %v1541_v45  ;;  %v1542_v51 = vadd.f32 %v1537_v39, %v1446_v46 }
 0x136   : > { %v1570_v52 = vsel %vm1564_vm14, %v1550_v49, 0.0  ;;  %v1551_v53 = vadd.f32 %v1857_v43, %v1542_v51 }
 0x137   : > { %v1580_v58 = vmul.f32 %v1570_v52, %v1570_v52 }
 0x138   : > { %v1864_v54 = vpack.c.bf16 %v1551_v53, %v1550_v49  ;;  %v1571_v55 = vsel %vm1565_vm15, %v1551_v53, 0.0 }
 0x139   : > { %v1572_v59 = vadd.f32 %v1571_v55, %v1570_v52  ;;  %v1581_v60 = vmul.f32 %v1571_v55, %v1571_v55 }
 0x13a   : > { %1865 = vst [vmem:[%s246_s8] sm:$0xff] %v1864_v54  }
 0x13b   : > { %v1573_v61 = vrot.slane %v1572_v59, 4  ;;  %v1582_v62 = vadd.f32 %v1581_v60, %v1580_v58 }
 0x13d   : > { %v1574_v63 = vadd.f32 %v1573_v61, %v1572_v59  ;;  %v1583_v2 = vrot.slane %v1582_v62, 4 }
 0x13f   : > { %v1575_v32 = vrot.slane %v1574_v63, 2  ;;  %v1584_v47 = vadd.f32 %v1583_v2, %v1582_v62 }
 0x141   : > { %v1576_v4 = vadd.f32 %v1575_v32, %v1574_v63  ;;  %v1585_v8 = vrot.slane %v1584_v47, 2 }
 0x143   : > { %v1577_v9 = vrot.slane %v1576_v4, 1  ;;  %v1586_v10 = vadd.f32 %v1585_v8, %v1584_v47 }
 0x145   : > { %v1578_v11 = vadd.f32 %v1577_v9, %v1576_v4  ;;  %v1587_v13 = vrot.slane %v1586_v10, 1 }
 0x147   : > { %1579 = vst [vmem:[%s255_s14] sm:$0x1] %v1578_v11  ;;  %v1588_v14 = vadd.f32 %v1587_v13, %v1586_v10 }
 0x149   : > { %1589 = vst [vmem:[%s255_s14 + $0x1] sm:$0x1] %v1588_v14 }
 0x14a PF: > { %s15_s19 = sadd.s32 1, %s2096_s19   ;;  %s2491_s15 = smov %s2088_s17 }
 0x14b   : > { %p12_p8 = scmp.ge.s32.totalorder %s15_s19, 6   ;;  %s2492_s16 = smov %s2092_s18 }
 0x14c   : > { %s2493_s17 = smov %s2496_s20  ;;  %s2494_s18 = smov %s2500_s21 }
 0x14d   :  { %14 = sbr.rel (!%p12_p8) target bundleno = 3 (0x3), region = 92 }

// kernel: discriminator_forward.7
= control target key start
LH: loop header
LB: loop body
LE: loop exit
PB: predicated region body
PF: predicated region fallthrough
CT: control target
= control target key end

     0   :  { %s1532_s12 = smov 0   ;;  %s1534_s13 = smov 0   ;;  %s1759_s0 = inlined_call_operand.vmem [shape: bf16[2,2,4,11,8], index: 0, kind: input, shape index: {}]   ;;  %s1760_s1 = inlined_call_operand.vmem [shape: bf16[16,8,128], index: 1, kind: input, shape index: {}]   ;;  %s1761_s2 = inlined_call_operand.vmem [shape: f32[1,128], index: 2, kind: input, shape index: {}]   ;;  %s1762_s3 = inlined_call_operand.vmem [shape: f32[2,2,8,128], index: 3, kind: output, shape index: {}]  }
   0x1   :  { %s1536_s14 = smov 0   ;;  %s1538_s15 = smov 0  }
   0x2   :  { %s1540_s16 = smov 0  }
   0x3 LB: > { %s22_s17 = sadd.s32 1, %s1500_s14  ;;  %s25_s18 = sadd.s32 1, %s1504_s15  ;;  %s1508_s16 = sphi %s1540_s16, %s13_s16   ;;  %s1504_s15 = sphi %s1538_s15, %s1766_s15   ;;  %s1500_s14 = sphi %s1536_s14, %s1765_s14   ;;  %s1496_s13 = sphi %s1534_s13, %s1764_s13   ;;  %s1492_s12 = sphi %s1532_s12, %s1763_s12  }
   0x4   : > { %p23_p0 = scmp.ge.s32.totalorder %s22_s17, 2  ;;  %p1221_p1 = scmp.ge.s32.totalorder %s1508_s16, 1 }
   0x5   : > { %p157_p2 = scmp.lt.s32.totalorder %s1508_s16, 5 }
   0x6   : > { %s1768_s17 = smov (%p23_p0, %s22_s17), 0  ;;  %s1770_s18 = smov (!%p23_p0, %s25_s18), %s1504_s15 }
   0x7   : > { %p158_p3 = pnand %p1221_p1, %p157_p2  ;;  %p27_p4 = scmp.ge.s32.totalorder %s1770_s18, 2 }
   0x8   : > { %v1227_v0 = vld [vmem:[%s1760_s1 + $0x4] sm:$0xf] (!%p158_p3)  ;;  %vm227_vm0 = vcmask (!%p158_p3), 1043456   ;;  %v207_v1 = vld [vmem:[%s1760_s1] sm:$0xf] (!%p158_p3)  ;;  %v1510_v2 = vmov (!%p158_p3), 0.0  }
   0x9   : > { %s1772_s18 = smov (%p27_p4, %s1770_s18), 0  ;;  %161 = sbr.rel (%p158_p3) target bundleno = 305 (0x131), region = 32 }
   0xa   : > { %1320 = vmatprep.subr.bf16.mxu0 (!%p158_p3), %v1510_v2  ;;  %1326 = vmatprep.subr.bf16.mxu1 (!%p158_p3), %v1510_v2  ;;  %v229_v3 = vsel (!%p158_p3), %vm227_vm0, %v1227_v0, 0  ;;  %v275_v4 = vsel (!%p158_p3), %vm227_vm0, %v207_v1, 0  ;;  %p188_p5 = scmp.lt.s32.totalorder (!%p158_p3), %s1496_s13, 1  ;;  %p190_p6 = scmp.lt.s32.totalorder (!%p158_p3), %s1492_s12, 1  ;;  %vm1511_vm1 = vmmov (!%p158_p3), 0   ;;  %vm223_vm2 = vcmask (!%p158_p3), 64512  }
   0xb   : > { %1321 = vmatpush3.bf16.msra.mxu0 (!%p158_p3), %v229_v3  ;;  %1327 = vmatpush3.bf16.msra.mxu1 (!%p158_p3), %v275_v4  ;;  %v1234_v5 = vld [vmem:[%s1760_s1 + $0xc] sm:$0xf] (!%p158_p3)  ;;  %v1231_v20 = vld [vmem:[%s1760_s1 + $0x8] sm:$0xf] (!%p158_p3)  ;;  %v1242_v24 = vld [vmem:[%s1760_s1 + $0x14] sm:$0xf] (!%p158_p3) }
   0xc   : > { %1328 = vmatprep.mubr.msk.bf16.mxu1 (!%p158_p3), %vm1511_vm1, %v1510_v2  ;;  %1322 = vmatprep.mubr.msk.bf16.mxu0 (!%p158_p3), %vm1511_vm1, %v1510_v2  ;;  %v389_v6 = vsel (!%p158_p3), %vm227_vm0, %v1234_v5, 0  ;;  %v328_v26 = vsel (!%p158_p3), %vm227_vm0, %v1231_v20, 0  ;;  %v503_v32 = vsel (!%p158_p3), %vm227_vm0, %v1242_v24, 0  ;;  %v1238_v36 = vld [vmem:[%s1760_s1 + $0x10] sm:$0xf] (!%p158_p3) }
   0xd   : > { %1332 = vmatprep.subr.bf16.mxu0 (!%p158_p3), %v1510_v2  ;;  %1338 = vmatprep.subr.bf16.mxu1 (!%p158_p3), %v1510_v2  ;;  %v1250_v38 = vld [vmem:[%s1760_s1 + $0x1c] sm:$0xf] (!%p158_p3)  ;;  %v440_v39 = vsel (!%p158_p3), %vm227_vm0, %v1238_v36, 0  ;;  %v1246_v49 = vld [vmem:[%s1760_s1 + $0x18] sm:$0xf] (!%p158_p3) }
   0xe   : > { %v618_v45 = vsel (!%p158_p3), %vm227_vm0, %v1250_v38, 0  ;;  %v1258_v51 = vld [vmem:[%s1760_s1 + $0x24] sm:$0xf] (!%p158_p3)  ;;  %v557_v52 = vsel (!%p158_p3), %vm227_vm0, %v1246_v49, 0  ;;  %v1254_v62 = vld [vmem:[%s1760_s1 + $0x20] sm:$0xf] (!%p158_p3) }
   0xf   : > { %v732_v58 = vsel (!%p158_p3), %vm227_vm0, %v1258_v51, 0  ;;  %v1266_v0 = vld [vmem:[%s1760_s1 + $0x2c] sm:$0xf] (!%p158_p3)  ;;  %v669_v1 = vsel (!%p158_p3), %vm227_vm0, %v1254_v62, 0 }
  0x10   : > { %s1774_s13 = smov (!%p188_p5, %s1496_s13), 1  ;;  %s1776_s12 = smov (!%p190_p6, %s1492_s12), 1 }
  0x11   : > { %s1223_s23 = sshll.u32 %s1774_s13, 4  ;;  %s1222_s24 = sshll.u32 %s1776_s12, 3 }
  0x12   : > { %s194_s27 = sadd.s32 %s1223_s23, %s1222_s24 }
  0x13   : > { %s1224_s28 = sshll.u32 %s194_s27, 2 }
  0x14   : > { %s1598_s4 = scalar_lea.vmem %s1759_s0, %s1224_s28 }
  0x15   : > { %v206_v7 = vld [vmem:[%s1598_s4] sm:$0xf]  ;;  %v208_v8 = vld [vmem:[%s1598_s4 + $0x4] sm:$0x1]  ;;  %v1240_v12 = vld [vmem:[%s1598_s4 + $0x8] sm:$0xf] }
  0x16   : > { %v317_v9 = vld [vmem:[%s1598_s4] sm:$0xe]  ;;  %v1228_v10 = vcombine.low %v206_v7, %v208_v8  ;;  %1329 = vmatmul.mubr.msk.bf16.vlgmr.msra.gmra.mrb[0].mxu1 %vm223_vm2, %v206_v7  ;;  %v371_v11 = vld [vmem:[%s1598_s4 + $0x4] sm:$0x3]  ;;  %v1608_v13 = vld [vmem:[%s1598_s4 + $0xc] sm:$0x1] }
  0x17   : > { %v1235_v14 = vcombine.low %v317_v9, %v371_v11  ;;  %1339 = vmatpush3.bf16.msra.mxu1 %v389_v6  ;;  %1340 = vmatprep.mubr.msk.bf16.mxu1 %vm1511_vm1, %v1510_v2  ;;  %v1243_v17 = vcombine.low %v1240_v12, %v1608_v13  ;;  %v1245_v29 = vld [vmem:[%s1598_s4 + $0x8] sm:$0xe]  ;;  %v1249_v30 = vld [vmem:[%s1598_s4 + $0xc] sm:$0x3]  ;;  %v1232_v31 = vcombine.low %v317_v9, %v208_v8  ;;  %v1256_v43 = vld [vmem:[%s1598_s4 + $0x10] sm:$0xf] }
  0x18   : > { %v217_v15 = vshrl.u32 %v1228_v10, 16  ;;  %v219_v16 = vshll.u32 %v1228_v10, 16  ;;  %1350 = vmatprep.subr.bf16.mxu1 %v1510_v2  ;;  %v1251_v35 = vcombine.low %v1245_v29, %v1249_v30  ;;  %v1641_v44 = vld [vmem:[%s1598_s4 + $0x14] sm:$0x1]  ;;  %v1237_v50 = vld [vmem:[%s1598_s4 + $0x8] sm:$0xf]  ;;  %v1247_v57 = vcombine.low %v1245_v29, %v1608_v13 }
  0x19   : > { %v378_v18 = vshrl.u32 %v1235_v14, 16  ;;  %v381_v19 = vshll.u32 %v1235_v14, 16  ;;  %v495_v27 = vshll.u32 %v1243_v17, 16  ;;  %v493_v33 = vshrl.u32 %v1243_v17, 16  ;;  %v1261_v55 = vld [vmem:[%s1598_s4 + $0x10] sm:$0xe] }
  0x1a   : > { %v221_v21 = vrot.slane %v219_v16, 1  ;;  %v323_v37 = vrot.slane %v1232_v31, 1  ;;  %v607_v41 = vshrl.u32 %v1251_v35, 16  ;;  %v610_v42 = vshll.u32 %v1251_v35, 16  ;;  %v1265_v56 = vld [vmem:[%s1598_s4 + $0x14] sm:$0x3] }
  0x1b   : > { %v380_v22 = vrot.slane %v378_v18, 1  ;;  %v383_v23 = vrot.slane %v381_v19, 2  ;;  %v497_v34 = vrot.slane %v495_v27, 1  ;;  %v1259_v48 = vcombine.low %v1256_v43, %v1641_v44  ;;  %v1272_v6 = vld [vmem:[%s1598_s4 + $0x18] sm:$0xf] }
  0x1c   : > { %v222_v25 = vor.u32 %v221_v21, %v217_v15  ;;  %v609_v46 = vrot.slane %v607_v41, 1  ;;  %v612_v47 = vrot.slane %v610_v42, 2  ;;  %v1267_v61 = vcombine.low %v1261_v55, %v1265_v56  ;;  %v1273_v7 = vld [vmem:[%s1598_s4 + $0x1c] sm:$0x1]  ;;  %v1262_v12 = vld [vmem:[%s1760_s1 + $0x28] sm:$0xf] }
  0x1d   : > { %v384_v28 = vor.u32 %v383_v23, %v380_v22  ;;  %v498_v40 = vor.u32 %v497_v34, %v493_v33  ;;  %v724_v54 = vshll.u32 %v1259_v48, 16  ;;  %v722_v59 = vshrl.u32 %v1259_v48, 16  ;;  %v1253_v13 = vld [vmem:[%s1598_s4 + $0x10] sm:$0xf]  ;;  %v1274_v14 = vld [vmem:[%s1760_s1 + $0x34] sm:$0xf] }
  0x1e   : > { %1323 = vmatmul.mubr.msk.bf16.vlgmr.msra.gmra.mrb[0].mxu0 %vm223_vm2, %v222_v25  ;;  %v613_v53 = vor.u32 %v612_v47, %v609_v46  ;;  %v552_v63 = vrot.slane %v1247_v57, 1  ;;  %v836_v4 = vshrl.u32 %v1267_v61, 16  ;;  %v839_v5 = vshll.u32 %v1267_v61, 16  ;;  %v1277_v18 = vld [vmem:[%s1598_s4 + $0x18] sm:$0xe] }
  0x1f   : > { %1333 = vmatpush3.bf16.msra.mxu0 %v328_v26  ;;  %1334 = vmatprep.mubr.msk.bf16.mxu0 %vm1511_vm1, %v1510_v2  ;;  %v726_v60 = vrot.slane %v724_v54, 1  ;;  %v847_v8 = vsel %vm227_vm0, %v1266_v0, 0  ;;  %v1275_v11 = vcombine.low %v1272_v6, %v1273_v7  ;;  %v786_v15 = vsel %vm227_vm0, %v1262_v12, 0  ;;  %v1281_v19 = vld [vmem:[%s1598_s4 + $0x1c] sm:$0x3] }
  0x20   : > { %1341 = vmatmul.mubr.msk.bf16.vlgmr.msra.gmra.mrb[4].mxu1 %vm223_vm2, %v384_v28  ;;  %1344 = vmatprep.subr.bf16.mxu0 %v1510_v2  ;;  %v838_v9 = vrot.slane %v836_v4, 1  ;;  %v841_v10 = vrot.slane %v839_v5, 2  ;;  %v1263_v20 = vcombine.low %v1261_v55, %v1641_v44  ;;  %v961_v21 = vsel %vm227_vm0, %v1274_v14, 0  ;;  %v1270_v25 = vld [vmem:[%s1760_s1 + $0x30] sm:$0xf] }
  0x21   : > { %1351 = vmatpush3.bf16.msra.mxu1 %v503_v32  ;;  %1352 = vmatprep.mubr.msk.bf16.mxu1 %vm1511_vm1, %v1510_v2  ;;  %v727_v3 = vor.u32 %v726_v60, %v722_v59  ;;  %v953_v17 = vshll.u32 %v1275_v11, 16  ;;  %v951_v22 = vshrl.u32 %v1275_v11, 16  ;;  %v1283_v24 = vcombine.low %v1277_v18, %v1281_v19  ;;  %v1282_v27 = vld [vmem:[%s1760_s1 + $0x3c] sm:$0xf]  ;;  %v1278_v35 = vld [vmem:[%s1760_s1 + $0x38] sm:$0xf] }
  0x22   : > { %1362 = vmatprep.subr.bf16.mxu1 %v1510_v2  ;;  %v842_v16 = vor.u32 %v841_v10, %v838_v9  ;;  %v781_v26 = vrot.slane %v1263_v20, 1  ;;  %v898_v28 = vsel %vm227_vm0, %v1270_v25, 0  ;;  %v1076_v32 = vsel %vm227_vm0, %v1282_v27, 0  ;;  %v1269_v36 = vld [vmem:[%s1598_s4 + $0x18] sm:$0xf]  ;;  %s1225_s4 = sshll.u32 %s1774_s13, 1 }
  0x23   : > { %v955_v23 = vrot.slane %v953_v17, 1  ;;  %v1065_v30 = vshrl.u32 %v1283_v24, 16  ;;  %v1068_v31 = vshll.u32 %v1283_v24, 16  ;;  %s202_s19 = sadd.s32 %s1225_s4, %s1776_s12 }
  0x24   : > { %s1226_s20 = sshll.u32 %s202_s19, 3 }
  0x25   : > { %v956_v29 = vor.u32 %v955_v23, %v951_v22  ;;  %v1067_v33 = vrot.slane %v1065_v30, 1  ;;  %v1070_v34 = vrot.slane %v1068_v31, 2  ;;  %s204_s13 = scalar_lea.vmem %s1762_s3, %s1226_s20 }
  0x26   : > { %1335 = vmatmul.mubr.msk.bf16.vlgmr.msra.gmra.mrb[4].mxu0 %vm223_vm2, %v323_v37  ;;  %v1015_v37 = vsel %vm227_vm0, %v1278_v35, 0 }
  0x27   : > { %1345 = vmatpush3.bf16.msra.mxu0 %v440_v39  ;;  %1346 = vmatprep.mubr.msk.bf16.mxu0 %vm1511_vm1, %v1510_v2  ;;  %v1071_v38 = vor.u32 %v1070_v34, %v1067_v33  ;;  %v1279_v39 = vcombine.low %v1277_v18, %v1273_v7 }
  0x28   : > { %1353 = vmatmul.mubr.msk.bf16.vlgmr.msra.gmra.mrb[8].mxu1 %vm223_vm2, %v498_v40  ;;  %1356 = vmatprep.subr.bf16.mxu0 %v1510_v2 }
  0x29   : > { %1363 = vmatpush3.bf16.msra.mxu1 %v618_v45  ;;  %1364 = vmatprep.mubr.msk.bf16.mxu1 %vm1511_vm1, %v1510_v2  ;;  %v1010_v40 = vrot.slane %v1279_v39, 1 }
  0x2a   : > { %1374 = vmatprep.subr.bf16.mxu1 %v1510_v2 }
  0x2e   : > { %1347 = vmatmul.mubr.msk.bf16.vlgmr.msra.gmra.mrb[8].mxu0 %vm223_vm2, %v1237_v50 }
  0x2f   : > { %1357 = vmatpush3.bf16.msra.mxu0 %v557_v52  ;;  %1358 = vmatprep.mubr.msk.bf16.mxu0 %vm1511_vm1, %v1510_v2 }
  0x30   : > { %1365 = vmatmul.mubr.msk.bf16.vlgmr.msra.gmra.mrb[12].mxu1 %vm223_vm2, %v613_v53  ;;  %1368 = vmatprep.subr.bf16.mxu0 %v1510_v2 }
  0x31   : > { %1375 = vmatpush3.bf16.msra.mxu1 %v732_v58  ;;  %1376 = vmatprep.mubr.msk.bf16.mxu1 %vm1511_vm1, %v1510_v2 }
  0x32   : > { %1386 = vmatprep.subr.bf16.mxu1 %v1510_v2 }
  0x36   : > { %1359 = vmatmul.mubr.msk.bf16.vlgmr.msra.gmra.mrb[12].mxu0 %vm223_vm2, %v552_v63 }
  0x37   : > { %1369 = vmatpush3.bf16.msra.mxu0 %v669_v1  ;;  %1370 = vmatprep.mubr.msk.bf16.mxu0 %vm1511_vm1, %v1510_v2 }
  0x38   : > { %1377 = vmatmul.mubr.msk.bf16.vlgmr.msra.gmra.mrb[16].mxu1 %vm223_vm2, %v727_v3  ;;  %1380 = vmatprep.subr.bf16.mxu0 %v1510_v2 }
  0x39   : > { %1387 = vmatpush3.bf16.msra.mxu1 %v847_v8  ;;  %1388 = vmatprep.mubr.msk.bf16.mxu1 %vm1511_vm1, %v1510_v2 }
  0x3a   : > { %1398 = vmatprep.subr.bf16.mxu1 %v1510_v2 }
  0x3e   : > { %1371 = vmatmul.mubr.msk.bf16.vlgmr.msra.gmra.mrb[16].mxu0 %vm223_vm2, %v1253_v13 }
  0x3f   : > { %1381 = vmatpush3.bf16.msra.mxu0 %v786_v15  ;;  %1382 = vmatprep.mubr.msk.bf16.mxu0 %vm1511_vm1, %v1510_v2 }
  0x40   : > { %1389 = vmatmul.mubr.msk.bf16.vlgmr.msra.gmra.mrb[20].mxu1 %vm223_vm2, %v842_v16  ;;  %1392 = vmatprep.subr.bf16.mxu0 %v1510_v2 }
  0x41   : > { %1399 = vmatpush3.bf16.msra.mxu1 %v961_v21  ;;  %1400 = vmatprep.mubr.msk.bf16.mxu1 %vm1511_vm1, %v1510_v2 }
  0x42   : > { %1410 = vmatprep.subr.bf16.mxu1 %v1510_v2 }
  0x46   : > { %1383 = vmatmul.mubr.msk.bf16.vlgmr.msra.gmra.mrb[20].mxu0 %vm223_vm2, %v781_v26 }
  0x47   : > { %1393 = vmatpush3.bf16.msra.mxu0 %v898_v28  ;;  %1394 = vmatprep.mubr.msk.bf16.mxu0 %vm1511_vm1, %v1510_v2 }
  0x48   : > { %1401 = vmatmul.mubr.msk.bf16.vlgmr.msra.gmra.mrb[24].mxu1 %vm223_vm2, %v956_v29  ;;  %1404 = vmatprep.subr.bf16.mxu0 %v1510_v2 }
  0x49   : > { %1411 = vmatpush3.bf16.msra.mxu1 %v1076_v32  ;;  %1412 = vmatprep.mubr.msk.bf16.mxu1 %vm1511_vm1, %v1510_v2 }
  0x4e   : > { %1395 = vmatmul.mubr.msk.bf16.vlgmr.msra.gmra.mrb[24].mxu0 %vm223_vm2, %v1269_v36 }
  0x4f   : > { %1405 = vmatpush3.bf16.msra.mxu0 %v1015_v37  ;;  %1406 = vmatprep.mubr.msk.bf16.mxu0 %vm1511_vm1, %v1510_v2 }
  0x50   : > { %1413 = vmatmul.mubr.msk.bf16.vlgmr.msra.gmra.mrb[28].mxu1 %vm223_vm2, %v1071_v38 }
  0x56   : > { %1407 = vmatmul.mubr.msk.bf16.vlgmr.msra.gmra.mrb[28].mxu0 %vm223_vm2, %v1010_v40 }
  0xe9   : > { %v311_v41 = vpop.f32.mrb[0].mxu1 }
  0xea   : > { %v1330_v42 = vpop.f32.mrb[1].mxu1 }
  0xeb   : > { %v314_v43 = vpop.f32.mrb[2].mxu1 }
  0xec   : > { %v1331_v44 = vpop.f32.mrb[3].mxu1 }
  0xf1   : > { %v265_v45 = vpop.f32.mrb[0].mxu0 }
  0xf2   : > { %v312_v46 = vadd.f32 %v311_v41, %v265_v45  ;;  %v1324_v47 = vpop.f32.mrb[1].mxu0 }
  0xf3   : > { %v268_v48 = vpop.f32.mrb[2].mxu0  ;;  %v425_v49 = vpop.f32.mrb[4].mxu1 }
  0xf4   : > { %v1325_v50 = vpop.f32.mrb[3].mxu0  ;;  %v1342_v51 = vpop.f32.mrb[5].mxu1 }
  0xf5   : > { %v428_v52 = vpop.f32.mrb[6].mxu1 }
  0xf6   : > { %v1343_v53 = vpop.f32.mrb[7].mxu1 }
  0xf7   : > { %v1285_v53 = vld [vmem:[%s1761_s2] ss:$0 sm:$0xff] }
  0xf9   : > { %v364_v54 = vpop.f32.mrb[4].mxu0 }
  0xfa   : > { %v370_v2 = vadd.f32 %v364_v54, %v312_v46  ;;  %v1336_v55 = vpop.f32.mrb[5].mxu0 }
  0xfb   : > { %v367_v56 = vpop.f32.mrb[6].mxu0  ;;  %v539_v57 = vpop.f32.mrb[8].mxu1 }
  0xfc   : > { %v1337_v58 = vpop.f32.mrb[7].mxu0  ;;  %v431_v59 = vadd.f32 %v425_v49, %v370_v2  ;;  %v1354_v60 = vpop.f32.mrb[9].mxu1 }
  0xfd   : > { %v542_v61 = vpop.f32.mrb[10].mxu1 }
  0xfe   : > { %v1355_v62 = vpop.f32.mrb[11].mxu1 }
 0x101   : > { %v476_v63 = vpop.f32.mrb[8].mxu0 }
 0x102   : > { %v482_v0 = vadd.f32 %v476_v63, %v431_v59  ;;  %v1348_v1 = vpop.f32.mrb[9].mxu0 }
 0x103   : > { %v479_v3 = vpop.f32.mrb[10].mxu0  ;;  %v654_v4 = vpop.f32.mrb[12].mxu1 }
 0x104   : > { %v1349_v5 = vpop.f32.mrb[11].mxu0  ;;  %v545_v6 = vadd.f32 %v539_v57, %v482_v0  ;;  %v1366_v7 = vpop.f32.mrb[13].mxu1 }
 0x105   : > { %v657_v8 = vpop.f32.mrb[14].mxu1 }
 0x106   : > { %v1367_v9 = vpop.f32.mrb[15].mxu1 }
 0x109   : > { %v593_v10 = vpop.f32.mrb[12].mxu0 }
 0x10a   : > { %v599_v11 = vadd.f32 %v593_v10, %v545_v6  ;;  %v1360_v12 = vpop.f32.mrb[13].mxu0 }
 0x10b   : > { %v596_v13 = vpop.f32.mrb[14].mxu0  ;;  %v768_v14 = vpop.f32.mrb[16].mxu1 }
 0x10c   : > { %v1361_v15 = vpop.f32.mrb[15].mxu0  ;;  %v660_v16 = vadd.f32 %v654_v4, %v599_v11  ;;  %v1378_v17 = vpop.f32.mrb[17].mxu1 }
 0x10d   : > { %v771_v18 = vpop.f32.mrb[18].mxu1 }
 0x10e   : > { %v1379_v19 = vpop.f32.mrb[19].mxu1 }
 0x111   : > { %v705_v20 = vpop.f32.mrb[16].mxu0 }
 0x112   : > { %v711_v21 = vadd.f32 %v705_v20, %v660_v16  ;;  %v1372_v22 = vpop.f32.mrb[17].mxu0 }
 0x113   : > { %v708_v23 = vpop.f32.mrb[18].mxu0  ;;  %v883_v24 = vpop.f32.mrb[20].mxu1 }
 0x114   : > { %v1373_v25 = vpop.f32.mrb[19].mxu0  ;;  %v774_v26 = vadd.f32 %v768_v14, %v711_v21  ;;  %v1390_v27 = vpop.f32.mrb[21].mxu1 }
 0x115   : > { %v886_v28 = vpop.f32.mrb[22].mxu1 }
 0x116   : > { %v1391_v29 = vpop.f32.mrb[23].mxu1 }
 0x119   : > { %v822_v30 = vpop.f32.mrb[20].mxu0 }
 0x11a   : > { %v828_v31 = vadd.f32 %v822_v30, %v774_v26  ;;  %v1384_v32 = vpop.f32.mrb[21].mxu0 }
 0x11b   : > { %v825_v33 = vpop.f32.mrb[22].mxu0  ;;  %v997_v34 = vpop.f32.mrb[24].mxu1 }
 0x11c   : > { %v1385_v35 = vpop.f32.mrb[23].mxu0  ;;  %v889_v36 = vadd.f32 %v883_v24, %v828_v31  ;;  %v1402_v37 = vpop.f32.mrb[25].mxu1 }
 0x11d   : > { %v1000_v38 = vpop.f32.mrb[26].mxu1 }
 0x11e   : > { %v1403_v39 = vpop.f32.mrb[27].mxu1 }
 0x121   : > { %v934_v40 = vpop.f32.mrb[24].mxu0 }
 0x122   : > { %v940_v41 = vadd.f32 %v934_v40, %v889_v36  ;;  %v1396_v42 = vpop.f32.mrb[25].mxu0 }
 0x123   : > { %v937_v43 = vpop.f32.mrb[26].mxu0  ;;  %v1112_v44 = vpop.f32.mrb[28].mxu1 }
 0x124   : > { %v1397_v45 = vpop.f32.mrb[27].mxu0  ;;  %v1003_v46 = vadd.f32 %v997_v34, %v940_v41  ;;  %v1414_v47 = vpop.f32.mrb[29].mxu1 }
 0x125   : > { %v1115_v48 = vpop.f32.mrb[30].mxu1 }
 0x126   : > { %v1415_v49 = vpop.f32.mrb[31].mxu1 }
 0x129   : > { %v1051_v50 = vpop.f32.mrb[28].mxu0 }
 0x12a   : > { %v1057_v51 = vadd.f32 %v1051_v50, %v1003_v46  ;;  %v1408_v52 = vpop.f32.mrb[29].mxu0 }
 0x12b   : > { %v1054_v54 = vpop.f32.mrb[30].mxu0 }
 0x12c   : > { %v1118_v2 = vadd.f32 %v1112_v44, %v1057_v51  ;;  %v1409_v55 = vpop.f32.mrb[31].mxu0 }
 0x12e   : > { %v1126_v56 = vadd.f32 %v1285_v53, %v1118_v2 }
 0x130   : > { %1127 = vst [vmem:[%s204_s13] sm:$0xff] %v1126_v56 }
 0x131 PF: > { %s13_s16 = sadd.s32 1, %s1508_s16   ;;  %s1763_s12 = smov %s1500_s14 }
 0x132   : > { %p10_p7 = scmp.ge.s32.totalorder %s13_s16, 6   ;;  %s1764_s13 = smov %s1504_s15 }
 0x133   : > { %s1765_s14 = smov %s1768_s17  ;;  %s1766_s15 = smov %s1772_s18 }
 0x134   :  { %12 = sbr.rel (!%p10_p7) target bundleno = 3 (0x3), region = 80 }

</bundles_post_ra>
